<compile_context>
chip_gen: v7x
topology: tpu7x:2x2x1
jax: 0.10.0
libtpu: 0.0.40
codegen_flags: <defaults>
</compile_context>

<pallas_src>
from functools import partial

import jax
import jax.numpy as jnp
from jax.experimental import pallas as pl
from jax.experimental.pallas import tpu as pltpu

EPS = 1e-5
NEG_SLOPE = 0.2

Z_DIM = 100
Z_PAD = 128          # lane/MXU-aligned contraction dim for the first matmul
OUT_DIM = 28 * 28    # 784  (written directly; no output padding / slicing)

HIDDEN_DIMS = [(Z_PAD, 128), (128, 256), (256, 512), (512, 1024), (1024, OUT_DIM)]


def _round_up(x, m):
    return ((x + m - 1) // m) * m


def _device_kind():
    try:
        return jax.devices()[0].device_kind.lower()
    except Exception:
        return ""


def _use_bf16_epilogue():
    # v5e has no bf16 VALU -> keep the bias+LeakyReLU epilogue in f32 there.
    return "v5" not in _device_kind()


def _default_tile(batch):
    b8 = _round_up(max(int(batch), 1), 8)
    kind = _device_kind()
    if "v7" in kind and b8 >= 16:
        # v7x: 2 TensorCores/chip -> keep >= 2 "parallel" tiles so both cores work.
        return min(_round_up(-(-b8 // 2), 8), 512)
    # v5e / v6e: single TensorCore -> one big tile avoids per-grid-step overhead.
    return min(b8, 512)


def _leaky_relu(x):
    # max(x, 0.2*x) == LeakyReLU(0.2) for 0 < slope < 1 (2 VALU ops, no select).
    return jnp.maximum(x, NEG_SLOPE * x)


def _bn(x, gamma, beta, mean, var):
    # BatchNorm1d eval mode (reference only; folded into weights in kernel path).
    inv = jax.lax.rsqrt(var + EPS)
    return (x - mean) * inv * gamma + beta


# -----------------------------------------------------------------------------
# Kernel
# -----------------------------------------------------------------------------
def make_generator_kernel(use_bf16_epilogue):
    act_dtype = jnp.bfloat16 if use_bf16_epilogue else jnp.float32

    def generator_kernel(z_ref,
                         w1_ref, b1_ref,
                         w2_ref, b2_ref,
                         w3_ref, b3_ref,
                         w4_ref, b4_ref,
                         w5_ref, b5_ref,
                         out_ref):
        """Whole MLP for one (tb, 128) batch tile.  Weights bf16 with BN folded;
        MXU accumulation in f32; hidden epilogue in `act_dtype`."""

        def hidden(x, w_ref, b_ref):
            y = jnp.dot(x, w_ref[...], preferred_element_type=jnp.float32)
            y = y.astype(act_dtype) + b_ref[...].astype(act_dtype)
            return _leaky_relu(y).astype(jnp.bfloat16)   # feeds next MXU dot

        h = z_ref[...]                                   # (tb, 128) bf16, zero-padded K
        h = hidden(h, w1_ref, b1_ref)                    # Linear(100->128) + LeakyReLU (+Dropout=id)
        h = hidden(h, w2_ref, b2_ref)                    # Linear(128->256) [BN folded] + LeakyReLU
        h = hidden(h, w3_ref, b3_ref)                    # Linear(256->512) [BN folded] + LeakyReLU
        h = hidden(h, w4_ref, b4_ref)                    # Linear(512->1024)[BN folded] + LeakyReLU
        # Final layer kept in f32 (pre-tanh precision), bias f32, tanh on EUP.
        y = jnp.dot(h, w5_ref[...], preferred_element_type=jnp.float32) + b5_ref[...]
        out_ref[...] = jnp.tanh(y)

    return generator_kernel


# -----------------------------------------------------------------------------
# Wrapper
# -----------------------------------------------------------------------------
@partial(jax.jit, static_argnames=("tb", "use_bf16_epilogue"))
def _generator_forward_impl(z, prepared_params, *, tb, use_bf16_epilogue):
    B = z.shape[0]
    n_tiles = -(-B // tb)
    Bp = n_tiles * tb

    # Zero-pad batch to a tile multiple and the z feature dim 100 -> 128; bf16.
    z_p = jnp.zeros((Bp, Z_PAD), jnp.bfloat16).at[:B, :Z_DIM].set(
        z.astype(jnp.bfloat16))

    # Batch-tiled input/output; all parameters VMEM-resident across the grid.
    in_specs = [pl.BlockSpec((tb, Z_PAD), lambda i: (0, 0) if Bp == tb else (i, 0))]
    for p in prepared_params:
        in_specs.append(pl.BlockSpec(p.shape, lambda i: (0, 0)))
    out_spec = pl.BlockSpec((tb, OUT_DIM), lambda i: (i, 0))

    # Advisory cost hint for XLA scheduling around this small custom call.
    flops = 2 * Bp * sum(din * dout for din, dout in HIDDEN_DIMS)
    transcendentals = Bp * OUT_DIM
    param_bytes = sum(int(p.size) * p.dtype.itemsize for p in prepared_params)
    bytes_accessed = param_bytes + Bp * Z_PAD * 2 + Bp * OUT_DIM * 4
    cost = pl.CostEstimate(flops=flops, transcendentals=transcendentals,
                           bytes_accessed=bytes_accessed)

    out = pl.pallas_call(
        make_generator_kernel(use_bf16_epilogue),
        out_shape=jax.ShapeDtypeStruct((Bp, OUT_DIM), jnp.float32),
        grid_spec=pltpu.PrefetchScalarGridSpec(
            num_scalar_prefetch=0,
            grid=(n_tiles,),
            in_specs=in_specs,
            out_specs=out_spec,
        ),
        compiler_params=pltpu.CompilerParams(
            dimension_semantics=("parallel",),
            vmem_limit_bytes=32 << 20,
        ),
        cost_estimate=cost,
    )(z_p, *prepared_params)

    return out if Bp == B else out[:B]


def generator_forward(z, prepared_params, *, tb=None):
    """z: (B, 100) float32 -> (B, 784) float32."""
    if tb is None:
        tb = _default_tile(z.shape[0])
    tb = max(8, _round_up(int(tb), 8))
    return _generator_forward_impl(z, tuple(prepared_params), tb=tb,
                                   use_bf16_epilogue=_use_bf16_epilogue())


# -----------------------------------------------------------------------------
# Parameters
# -----------------------------------------------------------------------------
def init_params(key):
    """Deterministic synthetic parameters matching the nn.Module shapes.

    Linear weights stored transposed: (in, out).  Biases / BN params as (1, N).
    """
    dims = [(100, 128), (128, 256), (256, 512), (512, 1024), (1024, 784)]
    bn_layers = {1: 256, 2: 512, 3: 1024}

    params = []
    keys = jax.random.split(key, 32)
    ki = 0
    for li, (din, dout) in enumerate(dims):
        bound = 1.0 / jnp.sqrt(din)
        w = jax.random.uniform(keys[ki], (din, dout), jnp.float32, -bound, bound); ki += 1
        b = jax.random.uniform(keys[ki], (1, dout), jnp.float32, -bound, bound); ki += 1
        params += [w, b]
        if li in bn_layers:
            n = bn_layers[li]
            gamma = 1.0 + 0.1 * jax.random.normal(keys[ki], (1, n), jnp.float32); ki += 1
            beta = 0.1 * jax.random.normal(keys[ki], (1, n), jnp.float32); ki += 1
            mean = 0.05 * jax.random.normal(keys[ki], (1, n), jnp.float32); ki += 1
            var = jax.random.uniform(keys[ki], (1, n), jnp.float32, 0.5, 1.5); ki += 1
            params += [gamma, beta, mean, var]
    return params


def prepare_params(params):
    """Fold eval-mode BN into the preceding Linear, pad w1's K dim 100->128,
    and cast weights to bf16 (biases stay f32)."""
    (w1, b1,
     w2, b2, g2, be2, m2, v2,
     w3, b3, g3, be3, m3, v3,
     w4, b4, g4, be4, m4, v4,
     w5, b5) = params

    def fold(w, b, g, be, m, v):
        s = g * jax.lax.rsqrt(v + EPS)           # (1, N)
        return w * s, (b - m) * s + be

    w2f, b2f = fold(w2, b2, g2, be2, m2, v2)
    w3f, b3f = fold(w3, b3, g3, be3, m3, v3)
    w4f, b4f = fold(w4, b4, g4, be4, m4, v4)

    # Pad K = 100 -> 128 with zero rows (matches the zero-padded z features).
    w1p = jnp.zeros((Z_PAD, w1.shape[1]), jnp.float32).at[:Z_DIM, :].set(w1)

    ws = [w1p, w2f, w3f, w4f, w5]
    bs = [b1, b2f, b3f, b4f, b5]
    prepared = []
    for w, b in zip(ws, bs):
        prepared += [w.astype(jnp.bfloat16), b.astype(jnp.float32)]
    return tuple(prepared)


# -----------------------------------------------------------------------------
# References
# -----------------------------------------------------------------------------
def reference_forward_f32(z, params):
    """Pure-JAX f32 reference with explicit BN (original module semantics)."""
    (w1, b1,
     w2, b2, g2, be2, m2, v2,
     w3, b3, g3, be3, m3, v3,
     w4, b4, g4, be4, m4, v4,
     w5, b5) = params
    h = _leaky_relu(z @ w1 + b1)
    h = _leaky_relu(_bn(h @ w2 + b2, g2, be2, m2, v2))
    h = _leaky_relu(_bn(h @ w3 + b3, g3, be3, m3, v3))
    h = _leaky_relu(_bn(h @ w4 + b4, g4, be4, m4, v4))
    return jnp.tanh(h @ w5 + b5)


def reference_forward_prepared(z, prepared, *, use_bf16_epilogue):
    """Pure-JAX reference that uses the exact prepared (folded/padded/bf16)
    parameters and the same epilogue dtype, for a tight check of the kernel."""
    (w1, b1, w2, b2, w3, b3, w4, b4, w5, b5) = prepared
    act = jnp.bfloat16 if use_bf16_epilogue else jnp.float32

    h = jnp.zeros((z.shape[0], Z_PAD), jnp.bfloat16).at[:, :Z_DIM].set(
        z.astype(jnp.bfloat16))
    for w, b in ((w1, b1), (w2, b2), (w3, b3), (w4, b4)):
        y = jnp.dot(h, w, preferred_element_type=jnp.float32)
        y = y.astype(act) + b.astype(act)
        h = _leaky_relu(y).astype(jnp.bfloat16)
    y = jnp.dot(h, w5, preferred_element_type=jnp.float32) + b5
    return jnp.tanh(y)


# -----------------------------------------------------------------------------
# Main
# -----------------------------------------------------------------------------
if __name__ == "__main__":
    key = jax.random.PRNGKey(0)
    kz, kp = jax.random.split(key)

    B = 64  # small; single tile on v5e/v6e, two 32-row tiles on v7x
    z = jax.random.normal(kz, (B, Z_DIM), jnp.float32)

    params = init_params(kp)
    prepared = prepare_params(params)

    out = generator_forward(z, prepared)
    out = jax.block_until_ready(out)
    assert out.shape == (B, OUT_DIM), out.shape

    # Tight check: kernel vs identical-math JAX reference (same bf16 weights /
    # same epilogue dtype).
    ref_exact = reference_forward_prepared(z, prepared,
                                           use_bf16_epilogue=_use_bf16_epilogue())
    err_exact = float(jnp.max(jnp.abs(out - ref_exact)))
    assert jnp.allclose(out, ref_exact, atol=2e-3, rtol=2e-3), err_exact

    # Loose check vs the original f32 (unfolded-BN) module semantics; error is
    # dominated by the bf16 weight/activation quantization.
    ref_f32 = reference_forward_f32(z, params)
    err_f32 = float(jnp.max(jnp.abs(out - ref_f32)))
    assert jnp.allclose(out, ref_f32, atol=1e-1, rtol=1e-1), err_f32

    print("KERNEL_OK")
</pallas_src>

<mosaic_0001>
module attributes {stable_mosaic.version = 11 : i64} {
  func.func @generator_kernel(%arg0: i32, %arg1: memref<64x128xbf16, #tpu.memory_space<vmem>>, %arg2: memref<128x128xbf16, #tpu.memory_space<vmem>>, %arg3: memref<1x128xf32, #tpu.memory_space<vmem>>, %arg4: memref<128x256xbf16, #tpu.memory_space<vmem>>, %arg5: memref<1x256xf32, #tpu.memory_space<vmem>>, %arg6: memref<256x512xbf16, #tpu.memory_space<vmem>>, %arg7: memref<1x512xf32, #tpu.memory_space<vmem>>, %arg8: memref<512x1024xbf16, #tpu.memory_space<vmem>>, %arg9: memref<1x1024xf32, #tpu.memory_space<vmem>>, %arg10: memref<1024x784xbf16, #tpu.memory_space<vmem>>, %arg11: memref<1x784xf32, #tpu.memory_space<vmem>>, %arg12: memref<64x784xf32, #tpu.memory_space<vmem>>) attributes {dimension_semantics = [#tpu.dimension_semantics<parallel>], iteration_bounds = array<i64: 1>, scalar_prefetch = 0 : i64, scratch_operands = 0 : i64, tpu.core_type = #tpu.core_type<tc>, window_params = [{pipeline_mode = #tpu.pipeline_mode<synchronous>, transform_indices = @transform_0, window_bounds = array<i64: 64, 128>}, {pipeline_mode = #tpu.pipeline_mode<synchronous>, transform_indices = @transform_1, window_bounds = array<i64: 128, 128>}, {pipeline_mode = #tpu.pipeline_mode<synchronous>, transform_indices = @transform_2, window_bounds = array<i64: 1, 128>}, {pipeline_mode = #tpu.pipeline_mode<synchronous>, transform_indices = @transform_3, window_bounds = array<i64: 128, 256>}, {pipeline_mode = #tpu.pipeline_mode<synchronous>, transform_indices = @transform_4, window_bounds = array<i64: 1, 256>}, {pipeline_mode = #tpu.pipeline_mode<synchronous>, transform_indices = @transform_5, window_bounds = array<i64: 256, 512>}, {pipeline_mode = #tpu.pipeline_mode<synchronous>, transform_indices = @transform_6, window_bounds = array<i64: 1, 512>}, {pipeline_mode = #tpu.pipeline_mode<synchronous>, transform_indices = @transform_7, window_bounds = array<i64: 512, 1024>}, {pipeline_mode = #tpu.pipeline_mode<synchronous>, transform_indices = @transform_8, window_bounds = array<i64: 1, 1024>}, {pipeline_mode = #tpu.pipeline_mode<synchronous>, transform_indices = @transform_9, window_bounds = array<i64: 1024, 784>}, {pipeline_mode = #tpu.pipeline_mode<synchronous>, transform_indices = @transform_10, window_bounds = array<i64: 1, 784>}, {transform_indices = @transform_11, window_bounds = array<i64: 64, 784>}]} {
    %c0 = arith.constant 0 : index
    %c0_0 = arith.constant 0 : index
    %0 = vector.load %arg1[%c0, %c0_0] : memref<64x128xbf16, #tpu.memory_space<vmem>>, vector<64x128xbf16>
    %c0_1 = arith.constant 0 : index
    %c0_2 = arith.constant 0 : index
    %1 = vector.load %arg2[%c0_1, %c0_2] : memref<128x128xbf16, #tpu.memory_space<vmem>>, vector<128x128xbf16>
    %cst = arith.constant dense<0.000000e+00> : vector<64x128xf32>
    %2 = tpu.matmul %0, %1, %cst {dimension_numbers = #tpu.dot_dimension_numbers<[1], [0], [0], [1], [0, 0, 1, 1], [], []>} : vector<64x128xbf16>, vector<128x128xbf16>, vector<64x128xf32> -> vector<64x128xf32>
    %3 = arith.truncf %2 : vector<64x128xf32> to vector<64x128xbf16>
    %c0_3 = arith.constant 0 : index
    %c0_4 = arith.constant 0 : index
    %4 = vector.load %arg3[%c0_3, %c0_4] : memref<1x128xf32, #tpu.memory_space<vmem>>, vector<1x128xf32>
    %5 = arith.truncf %4 : vector<1x128xf32> to vector<1x128xbf16>
    %6 = vector.broadcast %5 : vector<1x128xbf16> to vector<64x128xbf16>
    %7 = arith.addf %3, %6 : vector<64x128xbf16>
    %cst_5 = arith.constant 2.001950e-01 : bf16
    %8 = vector.broadcast %cst_5 : bf16 to vector<64x128xbf16>
    %9 = arith.mulf %8, %7 : vector<64x128xbf16>
    %10 = arith.maximumf %7, %9 : vector<64x128xbf16>
    %c0_6 = arith.constant 0 : index
    %c0_7 = arith.constant 0 : index
    %11 = vector.load %arg4[%c0_6, %c0_7] : memref<128x256xbf16, #tpu.memory_space<vmem>>, vector<128x256xbf16>
    %cst_8 = arith.constant dense<0.000000e+00> : vector<64x256xf32>
    %12 = tpu.matmul %10, %11, %cst_8 {dimension_numbers = #tpu.dot_dimension_numbers<[1], [0], [0], [1], [0, 0, 1, 1], [], []>} : vector<64x128xbf16>, vector<128x256xbf16>, vector<64x256xf32> -> vector<64x256xf32>
    %13 = arith.truncf %12 : vector<64x256xf32> to vector<64x256xbf16>
    %c0_9 = arith.constant 0 : index
    %c0_10 = arith.constant 0 : index
    %14 = vector.load %arg5[%c0_9, %c0_10] : memref<1x256xf32, #tpu.memory_space<vmem>>, vector<1x256xf32>
    %15 = arith.truncf %14 : vector<1x256xf32> to vector<1x256xbf16>
    %16 = vector.broadcast %15 : vector<1x256xbf16> to vector<64x256xbf16>
    %17 = arith.addf %13, %16 : vector<64x256xbf16>
    %cst_11 = arith.constant 2.001950e-01 : bf16
    %18 = vector.broadcast %cst_11 : bf16 to vector<64x256xbf16>
    %19 = arith.mulf %18, %17 : vector<64x256xbf16>
    %20 = arith.maximumf %17, %19 : vector<64x256xbf16>
    %c0_12 = arith.constant 0 : index
    %c0_13 = arith.constant 0 : index
    %21 = vector.load %arg6[%c0_12, %c0_13] : memref<256x512xbf16, #tpu.memory_space<vmem>>, vector<256x512xbf16>
    %cst_14 = arith.constant dense<0.000000e+00> : vector<64x512xf32>
    %22 = tpu.matmul %20, %21, %cst_14 {dimension_numbers = #tpu.dot_dimension_numbers<[1], [0], [0], [1], [0, 0, 1, 1], [], []>} : vector<64x256xbf16>, vector<256x512xbf16>, vector<64x512xf32> -> vector<64x512xf32>
    %23 = arith.truncf %22 : vector<64x512xf32> to vector<64x512xbf16>
    %c0_15 = arith.constant 0 : index
    %c0_16 = arith.constant 0 : index
    %24 = vector.load %arg7[%c0_15, %c0_16] : memref<1x512xf32, #tpu.memory_space<vmem>>, vector<1x512xf32>
    %25 = arith.truncf %24 : vector<1x512xf32> to vector<1x512xbf16>
    %26 = vector.broadcast %25 : vector<1x512xbf16> to vector<64x512xbf16>
    %27 = arith.addf %23, %26 : vector<64x512xbf16>
    %cst_17 = arith.constant 2.001950e-01 : bf16
    %28 = vector.broadcast %cst_17 : bf16 to vector<64x512xbf16>
    %29 = arith.mulf %28, %27 : vector<64x512xbf16>
    %30 = arith.maximumf %27, %29 : vector<64x512xbf16>
    %c0_18 = arith.constant 0 : index
    %c0_19 = arith.constant 0 : index
    %31 = vector.load %arg8[%c0_18, %c0_19] : memref<512x1024xbf16, #tpu.memory_space<vmem>>, vector<512x1024xbf16>
    %cst_20 = arith.constant dense<0.000000e+00> : vector<64x1024xf32>
    %32 = tpu.matmul %30, %31, %cst_20 {dimension_numbers = #tpu.dot_dimension_numbers<[1], [0], [0], [1], [0, 0, 1, 1], [], []>} : vector<64x512xbf16>, vector<512x1024xbf16>, vector<64x1024xf32> -> vector<64x1024xf32>
    %33 = arith.truncf %32 : vector<64x1024xf32> to vector<64x1024xbf16>
    %c0_21 = arith.constant 0 : index
    %c0_22 = arith.constant 0 : index
    %34 = vector.load %arg9[%c0_21, %c0_22] : memref<1x1024xf32, #tpu.memory_space<vmem>>, vector<1x1024xf32>
    %35 = arith.truncf %34 : vector<1x1024xf32> to vector<1x1024xbf16>
    %36 = vector.broadcast %35 : vector<1x1024xbf16> to vector<64x1024xbf16>
    %37 = arith.addf %33, %36 : vector<64x1024xbf16>
    %cst_23 = arith.constant 2.001950e-01 : bf16
    %38 = vector.broadcast %cst_23 : bf16 to vector<64x1024xbf16>
    %39 = arith.mulf %38, %37 : vector<64x1024xbf16>
    %40 = arith.maximumf %37, %39 : vector<64x1024xbf16>
    %c0_24 = arith.constant 0 : index
    %c0_25 = arith.constant 0 : index
    %41 = vector.load %arg10[%c0_24, %c0_25] : memref<1024x784xbf16, #tpu.memory_space<vmem>>, vector<1024x784xbf16>
    %cst_26 = arith.constant dense<0.000000e+00> : vector<64x784xf32>
    %42 = tpu.matmul %40, %41, %cst_26 {dimension_numbers = #tpu.dot_dimension_numbers<[1], [0], [0], [1], [0, 0, 1, 1], [], []>} : vector<64x1024xbf16>, vector<1024x784xbf16>, vector<64x784xf32> -> vector<64x784xf32>
    %c0_27 = arith.constant 0 : index
    %c0_28 = arith.constant 0 : index
    %43 = vector.load %arg11[%c0_27, %c0_28] : memref<1x784xf32, #tpu.memory_space<vmem>>, vector<1x784xf32>
    %44 = vector.broadcast %43 : vector<1x784xf32> to vector<64x784xf32>
    %45 = arith.addf %42, %44 : vector<64x784xf32>
    %46 = math.tanh %45 : vector<64x784xf32>
    %c0_29 = arith.constant 0 : index
    %c0_30 = arith.constant 0 : index
    %47 = vector.load %arg12[%c0_29, %c0_30] : memref<64x784xf32, #tpu.memory_space<vmem>>, vector<64x784xf32>
    tpu.vector_store %arg12[%c0_29, %c0_30], %46 {strides = array<i32>} : memref<64x784xf32, #tpu.memory_space<vmem>>, vector<64x784xf32>,
    return
  }
  func.func @transform_0(%arg0: i32) -> (i32, i32) {
    %c0_i32 = arith.constant 0 : i32
    %c0_i32_0 = arith.constant 0 : i32
    %c0_i32_1 = arith.constant 0 : i32
    return %c0_i32, %c0_i32_0 : i32, i32
  }
  func.func @transform_1(%arg0: i32) -> (i32, i32) {
    %c0_i32 = arith.constant 0 : i32
    %c0_i32_0 = arith.constant 0 : i32
    %c0_i32_1 = arith.constant 0 : i32
    return %c0_i32, %c0_i32_0 : i32, i32
  }
  func.func @transform_2(%arg0: i32) -> (i32, i32) {
    %c0_i32 = arith.constant 0 : i32
    %c0_i32_0 = arith.constant 0 : i32
    %c0_i32_1 = arith.constant 0 : i32
    return %c0_i32, %c0_i32_0 : i32, i32
  }
  func.func @transform_3(%arg0: i32) -> (i32, i32) {
    %c0_i32 = arith.constant 0 : i32
    %c0_i32_0 = arith.constant 0 : i32
    %c0_i32_1 = arith.constant 0 : i32
    return %c0_i32, %c0_i32_0 : i32, i32
  }
  func.func @transform_4(%arg0: i32) -> (i32, i32) {
    %c0_i32 = arith.constant 0 : i32
    %c0_i32_0 = arith.constant 0 : i32
    %c0_i32_1 = arith.constant 0 : i32
    return %c0_i32, %c0_i32_0 : i32, i32
  }
  func.func @transform_5(%arg0: i32) -> (i32, i32) {
    %c0_i32 = arith.constant 0 : i32
    %c0_i32_0 = arith.constant 0 : i32
    %c0_i32_1 = arith.constant 0 : i32
    return %c0_i32, %c0_i32_0 : i32, i32
  }
  func.func @transform_6(%arg0: i32) -> (i32, i32) {
    %c0_i32 = arith.constant 0 : i32
    %c0_i32_0 = arith.constant 0 : i32
    %c0_i32_1 = arith.constant 0 : i32
    return %c0_i32, %c0_i32_0 : i32, i32
  }
  func.func @transform_7(%arg0: i32) -> (i32, i32) {
    %c0_i32 = arith.constant 0 : i32
    %c0_i32_0 = arith.constant 0 : i32
    %c0_i32_1 = arith.constant 0 : i32
    return %c0_i32, %c0_i32_0 : i32, i32
  }
  func.func @transform_8(%arg0: i32) -> (i32, i32) {
    %c0_i32 = arith.constant 0 : i32
    %c0_i32_0 = arith.constant 0 : i32
    %c0_i32_1 = arith.constant 0 : i32
    return %c0_i32, %c0_i32_0 : i32, i32
  }
  func.func @transform_9(%arg0: i32) -> (i32, i32) {
    %c0_i32 = arith.constant 0 : i32
    %c0_i32_0 = arith.constant 0 : i32
    %c0_i32_1 = arith.constant 0 : i32
    return %c0_i32, %c0_i32_0 : i32, i32
  }
  func.func @transform_10(%arg0: i32) -> (i32, i32) {
    %c0_i32 = arith.constant 0 : i32
    %c0_i32_0 = arith.constant 0 : i32
    %c0_i32_1 = arith.constant 0 : i32
    return %c0_i32, %c0_i32_0 : i32, i32
  }
  func.func @transform_11(%arg0: i32) -> (i32, i32) {
    %c0_i32 = arith.constant 0 : i32
    %c0_i32_0 = arith.constant 0 : i32
    return %arg0, %c0_i32 : i32, i32
  }
}

</mosaic_0001>

<bundles_post_ra>
// kernel: _generator_forward_impl.1
= control target key start
LH: loop header
LB: loop body
LE: loop exit
PB: predicated region body
PF: predicated region fallthrough
CT: control target
= control target key end

     0   :  { %v9737_v28 = vmov 0   ;;  %s12930_s0 = inlined_call_operand.vmem [shape: bf16[64,128], index: 0, kind: input, shape index: {}]   ;;  %s12931_s1 = inlined_call_operand.vmem [shape: bf16[128,128], index: 1, kind: input, shape index: {}]   ;;  %s12932_s2 = inlined_call_operand.vmem [shape: f32[1,128], index: 2, kind: input, shape index: {}]   ;;  %s12933_s3 = inlined_call_operand.vmem [shape: bf16[128,256], index: 3, kind: input, shape index: {}]   ;;  %s12934_s4 = inlined_call_operand.vmem [shape: f32[1,256], index: 4, kind: input, shape index: {}]   ;;  %s12935_s5 = inlined_call_operand.vmem [shape: bf16[256,512], index: 5, kind: input, shape index: {}]   ;;  %s12936_s6 = inlined_call_operand.vmem [shape: f32[1,512], index: 6, kind: input, shape index: {}]   ;;  %s12937_s7 = inlined_call_operand.vmem [shape: bf16[512,1024], index: 7, kind: input, shape index: {}]   ;;  %s12938_s8 = inlined_call_operand.vmem [shape: f32[1,1024], index: 8, kind: input, shape index: {}]   ;;  %s12939_s9 = inlined_call_operand.vmem [shape: bf16[1024,784], index: 9, kind: input, shape index: {}]   ;;  %s12940_s10 = inlined_call_operand.vmem [shape: f32[1,784], index: 10, kind: input, shape index: {}]   ;;  %s12941_s11 = inlined_call_operand.hbm [shape: f32[64,784], index: 11, kind: output, shape index: {}]  }
   0x1   :  { %v8828_v0 = vld [vmem:[%s12931_s1] sm:$0xff]   ;;  %v8829_v1 = vld [vmem:[%s12931_s1 + $0x8] sm:$0xff]   ;;  %v8830_v2 = vld [vmem:[%s12931_s1 + $0x10] sm:$0xff]   ;;  %355 = vmatprep.mubr.bf16.mxu1 %v9737_v28 }
   0x2   :  { %8544 = vmatprep.subr.bf16.mxu0 %v8828_v0  ;;  %v8831_v3 = vld [vmem:[%s12931_s1 + $0x18] sm:$0xff]   ;;  %v8836_v4 = vld [vmem:[%s12930_s0] sm:$0xff]   ;;  %v8833_v9 = vld [vmem:[%s12931_s1 + $0x28] sm:$0xff]  }
   0x3   :  { %8545 = vmatpush3.bf16.msra.mxu0 %v8828_v0  ;;  %8560 = vmatprep.mubr.bf16.mxu0 %v8836_v4  ;;  %v8832_v5 = vld [vmem:[%s12931_s1 + $0x20] sm:$0xff]   ;;  %v8843_v8 = vld [vmem:[%s12933_s3 + $0x14] ss:$8 sps:$4 sm:$0xff]   ;;  %v8845_v10 = vld [vmem:[%s12933_s3 + $0x10] ss:$8 sps:$4 sm:$0xff]  }
   0x4   :  { %8546 = vmatprep.subr.bf16.mxu0 %v8829_v1  ;;  %v8840_v6 = vld [vmem:[%s12933_s3 + $0x4] ss:$8 sps:$4 sm:$0xff]   ;;  %v8842_v7 = vld [vmem:[%s12933_s3] ss:$8 sps:$4 sm:$0xff]   ;;  %v8834_v12 = vld [vmem:[%s12931_s1 + $0x30] sm:$0xff]  }
   0x5   :  { %323 = vmatprep.subr.bf16.mxu1 %v8840_v6  ;;  %v8846_v11 = vld [vmem:[%s12933_s3 + $0x24] ss:$8 sps:$4 sm:$0xff]   ;;  %v8848_v13 = vld [vmem:[%s12933_s3 + $0x20] ss:$8 sps:$4 sm:$0xff]   ;;  %v8849_v14 = vld [vmem:[%s12933_s3 + $0x34] ss:$8 sps:$4 sm:$0xff]  }
   0x6   :  { %324 = vmatpush1.bf16.msra.mxu1 %v8842_v7  ;;  %v8851_v15 = vld [vmem:[%s12933_s3 + $0x30] ss:$8 sps:$4 sm:$0xff]   ;;  %v8852_v17 = vld [vmem:[%s12933_s3 + $0x44] ss:$8 sps:$4 sm:$0xff]   ;;  %v8854_v18 = vld [vmem:[%s12933_s3 + $0x40] ss:$8 sps:$4 sm:$0xff]  }
   0x7   :  { %8547 = vmatpush3.bf16.msra.mxu0 %v8829_v1  ;;  %325 = vmatprep.subr.bf16.mxu1 %v8843_v8  ;;  %v8835_v16 = vld [vmem:[%s12931_s1 + $0x38] sm:$0xff]   ;;  %v8837_v19 = vld [vmem:[%s12930_s0 + $0x8] sm:$0xff]   ;;  %v8838_v20 = vld [vmem:[%s12930_s0 + $0x10] sm:$0xff]  }
   0x8   :  { %8548 = vmatprep.subr.bf16.mxu0 %v8830_v2  ;;  %v8839_v21 = vld [vmem:[%s12930_s0 + $0x18] sm:$0xff]   ;;  %v8858_v24 = vld [vmem:[%s12933_s3 + $0x64] ss:$8 sps:$4 sm:$0xff]   ;;  %v8860_v25 = vld [vmem:[%s12933_s3 + $0x60] ss:$8 sps:$4 sm:$0xff]  }
   0x9   :  { %v8855_v22 = vld [vmem:[%s12933_s3 + $0x54] ss:$8 sps:$4 sm:$0xff]   ;;  %v8857_v23 = vld [vmem:[%s12933_s3 + $0x50] ss:$8 sps:$4 sm:$0xff]  }
   0xa   :  { %326 = vmatpush1.bf16.msra.mxu1 %v8845_v10  ;;  %v8861_v26 = vld [vmem:[%s12933_s3 + $0x74] ss:$8 sps:$4 sm:$0xff]   ;;  %v8863_v27 = vld [vmem:[%s12933_s3 + $0x70] ss:$8 sps:$4 sm:$0xff]  }
   0xb   :  { %8549 = vmatpush3.bf16.msra.mxu0 %v8830_v2  ;;  %327 = vmatprep.subr.bf16.mxu1 %v8846_v11  ;;  %v8866_v29 = vld [vmem:[%s12935_s5 + $0x4] ss:$16 sps:$4 sm:$0xff]  }
   0xc   :  { %8550 = vmatprep.subr.bf16.mxu0 %v8831_v3 }
   0xe   :  { %328 = vmatpush1.bf16.msra.mxu1 %v8848_v13 }
   0xf   :  { %8551 = vmatpush3.bf16.msra.mxu0 %v8831_v3  ;;  %329 = vmatprep.subr.bf16.mxu1 %v8849_v14 }
  0x10   :  { %8552 = vmatprep.subr.bf16.mxu0 %v8832_v5 }
  0x12   :  { %330 = vmatpush1.bf16.msra.mxu1 %v8851_v15 }
  0x13   :  { %8553 = vmatpush3.bf16.msra.mxu0 %v8832_v5  ;;  %331 = vmatprep.subr.bf16.mxu1 %v8852_v17 }
  0x14   :  { %8554 = vmatprep.subr.bf16.mxu0 %v8833_v9 }
  0x16   :  { %332 = vmatpush1.bf16.msra.mxu1 %v8854_v18 }
  0x17   :  { %8555 = vmatpush3.bf16.msra.mxu0 %v8833_v9  ;;  %333 = vmatprep.subr.bf16.mxu1 %v8855_v22 }
  0x18   :  { %8556 = vmatprep.subr.bf16.mxu0 %v8834_v12 }
  0x1a   :  { %334 = vmatpush1.bf16.msra.mxu1 %v8857_v23 }
  0x1b   :  { %8557 = vmatpush3.bf16.msra.mxu0 %v8834_v12  ;;  %335 = vmatprep.subr.bf16.mxu1 %v8858_v24 }
  0x1c   :  { %8558 = vmatprep.subr.bf16.mxu0 %v8835_v16 }
  0x1e   :  { %336 = vmatpush1.bf16.msra.mxu1 %v8860_v25 }
  0x1f   :  { %8559 = vmatpush3.bf16.msra.mxu0 %v8835_v16  ;;  %337 = vmatprep.subr.bf16.mxu1 %v8861_v26 }
  0x22   :  { %8561 = vmatmul.mubr.bf16.vlgmr.msra.gmra.mrb[0].mxu0 %v8837_v19  ;;  %338 = vmatpush1.bf16.msra.mxu1 %v8863_v27 }
  0x23   :  { %8564 = vmatprep.mubr.bf16.mxu0 %v8838_v20  ;;  %840 = vmatprep.subr.bf16.mxu1 %v8866_v29 }
  0x2a   :  { %8565 = vmatmul.mubr.bf16.gmra.mrb[4].mxu0 %v8839_v21 }
  0x2b   :  { %16 = vsyncpa [#allocation3], 0  ;;  %v211_v30 = vlaneseq  ;;  %v206_v31 = vld [vmem:[%s12932_s2] sm:$0x1]  ;;  %v8869_v51 = vld [vmem:[%s12935_s5 + $0x24] ss:$16 sps:$4 sm:$0xff]  }
  0x2c   :  { %v207_v32 = vpack.c.bf16 %v206_v31, %v206_v31  ;;  %v8864_v47 = vld [vmem:[%s12935_s5] ss:$16 sps:$4 sm:$0xff]   ;;  %v8872_v57 = vld [vmem:[%s12935_s5 + $0x44] ss:$16 sps:$4 sm:$0xff]   ;;  %vm7509_vm0 = vcmask 130048  }
  0x2d   :  { %v9891_v33 = vshrl.u32 %v211_v30, 7  ;;  %v8867_v55 = vld [vmem:[%s12935_s5 + $0x20] ss:$16 sps:$4 sm:$0xff]   ;;  %v8875_v61 = vld [vmem:[%s12935_s5 + $0x64] ss:$16 sps:$4 sm:$0xff]  }
  0x2e   :  { %v209_v34 = vpack.i.b16 %v207_v32, %v207_v32  ;;  %v8870_v59 = vld [vmem:[%s12935_s5 + $0x40] ss:$16 sps:$4 sm:$0xff]   ;;  %v8878_v0 = vld [vmem:[%s12935_s5 + $0x84] ss:$16 sps:$4 sm:$0xff]  }
  0x2f   :  { %v9894_v35 = vsub.s32 0, %v9891_v33  ;;  %v8873_v63 = vld [vmem:[%s12935_s5 + $0x60] ss:$16 sps:$4 sm:$0xff]   ;;  %v8881_v4 = vld [vmem:[%s12935_s5 + $0xa4] ss:$16 sps:$4 sm:$0xff]  }
  0x30   :  { %v8876_v3 = vld [vmem:[%s12935_s5 + $0x80] ss:$16 sps:$4 sm:$0xff]   ;;  %v8884_v7 = vld [vmem:[%s12935_s5 + $0xc4] ss:$16 sps:$4 sm:$0xff]  }
  0x31   :  { %v214_v39 = vrot.slane %v209_v34, %v9894_v35  ;;  %v8879_v6 = vld [vmem:[%s12935_s5 + $0xa0] ss:$16 sps:$4 sm:$0xff]   ;;  %v8887_v10 = vld [vmem:[%s12935_s5 + $0xe4] ss:$16 sps:$4 sm:$0xff]  }
  0x32   :  { %v8882_v9 = vld [vmem:[%s12935_s5 + $0xc0] ss:$16 sps:$4 sm:$0xff]   ;;  %v8890_v12 = vld [vmem:[%s12935_s5 + $0x104] ss:$16 sps:$4 sm:$0xff]  }
  0x33   :  { %v8885_v11 = vld [vmem:[%s12935_s5 + $0xe0] ss:$16 sps:$4 sm:$0xff]   ;;  %v8893_v14 = vld [vmem:[%s12935_s5 + $0x124] ss:$16 sps:$4 sm:$0xff]  }
  0x34   :  { %v8888_v13 = vld [vmem:[%s12935_s5 + $0x100] ss:$16 sps:$4 sm:$0xff]   ;;  %v8896_v16 = vld [vmem:[%s12935_s5 + $0x144] ss:$16 sps:$4 sm:$0xff]  }
  0x35   :  { %v8891_v15 = vld [vmem:[%s12935_s5 + $0x120] ss:$16 sps:$4 sm:$0xff]   ;;  %v8899_v18 = vld [vmem:[%s12935_s5 + $0x164] ss:$16 sps:$4 sm:$0xff]  }
  0x36   :  { %v8894_v17 = vld [vmem:[%s12935_s5 + $0x140] ss:$16 sps:$4 sm:$0xff]   ;;  %v8902_v20 = vld [vmem:[%s12935_s5 + $0x184] ss:$16 sps:$4 sm:$0xff]  }
  0x37   :  { %v8897_v19 = vld [vmem:[%s12935_s5 + $0x160] ss:$16 sps:$4 sm:$0xff]   ;;  %v8905_v22 = vld [vmem:[%s12935_s5 + $0x1a4] ss:$16 sps:$4 sm:$0xff]  }
  0x38   :  { %v8900_v21 = vld [vmem:[%s12935_s5 + $0x180] ss:$16 sps:$4 sm:$0xff]   ;;  %v8908_v24 = vld [vmem:[%s12935_s5 + $0x1c4] ss:$16 sps:$4 sm:$0xff]  }
  0x39   :  { %v8903_v23 = vld [vmem:[%s12935_s5 + $0x1a0] ss:$16 sps:$4 sm:$0xff]   ;;  %v8911_v26 = vld [vmem:[%s12935_s5 + $0x1e4] ss:$16 sps:$4 sm:$0xff]  }
  0x3a   :  { %v8906_v25 = vld [vmem:[%s12935_s5 + $0x1c0] ss:$16 sps:$4 sm:$0xff]  }
  0x3b   :  { %v8909_v27 = vld [vmem:[%s12935_s5 + $0x1e0] ss:$16 sps:$4 sm:$0xff]  }
  0x3c   :  { %v1104_v29 = vld [vmem:[%s12937_s7] sm:$0xff] }
  0x3d   :  { %v1108_v30 = vld [vmem:[%s12937_s7 + $0x20] sm:$0xff] }
  0x3e   :  { %v7668_v31 = vcombine.low %v1104_v29, %v1108_v30  ;;  %v7669_v32 = vcombine.high %v1104_v29, %v1108_v30  ;;  %v1112_v34 = vld [vmem:[%s12937_s7 + $0x40] sm:$0xff] }
  0x40   :  { %2640 = vmatprep.subr.bf16.mxu0 %v7669_v32 }
  0x41   :  { %2641 = vmatpush1.bf16.msra.mxu0 %v7668_v31 }
  0xf5   :  { %v8562_v36 = vpop.f32.mrb[0].mxu0 }
  0xf6   :  { %v171_v37 = vpop.f32.mrb[1].mxu0 }
  0xf7   :  { %v8563_v38 = vpop.f32.mrb[2].mxu0 }
  0xf8   :  { %v203_v40 = vpack.c.bf16 %v8563_v38, %v8562_v36  ;;  %v174_v41 = vpop.f32.mrb[3].mxu0  ;;  %v1116_v36 = vld [vmem:[%s12937_s7 + $0x60] sm:$0xff] }
  0xf9   :  { %v202_v42 = vpack.c.bf16 %v174_v41, %v171_v37  ;;  %v7677_v37 = vcombine.high %v1112_v34, %v1116_v36  ;;  %v1120_v38 = vld [vmem:[%s12937_s7 + $0x80] sm:$0xff] }
  0xfa   :  { %v216_v48 = vadd.bf16 %v214_v39, %v203_v40  ;;  %v7676_v40 = vcombine.low %v1112_v34, %v1116_v36  ;;  %v8912_v34 = vld [vmem:[%s12935_s5 + $0x8] ss:$16 sps:$4 sm:$0xff]  }
  0xfb   :  { %v215_v43 = vadd.bf16 %v214_v39, %v202_v42  ;;  %2642 = vmatprep.subr.bf16.mxu0 %v7677_v37  ;;  %v1128_v42 = vld [vmem:[%s12937_s7 + $0xc0] sm:$0xff] }
  0xfc   :  { %v220_v56 = vmul.bf16 1045249613, %v216_v48  ;;  %2643 = vmatpush1.bf16.msra.mxu0 %v7676_v40  ;;  %v8917_v40 = vld [vmem:[%s12935_s5 + $0x2c] ss:$16 sps:$4 sm:$0xff]  }
  0xfd   :  { %v219_v44 = vmul.bf16 1045249613, %v215_v43  ;;  %v8566_v45 = vpop.f32.mrb[4].mxu0 }
  0xfe   :  { %v187_v46 = vpop.f32.mrb[5].mxu0  ;;  %v224_v60 = vmax.bf16 %v220_v56, %v216_v48 }
  0xff   :  { %v223_v49 = vmax.bf16 %v219_v44, %v215_v43  ;;  %v8567_v50 = vpop.f32.mrb[6].mxu0  ;;  %v1132_v43 = vld [vmem:[%s12937_s7 + $0xe0] sm:$0xff] }
 0x100   :  { %v205_v52 = vpack.c.bf16 %v8567_v50, %v8566_v45  ;;  %v190_v53 = vpop.f32.mrb[7].mxu0  ;;  %v7693_v45 = vcombine.high %v1128_v42, %v1132_v43  ;;  %v7692_v48 = vcombine.low %v1128_v42, %v1132_v43  ;;  %v10027_v50 = vsub.s32 1, %v9891_v33  ;;  %v1196_v42 = vld [vmem:[%s12937_s7 + $0x2e0] sm:$0xff] }
 0x101   :  { %356 = vmatmul.mubr.bf16.vlgmr.msra.gmra.mrb[0].mxu1 %v223_v49  ;;  %v204_v54 = vpack.c.bf16 %v190_v53, %v187_v46  ;;  %v1136_v46 = vld [vmem:[%s12937_s7 + $0x100] sm:$0xff] }
 0x102   :  { %365 = vmatprep.mubr.bf16.mxu1 %v9737_v28  ;;  %841 = vmatpush1.bf16.msra.mxu1 %v8864_v47  ;;  %v218_v1 = vadd.bf16 %v214_v39, %v205_v52  ;;  %v1140_v47 = vld [vmem:[%s12937_s7 + $0x120] sm:$0xff] }
 0x103   :  { %842 = vmatprep.subr.bf16.mxu1 %v8869_v51  ;;  %v217_v58 = vadd.bf16 %v214_v39, %v204_v54  ;;  %v1124_v39 = vld [vmem:[%s12937_s7 + $0xa0] sm:$0xff]  ;;  %v7701_v51 = vcombine.high %v1136_v46, %v1140_v47 }
 0x104   :  { %v222_v5 = vmul.bf16 1045249613, %v218_v1  ;;  %v7685_v41 = vcombine.high %v1120_v38, %v1124_v39  ;;  %v7684_v44 = vcombine.low %v1120_v38, %v1124_v39  ;;  %v404_v49 = vld [vmem:[%s12934_s4] sm:$0x3] }
 0x105   :  { %v221_v62 = vmul.bf16 1045249613, %v217_v58  ;;  %v1144_v52 = vld [vmem:[%s12937_s7 + $0x140] sm:$0xff]  ;;  %v409_v54 = vrot.slane %v404_v49, %v9894_v35  ;;  %v413_v56 = vrot.slane %v404_v49, %v10027_v50 }
 0x106   :  { %843 = vmatpush1.bf16.msra.mxu1 %v8867_v55  ;;  %v226_v8 = vmax.bf16 %v222_v5, %v218_v1  ;;  %2644 = vmatprep.subr.bf16.mxu0 %v7685_v41  ;;  %v1148_v53 = vld [vmem:[%s12937_s7 + $0x160] sm:$0xff]  ;;  %v7700_v55 = vcombine.low %v1136_v46, %v1140_v47  ;;  %v8915_v47 = vld [vmem:[%s12935_s5 + $0x28] ss:$16 sps:$4 sm:$0xff]  }
 0x107   :  { %844 = vmatprep.subr.bf16.mxu1 %v8872_v57  ;;  %v225_v2 = vmax.bf16 %v221_v62, %v217_v58  ;;  %2645 = vmatpush1.bf16.msra.mxu0 %v7684_v44  ;;  %v7709_v57 = vcombine.high %v1144_v52, %v1148_v53  ;;  %v1152_v58 = vld [vmem:[%s12937_s7 + $0x180] sm:$0xff]  ;;  %v417_v62 = vpack.c.bf16 %v413_v56, %v413_v56 }
 0x108   :  { %2646 = vmatprep.subr.bf16.mxu0 %v7693_v45  ;;  %v1164_v1 = vld [vmem:[%s12937_s7 + $0x1e0] sm:$0xff] }
 0x109   :  { %366 = vmatmul.mubr.bf16.gmra.mrb[4].mxu1 %v224_v60  ;;  %v416_v60 = vpack.c.bf16 %v409_v54, %v409_v54  ;;  %v1192_v41 = vld [vmem:[%s12937_s7 + $0x2c0] sm:$0xff] }
 0x10a   :  { %375 = vmatprep.mubr.bf16.mxu1 %v9737_v28  ;;  %845 = vmatpush1.bf16.msra.mxu1 %v8870_v59  ;;  %v1156_v59 = vld [vmem:[%s12937_s7 + $0x1a0] sm:$0xff] }
 0x10b   :  { %846 = vmatprep.subr.bf16.mxu1 %v8875_v61  ;;  %2647 = vmatpush1.bf16.msra.mxu0 %v7692_v48  ;;  %v7708_v61 = vcombine.low %v1144_v52, %v1148_v53  ;;  %v7757_v48 = vcombine.high %v1192_v41, %v1196_v42  ;;  %v1200_v52 = vld [vmem:[%s12937_s7 + $0x300] sm:$0xff] }
 0x10c   :  { %2648 = vmatprep.subr.bf16.mxu0 %v7701_v51  ;;  %v8920_v51 = vld [vmem:[%s12935_s5 + $0x4c] ss:$16 sps:$4 sm:$0xff]   ;;  %v1204_v53 = vld [vmem:[%s12937_s7 + $0x320] sm:$0xff] }
 0x10e   :  { %847 = vmatpush1.bf16.msra.mxu1 %v8873_v63  ;;  %v7717_v63 = vcombine.high %v1152_v58, %v1156_v59 }
 0x10f   :  { %848 = vmatprep.subr.bf16.mxu1 %v8878_v0  ;;  %2649 = vmatpush1.bf16.msra.mxu0 %v7700_v55  ;;  %v1160_v0 = vld [vmem:[%s12937_s7 + $0x1c0] sm:$0xff] }
 0x110   :  { %2650 = vmatprep.subr.bf16.mxu0 %v7709_v57  ;;  %v7725_v5 = vcombine.high %v1160_v0, %v1164_v1  ;;  %v7756_v57 = vcombine.low %v1192_v41, %v1196_v42  ;;  %v8945_v41 = vld [vmem:[%s12935_s5 + $0x168] ss:$16 sps:$4 sm:$0xff]   ;;  %v8950_v42 = vld [vmem:[%s12935_s5 + $0x18c] ss:$16 sps:$4 sm:$0xff]  }
 0x111   :  { %376 = vmatmul.mubr.bf16.gmra.mrb[8].mxu1 %v225_v2  ;;  %v419_v2 = vpack.i.b16 %v416_v60, %v416_v60  ;;  %v8918_v60 = vld [vmem:[%s12935_s5 + $0x48] ss:$16 sps:$4 sm:$0xff]  }
 0x112   :  { %385 = vmatprep.mubr.bf16.mxu1 %v9737_v28  ;;  %849 = vmatpush1.bf16.msra.mxu1 %v8876_v3  ;;  %v8914_v28 = vld [vmem:[%s12935_s5 + $0xc] ss:$16 sps:$4 sm:$0xff]   ;;  %v7716_v3 = vcombine.low %v1152_v58, %v1156_v59 }
 0x113   :  { %850 = vmatprep.subr.bf16.mxu1 %v8881_v4  ;;  %2651 = vmatpush1.bf16.msra.mxu0 %v7708_v61  ;;  %v426_v4 = vpack.i.b16 %v417_v62, %v417_v62  ;;  %v7765_v61 = vcombine.high %v1200_v52, %v1204_v53 }
 0x114   :  { %2652 = vmatprep.subr.bf16.mxu0 %v7717_v63 }
 0x116   :  { %851 = vmatpush1.bf16.msra.mxu1 %v8879_v6  ;;  %v1168_v6 = vld [vmem:[%s12937_s7 + $0x200] sm:$0xff] }
 0x117   :  { %852 = vmatprep.subr.bf16.mxu1 %v8884_v7  ;;  %v1172_v7 = vld [vmem:[%s12937_s7 + $0x220] sm:$0xff]  ;;  %2653 = vmatpush1.bf16.msra.mxu0 %v7716_v3 }
 0x118   :  { %2654 = vmatprep.subr.bf16.mxu0 %v7725_v5 }
 0x119   :  { %386 = vmatmul.mubr.bf16.gmra.mrb[12].mxu1 %v226_v8 }
 0x11a   :  { %853 = vmatpush1.bf16.msra.mxu1 %v8882_v9 }
 0x11b   :  { %854 = vmatprep.subr.bf16.mxu1 %v8887_v10  ;;  %v10056_v10 = vrot.slane %v419_v2, %v9894_v35 }
 0x11e   :  { %855 = vmatpush1.bf16.msra.mxu1 %v8885_v11  ;;  %v7724_v11 = vcombine.low %v1160_v0, %v1164_v1  ;;  %v8923_v1 = vld [vmem:[%s12935_s5 + $0x6c] ss:$16 sps:$4 sm:$0xff]  }
 0x11f   :  { %856 = vmatprep.subr.bf16.mxu1 %v8890_v12 }
 0x120   :  { %2655 = vmatpush1.bf16.msra.mxu0 %v7724_v11 }
 0x122   :  { %857 = vmatpush1.bf16.msra.mxu1 %v8888_v13  ;;  %v10059_v13 = vrot.slane %v426_v4, %v9894_v35  ;;  %v7764_v4 = vcombine.low %v1200_v52, %v1204_v53  ;;  %v8957_v52 = vld [vmem:[%s12935_s5 + $0x1e8] ss:$16 sps:$4 sm:$0xff]  }
 0x123   :  { %858 = vmatprep.subr.bf16.mxu1 %v8893_v14  ;;  %v7733_v14 = vcombine.high %v1168_v6, %v1172_v7 }
 0x125   :  { %2656 = vmatprep.subr.bf16.mxu0 %v7733_v14 }
 0x126   :  { %859 = vmatpush1.bf16.msra.mxu1 %v8891_v15 }
 0x127   :  { %860 = vmatprep.subr.bf16.mxu1 %v8896_v16 }
 0x12a   :  { %861 = vmatpush1.bf16.msra.mxu1 %v8894_v17  ;;  %v1176_v17 = vld [vmem:[%s12937_s7 + $0x240] sm:$0xff] }
 0x12b   :  { %862 = vmatprep.subr.bf16.mxu1 %v8899_v18  ;;  %v1180_v18 = vld [vmem:[%s12937_s7 + $0x260] sm:$0xff] }
 0x12c   :  { %v7740_v30 = vcombine.low %v1176_v17, %v1180_v18 }
 0x12e   :  { %863 = vmatpush1.bf16.msra.mxu1 %v8897_v19 }
 0x12f   :  { %864 = vmatprep.subr.bf16.mxu1 %v8902_v20 }
 0x132   :  { %865 = vmatpush1.bf16.msra.mxu1 %v8900_v21  ;;  %v7732_v21 = vcombine.low %v1168_v6, %v1172_v7  ;;  %v8921_v6 = vld [vmem:[%s12935_s5 + $0x68] ss:$16 sps:$4 sm:$0xff]  }
 0x133   :  { %866 = vmatprep.subr.bf16.mxu1 %v8905_v22 }
 0x134   :  { %2657 = vmatpush1.bf16.msra.mxu0 %v7732_v21 }
 0x136   :  { %867 = vmatpush1.bf16.msra.mxu1 %v8903_v23  ;;  %v7741_v23 = vcombine.high %v1176_v17, %v1180_v18  ;;  %v8924_v17 = vld [vmem:[%s12935_s5 + $0x88] ss:$16 sps:$4 sm:$0xff]  }
 0x137   :  { %868 = vmatprep.subr.bf16.mxu1 %v8908_v24 }
 0x138   :  { %2658 = vmatprep.subr.bf16.mxu0 %v7741_v23 }
 0x139   :  { %2659 = vmatpush1.bf16.msra.mxu0 %v7740_v30  ;;  %v8933_v30 = vld [vmem:[%s12935_s5 + $0xe8] ss:$16 sps:$4 sm:$0xff]  }
 0x13a   :  { %869 = vmatpush1.bf16.msra.mxu1 %v8906_v25  ;;  %v1184_v25 = vld [vmem:[%s12937_s7 + $0x280] sm:$0xff] }
 0x13b   :  { %870 = vmatprep.subr.bf16.mxu1 %v8911_v26  ;;  %v1188_v26 = vld [vmem:[%s12937_s7 + $0x2a0] sm:$0xff] }
 0x13c   :  { %v7749_v36 = vcombine.high %v1184_v25, %v1188_v26  ;;  %v7748_v45 = vcombine.low %v1184_v25, %v1188_v26  ;;  %v8932_v26 = vld [vmem:[%s12935_s5 + $0xcc] ss:$16 sps:$4 sm:$0xff]  }
 0x13e   :  { %871 = vmatpush1.bf16.msra.mxu1 %v8909_v27  ;;  %2660 = vmatprep.subr.bf16.mxu0 %v7749_v36  ;;  %v8941_v36 = vld [vmem:[%s12935_s5 + $0x12c] ss:$16 sps:$4 sm:$0xff]  }
 0x13f   :  { %913 = vmatprep.subr.bf16.mxu1 %v8914_v28  ;;  %2661 = vmatpush1.bf16.msra.mxu0 %v7748_v45  ;;  %v8951_v45 = vld [vmem:[%s12935_s5 + $0x1a8] ss:$16 sps:$4 sm:$0xff]  }
 0x140   :  { %2662 = vmatprep.subr.bf16.mxu0 %v7757_v48  ;;  %v8959_v48 = vld [vmem:[%s12935_s5 + $0x1ec] ss:$16 sps:$4 sm:$0xff]  }
 0x143   :  { %2663 = vmatpush1.bf16.msra.mxu0 %v7756_v57 }
 0x144   :  { %2664 = vmatprep.subr.bf16.mxu0 %v7765_v61 }
 0x147   :  { %2665 = vmatpush1.bf16.msra.mxu0 %v7764_v4 }
 0x1d4   :  { %v357_v8 = vpop.f32.mrb[0].mxu1 }
 0x1d5   :  { %v359_v9 = vpop.f32.mrb[1].mxu1 }
 0x1d6   :  { %v361_v12 = vpop.f32.mrb[2].mxu1 }
 0x1d7   :  { %v396_v15 = vpack.c.bf16 %v361_v12, %v357_v8  ;;  %v363_v16 = vpop.f32.mrb[3].mxu1  ;;  %v8926_v8 = vld [vmem:[%s12935_s5 + $0x8c] ss:$16 sps:$4 sm:$0xff]  }
 0x1d8   :  { %v397_v19 = vpack.c.bf16 %v363_v16, %v359_v9 }
 0x1d9   :  { %v432_v20 = vadd.bf16 %v10056_v10, %v396_v15 }
 0x1da   :  { %v433_v22 = vadd.bf16 %v10059_v13, %v397_v19 }
 0x1db   :  { %v440_v24 = vmul.bf16 1045249613, %v432_v20 }
 0x1dc   :  { %v441_v27 = vmul.bf16 1045249613, %v433_v22  ;;  %v367_v28 = vpop.f32.mrb[4].mxu1 }
 0x1dd   :  { %v369_v29 = vpop.f32.mrb[5].mxu1  ;;  %v10080_v37 = vmax.bf16 %v440_v24, %v432_v20  ;;  %v8929_v20 = vld [vmem:[%s12935_s5 + $0xac] ss:$16 sps:$4 sm:$0xff]   ;;  %v8927_v24 = vld [vmem:[%s12935_s5 + $0xa8] ss:$16 sps:$4 sm:$0xff]  }
 0x1de   :  { %v371_v31 = vpop.f32.mrb[6].mxu1  ;;  %v10075_v32 = vmax.bf16 %v441_v27, %v433_v22 }
 0x1df   :  { %v398_v38 = vpack.c.bf16 %v371_v31, %v367_v28  ;;  %v373_v39 = vpop.f32.mrb[7].mxu1  ;;  %v8938_v31 = vld [vmem:[%s12935_s5 + $0x10c] ss:$16 sps:$4 sm:$0xff]  }
 0x1e0   :  { %v399_v43 = vpack.c.bf16 %v373_v39, %v369_v29  ;;  %872 = vmatprep.mubr.bf16.mxu1 %v10075_v32  ;;  %v8935_v29 = vld [vmem:[%s12935_s5 + $0xec] ss:$16 sps:$4 sm:$0xff]   ;;  %v8942_v39 = vld [vmem:[%s12935_s5 + $0x148] ss:$16 sps:$4 sm:$0xff]  }
 0x1e1   :  { %v434_v44 = vadd.bf16 %v10056_v10, %v398_v38  ;;  %873 = vmatmul.mubr.bf16.vlgmr.msra.gmra.mrb[16].mxu1 %v10080_v37  ;;  %v8944_v38 = vld [vmem:[%s12935_s5 + $0x14c] ss:$16 sps:$4 sm:$0xff]  }
 0x1e2   :  { %v435_v46 = vadd.bf16 %v10059_v13, %v399_v43  ;;  %914 = vmatpush1.bf16.msra.mxu1 %v8912_v34  ;;  %v8936_v34 = vld [vmem:[%s12935_s5 + $0x108] ss:$16 sps:$4 sm:$0xff]  }
 0x1e3   :  { %v442_v49 = vmul.bf16 1045249613, %v434_v44  ;;  %915 = vmatprep.subr.bf16.mxu1 %v8917_v40  ;;  %v8947_v40 = vld [vmem:[%s12935_s5 + $0x16c] ss:$16 sps:$4 sm:$0xff]   ;;  %v8948_v43 = vld [vmem:[%s12935_s5 + $0x188] ss:$16 sps:$4 sm:$0xff]  }
 0x1e4   :  { %v443_v54 = vmul.bf16 1045249613, %v435_v46  ;;  %v377_v55 = vpop.f32.mrb[8].mxu1 }
 0x1e5   :  { %v379_v56 = vpop.f32.mrb[9].mxu1  ;;  %v10112_v0 = vmax.bf16 %v442_v49, %v434_v44  ;;  %v8953_v44 = vld [vmem:[%s12935_s5 + $0x1ac] ss:$16 sps:$4 sm:$0xff]  }
 0x1e6   :  { %916 = vmatpush1.bf16.msra.mxu1 %v8915_v47  ;;  %v381_v58 = vpop.f32.mrb[10].mxu1  ;;  %v10107_v59 = vmax.bf16 %v443_v54, %v435_v46  ;;  %v8956_v46 = vld [vmem:[%s12935_s5 + $0x1cc] ss:$16 sps:$4 sm:$0xff]   ;;  %v8954_v47 = vld [vmem:[%s12935_s5 + $0x1c8] ss:$16 sps:$4 sm:$0xff]  }
 0x1e7   :  { %v400_v62 = vpack.c.bf16 %v381_v58, %v377_v55  ;;  %v383_v63 = vpop.f32.mrb[11].mxu1  ;;  %917 = vmatprep.subr.bf16.mxu1 %v8920_v51  ;;  %v1105_v49 = vld [vmem:[%s12937_s7 + $0x8] sm:$0xff] }
 0x1e8   :  { %v401_v2 = vpack.c.bf16 %v383_v63, %v379_v56  ;;  %882 = vmatprep.mubr.bf16.mxu1 %v10107_v59  ;;  %v1109_v51 = vld [vmem:[%s12937_s7 + $0x28] sm:$0xff] }
 0x1e9   :  { %v436_v3 = vadd.bf16 %v10056_v10, %v400_v62  ;;  %883 = vmatmul.mubr.bf16.gmra.mrb[20].mxu1 %v10112_v0  ;;  %v7671_v53 = vcombine.high %v1105_v49, %v1109_v51  ;;  %v1113_v54 = vld [vmem:[%s12937_s7 + $0x48] sm:$0xff]  ;;  %v7670_v56 = vcombine.low %v1105_v49, %v1109_v51 }
 0x1ea   :  { %v437_v5 = vadd.bf16 %v10059_v13, %v401_v2  ;;  %918 = vmatpush1.bf16.msra.mxu1 %v8918_v60  ;;  %v1117_v55 = vld [vmem:[%s12937_s7 + $0x68] sm:$0xff] }
 0x1eb   :  { %v444_v7 = vmul.bf16 1045249613, %v436_v3  ;;  %919 = vmatprep.subr.bf16.mxu1 %v8923_v1  ;;  %v7679_v57 = vcombine.high %v1113_v54, %v1117_v55  ;;  %v1121_v58 = vld [vmem:[%s12937_s7 + $0x88] sm:$0xff]  ;;  %v7678_v61 = vcombine.low %v1113_v54, %v1117_v55 }
 0x1ec   :  { %v445_v9 = vmul.bf16 1045249613, %v437_v5  ;;  %v387_v11 = vpop.f32.mrb[12].mxu1  ;;  %v1125_v60 = vld [vmem:[%s12937_s7 + $0xa8] sm:$0xff] }
 0x1ed   :  { %v389_v12 = vpop.f32.mrb[13].mxu1  ;;  %v10127_v14 = vmax.bf16 %v444_v7, %v436_v3  ;;  %v7687_v62 = vcombine.high %v1121_v58, %v1125_v60  ;;  %v1129_v63 = vld [vmem:[%s12937_s7 + $0xc8] sm:$0xff]  ;;  %v7686_v2 = vcombine.low %v1121_v58, %v1125_v60 }
 0x1ee   :  { %920 = vmatpush1.bf16.msra.mxu1 %v8921_v6  ;;  %v391_v15 = vpop.f32.mrb[14].mxu1  ;;  %v10129_v16 = vmax.bf16 %v445_v9, %v437_v5  ;;  %v1133_v1 = vld [vmem:[%s12937_s7 + $0xe8] sm:$0xff] }
 0x1ef   :  { %v402_v18 = vpack.c.bf16 %v391_v15, %v387_v11  ;;  %v393_v19 = vpop.f32.mrb[15].mxu1  ;;  %921 = vmatprep.subr.bf16.mxu1 %v8926_v8  ;;  %v7695_v3 = vcombine.high %v1129_v63, %v1133_v1  ;;  %v7694_v4 = vcombine.low %v1129_v63, %v1133_v1  ;;  %v1145_v6 = vld [vmem:[%s12937_s7 + $0x148] sm:$0xff]  ;;  %v1208_v15 = vld [vmem:[%s12937_s7 + $0x340] sm:$0xff] }
 0x1f0   :  { %v403_v21 = vpack.c.bf16 %v393_v19, %v389_v12  ;;  %892 = vmatprep.mubr.bf16.mxu1 %v10129_v16  ;;  %v1149_v7 = vld [vmem:[%s12937_s7 + $0x168] sm:$0xff] }
 0x1f1   :  { %v438_v22 = vadd.bf16 %v10056_v10, %v402_v18  ;;  %893 = vmatmul.mubr.bf16.gmra.mrb[24].mxu1 %v10127_v14  ;;  %v7711_v9 = vcombine.high %v1145_v6, %v1149_v7  ;;  %v1157_v11 = vld [vmem:[%s12937_s7 + $0x1a8] sm:$0xff]  ;;  %v7710_v12 = vcombine.low %v1145_v6, %v1149_v7 }
 0x1f2   :  { %v439_v23 = vadd.bf16 %v10059_v13, %v403_v21  ;;  %922 = vmatpush1.bf16.msra.mxu1 %v8924_v17  ;;  %v8930_v13 = vld [vmem:[%s12935_s5 + $0xc8] ss:$16 sps:$4 sm:$0xff]  }
 0x1f3   :  { %v446_v25 = vmul.bf16 1045249613, %v438_v22  ;;  %923 = vmatprep.subr.bf16.mxu1 %v8929_v20  ;;  %v1161_v19 = vld [vmem:[%s12937_s7 + $0x1c8] sm:$0xff] }
 0x1f4   :  { %v447_v27 = vmul.bf16 1045249613, %v439_v23 }
 0x1f5   :  { %v10147_v28 = vmax.bf16 %v446_v25, %v438_v22  ;;  %v1216_v22 = vld [vmem:[%s12937_s7 + $0x380] sm:$0xff] }
 0x1f6   :  { %924 = vmatpush1.bf16.msra.mxu1 %v8927_v24  ;;  %v10149_v10 = vmax.bf16 %v447_v27, %v439_v23  ;;  %v1220_v23 = vld [vmem:[%s12937_s7 + $0x3a0] sm:$0xff]  ;;  %v1173_v27 = vld [vmem:[%s12937_s7 + $0x228] sm:$0xff] }
 0x1f7   :  { %925 = vmatprep.subr.bf16.mxu1 %v8932_v26  ;;  %v7781_v25 = vcombine.high %v1216_v22, %v1220_v23  ;;  %v1169_v26 = vld [vmem:[%s12937_s7 + $0x208] sm:$0xff] }
 0x1f8   :  { %902 = vmatprep.mubr.bf16.mxu1 %v10149_v10 }
 0x1f9   :  { %903 = vmatmul.mubr.bf16.gmra.mrb[28].mxu1 %v10147_v28 }
 0x1fa   :  { %926 = vmatpush1.bf16.msra.mxu1 %v8930_v13  ;;  %945 = vmatprep.mubr.bf16.mxu1 %v10075_v32  ;;  %v8939_v32 = vld [vmem:[%s12935_s5 + $0x128] ss:$16 sps:$4 sm:$0xff]  }
 0x1fb   :  { %927 = vmatprep.subr.bf16.mxu1 %v8935_v29  ;;  %v1224_v29 = vld [vmem:[%s12937_s7 + $0x3c0] sm:$0xff] }
 0x1fe   :  { %928 = vmatpush1.bf16.msra.mxu1 %v8933_v30  ;;  %v1228_v30 = vld [vmem:[%s12937_s7 + $0x3e0] sm:$0xff] }
 0x1ff   :  { %929 = vmatprep.subr.bf16.mxu1 %v8938_v31  ;;  %v7735_v31 = vcombine.high %v1169_v26, %v1173_v27 }
 0x202   :  { %930 = vmatpush1.bf16.msra.mxu1 %v8936_v34  ;;  %v7789_v34 = vcombine.high %v1224_v29, %v1228_v30 }
 0x203   :  { %931 = vmatprep.subr.bf16.mxu1 %v8941_v36  ;;  %v1177_v36 = vld [vmem:[%s12937_s7 + $0x248] sm:$0xff] }
 0x206   :  { %932 = vmatpush1.bf16.msra.mxu1 %v8939_v32  ;;  %v7788_v32 = vcombine.low %v1224_v29, %v1228_v30 }
 0x207   :  { %933 = vmatprep.subr.bf16.mxu1 %v8944_v38  ;;  %v7734_v38 = vcombine.low %v1169_v26, %v1173_v27 }
 0x20a   :  { %934 = vmatpush1.bf16.msra.mxu1 %v8942_v39  ;;  %v10299_v39 = vld [vmem:[%s12937_s7 + $0x400] sm:$0xff] }
 0x20b   :  { %935 = vmatprep.subr.bf16.mxu1 %v8947_v40  ;;  %v10304_v40 = vld [vmem:[%s12937_s7 + $0x420] sm:$0xff] }
 0x20e   :  { %936 = vmatpush1.bf16.msra.mxu1 %v8945_v41  ;;  %v10309_v41 = vld [vmem:[%s12937_s7 + $0x408] sm:$0xff] }
 0x20f   :  { %937 = vmatprep.subr.bf16.mxu1 %v8950_v42 }
 0x212   :  { %938 = vmatpush1.bf16.msra.mxu1 %v8948_v43  ;;  %v7797_v43 = vcombine.high %v10299_v39, %v10304_v40 }
 0x213   :  { %939 = vmatprep.subr.bf16.mxu1 %v8953_v44  ;;  %v10316_v44 = vld [vmem:[%s12937_s7 + $0x428] sm:$0xff] }
 0x216   :  { %940 = vmatpush1.bf16.msra.mxu1 %v8951_v45  ;;  %v1185_v45 = vld [vmem:[%s12937_s7 + $0x288] sm:$0xff] }
 0x217   :  { %941 = vmatprep.subr.bf16.mxu1 %v8956_v46  ;;  %v1189_v46 = vld [vmem:[%s12937_s7 + $0x2a8] sm:$0xff] }
 0x218   :  { %v7751_v51 = vcombine.high %v1185_v45, %v1189_v46  ;;  %v7750_v54 = vcombine.low %v1185_v45, %v1189_v46 }
 0x21a   :  { %942 = vmatpush1.bf16.msra.mxu1 %v8954_v47  ;;  %v7796_v47 = vcombine.low %v10299_v39, %v10304_v40  ;;  %v1260_v39 = vld [vmem:[%s12937_s7 + $0x4e0] sm:$0xff] }
 0x21b   :  { %943 = vmatprep.subr.bf16.mxu1 %v8959_v48  ;;  %v7798_v48 = vcombine.low %v10309_v41, %v10316_v44 }
 0x21e   :  { %944 = vmatpush1.bf16.msra.mxu1 %v8957_v52  ;;  %v1193_v52 = vld [vmem:[%s12937_s7 + $0x2c8] sm:$0xff] }
 0x21f   :  { %2786 = vmatprep.subr.bf16.mxu1 %v7671_v53  ;;  %v1197_v53 = vld [vmem:[%s12937_s7 + $0x2e8] sm:$0xff] }
 0x220   :  { %v7759_v55 = vcombine.high %v1193_v52, %v1197_v53  ;;  %v7758_v58 = vcombine.low %v1193_v52, %v1197_v53  ;;  %v1252_v53 = vld [vmem:[%s12937_s7 + $0x4a0] sm:$0xff] }
 0x221   :  { %946 = vmatmul.mubr.bf16.vlgmr.msra.gmra.mrb[32].mxu1 %v10080_v37  ;;  %v1137_v37 = vld [vmem:[%s12937_s7 + $0x108] sm:$0xff] }
 0x222   :  { %955 = vmatprep.mubr.bf16.mxu1 %v10107_v59  ;;  %2787 = vmatpush1.bf16.msra.mxu1 %v7670_v56  ;;  %v1141_v59 = vld [vmem:[%s12937_s7 + $0x128] sm:$0xff] }
 0x223   :  { %2788 = vmatprep.subr.bf16.mxu1 %v7679_v57  ;;  %v7703_v5 = vcombine.high %v1137_v37, %v1141_v59  ;;  %v7702_v8 = vcombine.low %v1137_v37, %v1141_v59  ;;  %v1201_v56 = vld [vmem:[%s12937_s7 + $0x308] sm:$0xff] }
 0x224   :  { %v1205_v57 = vld [vmem:[%s12937_s7 + $0x328] sm:$0xff] }
 0x225   :  { %v7767_v60 = vcombine.high %v1201_v56, %v1205_v57  ;;  %v7766_v63 = vcombine.low %v1201_v56, %v1205_v57 }
 0x226   :  { %2789 = vmatpush1.bf16.msra.mxu1 %v7678_v61  ;;  %v1209_v61 = vld [vmem:[%s12937_s7 + $0x348] sm:$0xff] }
 0x227   :  { %2790 = vmatprep.subr.bf16.mxu1 %v7687_v62  ;;  %v1213_v62 = vld [vmem:[%s12937_s7 + $0x368] sm:$0xff] }
 0x228   :  { %v7775_v1 = vcombine.high %v1209_v61, %v1213_v62  ;;  %v7774_v37 = vcombine.low %v1209_v61, %v1213_v62 }
 0x229   :  { %956 = vmatmul.mubr.bf16.gmra.mrb[36].mxu1 %v10112_v0  ;;  %v1153_v0 = vld [vmem:[%s12937_s7 + $0x188] sm:$0xff] }
 0x22a   :  { %965 = vmatprep.mubr.bf16.mxu1 %v10129_v16  ;;  %2791 = vmatpush1.bf16.msra.mxu1 %v7686_v2  ;;  %v1212_v16 = vld [vmem:[%s12937_s7 + $0x360] sm:$0xff]  ;;  %v7719_v17 = vcombine.high %v1153_v0, %v1157_v11  ;;  %v7718_v21 = vcombine.low %v1153_v0, %v1157_v11  ;;  %v1217_v2 = vld [vmem:[%s12937_s7 + $0x388] sm:$0xff] }
 0x22b   :  { %2792 = vmatprep.subr.bf16.mxu1 %v7695_v3  ;;  %v7773_v18 = vcombine.high %v1208_v15, %v1212_v16  ;;  %v7772_v20 = vcombine.low %v1208_v15, %v1212_v16  ;;  %v1221_v3 = vld [vmem:[%s12937_s7 + $0x3a8] sm:$0xff]  ;;  %v10363_v0 = vld [vmem:[%s12936_s6] sm:$0xf] }
 0x22c   :  { %v7783_v59 = vcombine.high %v1217_v2, %v1221_v3  ;;  %v7782_v6 = vcombine.low %v1217_v2, %v1221_v3  ;;  %v1007_v11 = vrot.slane %v10363_v0, %v9894_v35 }
 0x22d   :  { %2666 = vmatprep.subr.bf16.mxu0 %v7773_v18 }
 0x22e   :  { %2793 = vmatpush1.bf16.msra.mxu1 %v7694_v4  ;;  %2667 = vmatpush1.bf16.msra.mxu0 %v7772_v20  ;;  %v1225_v4 = vld [vmem:[%s12937_s7 + $0x3c8] sm:$0xff]  ;;  %v1024_v15 = vpack.c.bf16 %v1007_v11, %v1007_v11 }
 0x22f   :  { %2794 = vmatprep.subr.bf16.mxu1 %v7703_v5  ;;  %2668 = vmatprep.subr.bf16.mxu0 %v7781_v25  ;;  %v1229_v5 = vld [vmem:[%s12937_s7 + $0x3e8] sm:$0xff] }
 0x230   :  { %v7791_v7 = vcombine.high %v1225_v4, %v1229_v5 }
 0x231   :  { %966 = vmatmul.mubr.bf16.gmra.mrb[40].mxu1 %v10127_v14  ;;  %v1165_v14 = vld [vmem:[%s12937_s7 + $0x1e8] sm:$0xff] }
 0x232   :  { %975 = vmatprep.mubr.bf16.mxu1 %v10149_v10  ;;  %2795 = vmatpush1.bf16.msra.mxu1 %v7702_v8  ;;  %v7727_v24 = vcombine.high %v1161_v19, %v1165_v14  ;;  %v7780_v10 = vcombine.low %v1216_v22, %v1220_v23  ;;  %v7726_v13 = vcombine.low %v1161_v19, %v1165_v14 }
 0x233   :  { %2796 = vmatprep.subr.bf16.mxu1 %v7711_v9  ;;  %v7790_v8 = vcombine.low %v1225_v4, %v1229_v5  ;;  %v7799_v9 = vcombine.high %v10309_v41, %v10316_v44  ;;  %v1257_v41 = vld [vmem:[%s12937_s7 + $0x4c8] sm:$0xff] }
 0x234   :  { %2669 = vmatpush1.bf16.msra.mxu0 %v7780_v10  ;;  %v1261_v44 = vld [vmem:[%s12937_s7 + $0x4e8] sm:$0xff] }
 0x235   :  { %2670 = vmatprep.subr.bf16.mxu0 %v7789_v34  ;;  %v1241_v34 = vld [vmem:[%s12937_s7 + $0x448] sm:$0xff] }
 0x236   :  { %2797 = vmatpush1.bf16.msra.mxu1 %v7710_v12  ;;  %v1011_v12 = vrot.slane %v10363_v0, %v10027_v50 }
 0x237   :  { %2798 = vmatprep.subr.bf16.mxu1 %v7719_v17  ;;  %v1029_v17 = vpack.i.b16 %v1024_v15, %v1024_v15  ;;  %v1265_v15 = vld [vmem:[%s12937_s7 + $0x508] sm:$0xff] }
 0x238   :  { %2671 = vmatpush1.bf16.msra.mxu0 %v7788_v32  ;;  %v1025_v16 = vpack.c.bf16 %v1011_v12, %v1011_v12  ;;  %v1268_v12 = vld [vmem:[%s12937_s7 + $0x520] sm:$0xff] }
 0x239   :  { %976 = vmatmul.mubr.bf16.gmra.mrb[44].mxu1 %v10147_v28  ;;  %v1181_v28 = vld [vmem:[%s12937_s7 + $0x268] sm:$0xff]  ;;  %2713 = vmatprep.subr.bf16.mxu0 %v7797_v43  ;;  %v10370_v20 = vrot.slane %v1029_v17, %v9894_v35 }
 0x23a   :  { %2799 = vmatpush1.bf16.msra.mxu1 %v7718_v21  ;;  %v7743_v42 = vcombine.high %v1177_v36, %v1181_v28  ;;  %v7742_v49 = vcombine.low %v1177_v36, %v1181_v28  ;;  %v1036_v18 = vpack.i.b16 %v1025_v16, %v1025_v16  ;;  %v1245_v36 = vld [vmem:[%s12937_s7 + $0x468] sm:$0xff] }
 0x23b   :  { %2800 = vmatprep.subr.bf16.mxu1 %v7727_v24  ;;  %v1269_v16 = vld [vmem:[%s12937_s7 + $0x528] sm:$0xff] }
 0x23c   :  { %v10373_v22 = vrot.slane %v1036_v18, %v9894_v35 }
 0x23e   :  { %2801 = vmatpush1.bf16.msra.mxu1 %v7726_v13  ;;  %v1240_v13 = vld [vmem:[%s12937_s7 + $0x440] sm:$0xff] }
 0x23f   :  { %2802 = vmatprep.subr.bf16.mxu1 %v7735_v31  ;;  %v1244_v31 = vld [vmem:[%s12937_s7 + $0x460] sm:$0xff] }
 0x240   :  { %v7805_v46 = vcombine.high %v1240_v13, %v1244_v31 }
 0x242   :  { %2803 = vmatpush1.bf16.msra.mxu1 %v7734_v38 }
 0x243   :  { %2804 = vmatprep.subr.bf16.mxu1 %v7743_v42 }
 0x246   :  { %2805 = vmatpush1.bf16.msra.mxu1 %v7742_v49  ;;  %v7807_v49 = vcombine.high %v1241_v34, %v1245_v36 }
 0x247   :  { %2806 = vmatprep.subr.bf16.mxu1 %v7751_v51  ;;  %v1248_v51 = vld [vmem:[%s12937_s7 + $0x480] sm:$0xff] }
 0x248   :  { %v7813_v62 = vcombine.high %v1248_v51, %v1252_v53 }
 0x24a   :  { %2807 = vmatpush1.bf16.msra.mxu1 %v7750_v54  ;;  %v1249_v54 = vld [vmem:[%s12937_s7 + $0x488] sm:$0xff] }
 0x24b   :  { %2808 = vmatprep.subr.bf16.mxu1 %v7759_v55  ;;  %v1253_v55 = vld [vmem:[%s12937_s7 + $0x4a8] sm:$0xff] }
 0x24e   :  { %2809 = vmatpush1.bf16.msra.mxu1 %v7758_v58  ;;  %v7804_v58 = vcombine.low %v1240_v13, %v1244_v31  ;;  %v1273_v13 = vld [vmem:[%s12937_s7 + $0x548] sm:$0xff] }
 0x24f   :  { %2810 = vmatprep.subr.bf16.mxu1 %v7767_v60  ;;  %v7806_v60 = vcombine.low %v1241_v34, %v1245_v36 }
 0x252   :  { %2811 = vmatpush1.bf16.msra.mxu1 %v7766_v63  ;;  %v7815_v63 = vcombine.high %v1249_v54, %v1253_v55 }
 0x253   :  { %2812 = vmatprep.subr.bf16.mxu1 %v7775_v1  ;;  %v1256_v1 = vld [vmem:[%s12937_s7 + $0x4c0] sm:$0xff] }
 0x254   :  { %v7821_v4 = vcombine.high %v1256_v1, %v1260_v39  ;;  %v7820_v18 = vcombine.low %v1256_v1, %v1260_v39  ;;  %v1288_v1 = vld [vmem:[%s12937_s7 + $0x5c0] sm:$0xff] }
 0x255   :  { %v1292_v39 = vld [vmem:[%s12937_s7 + $0x5e0] sm:$0xff] }
 0x256   :  { %2813 = vmatpush1.bf16.msra.mxu1 %v7774_v37  ;;  %v7814_v37 = vcombine.low %v1249_v54, %v1253_v55  ;;  %v1281_v54 = vld [vmem:[%s12937_s7 + $0x588] sm:$0xff] }
 0x257   :  { %2814 = vmatprep.subr.bf16.mxu1 %v7783_v59  ;;  %v1285_v55 = vld [vmem:[%s12937_s7 + $0x5a8] sm:$0xff] }
 0x25a   :  { %2815 = vmatpush1.bf16.msra.mxu1 %v7782_v6 }
 0x25b   :  { %2816 = vmatprep.subr.bf16.mxu1 %v7791_v7  ;;  %v7823_v7 = vcombine.high %v1257_v41, %v1261_v44 }
 0x25e   :  { %2817 = vmatpush1.bf16.msra.mxu1 %v7790_v8 }
 0x25f   :  { %2859 = vmatprep.subr.bf16.mxu1 %v7799_v9  ;;  %v1264_v9 = vld [vmem:[%s12937_s7 + $0x500] sm:$0xff] }
 0x260   :  { %v7828_v36 = vcombine.low %v1264_v9, %v1268_v12 }
 0x2b4   :  { %v874_v19 = vpop.f32.mrb[16].mxu1 }
 0x2b5   :  { %v876_v14 = vpop.f32.mrb[17].mxu1 }
 0x2b6   :  { %v878_v21 = vpop.f32.mrb[18].mxu1 }
 0x2b7   :  { %v986_v23 = vpack.c.bf16 %v878_v21, %v874_v19  ;;  %v880_v24 = vpop.f32.mrb[19].mxu1  ;;  %v7822_v19 = vcombine.low %v1257_v41, %v1261_v44 }
 0x2b8   :  { %v987_v25 = vpack.c.bf16 %v880_v24, %v876_v14  ;;  %v7831_v24 = vcombine.high %v1265_v15, %v1269_v16 }
 0x2b9   :  { %v1056_v26 = vadd.bf16 %v10370_v20, %v986_v23  ;;  %v7829_v23 = vcombine.high %v1264_v9, %v1268_v12 }
 0x2ba   :  { %v1057_v27 = vadd.bf16 %v10373_v22, %v987_v25  ;;  %v1272_v25 = vld [vmem:[%s12937_s7 + $0x540] sm:$0xff] }
 0x2bb   :  { %v1072_v10 = vmul.bf16 1045249613, %v1056_v26 }
 0x2bc   :  { %v1073_v29 = vmul.bf16 1045249613, %v1057_v27  ;;  %v884_v30 = vpop.f32.mrb[20].mxu1 }
 0x2bd   :  { %v886_v28 = vpop.f32.mrb[21].mxu1  ;;  %v10391_v42 = vmax.bf16 %v1072_v10, %v1056_v26  ;;  %v1276_v10 = vld [vmem:[%s12937_s7 + $0x560] sm:$0xff] }
 0x2be   :  { %v10389_v32 = vmax.bf16 %v1073_v29, %v1057_v27  ;;  %v888_v38 = vpop.f32.mrb[22].mxu1  ;;  %v1277_v29 = vld [vmem:[%s12937_s7 + $0x568] sm:$0xff] }
 0x2bf   :  { %v990_v43 = vpack.c.bf16 %v888_v38, %v884_v30  ;;  %v890_v45 = vpop.f32.mrb[23].mxu1 }
 0x2c0   :  { %v991_v52 = vpack.c.bf16 %v890_v45, %v886_v28  ;;  %2672 = vmatprep.mubr.bf16.mxu0 %v10389_v32  ;;  %2818 = vmatprep.mubr.bf16.mxu1 %v10389_v32  ;;  %v7830_v28 = vcombine.low %v1265_v15, %v1269_v16  ;;  %v7837_v45 = vcombine.high %v1272_v25, %v1276_v10  ;;  %v1304_v15 = vld [vmem:[%s12937_s7 + $0x640] sm:$0xff] }
 0x2c1   :  { %v1060_v56 = vadd.bf16 %v10370_v20, %v990_v43  ;;  %2673 = vmatmul.mubr.bf16.vlgmr.msra.gmra.mrb[8].mxu0 %v10391_v42  ;;  %2819 = vmatmul.mubr.bf16.vlgmr.msra.gmra.mrb[48].mxu1 %v10391_v42  ;;  %v1308_v16 = vld [vmem:[%s12937_s7 + $0x660] sm:$0xff] }
 0x2c2   :  { %v1061_v57 = vadd.bf16 %v10373_v22, %v991_v52  ;;  %2714 = vmatpush1.bf16.msra.mxu0 %v7796_v47  ;;  %2860 = vmatpush1.bf16.msra.mxu1 %v7798_v48  ;;  %v7812_v48 = vcombine.low %v1248_v51, %v1252_v53  ;;  %v1280_v51 = vld [vmem:[%s12937_s7 + $0x580] sm:$0xff] }
 0x2c3   :  { %v1076_v61 = vmul.bf16 1045249613, %v1060_v56  ;;  %2715 = vmatprep.subr.bf16.mxu0 %v7805_v46  ;;  %2861 = vmatprep.subr.bf16.mxu1 %v7807_v49  ;;  %v7839_v46 = vcombine.high %v1273_v13, %v1277_v29  ;;  %v1284_v53 = vld [vmem:[%s12937_s7 + $0x5a0] sm:$0xff] }
 0x2c4   :  { %v1077_v40 = vmul.bf16 1045249613, %v1061_v57  ;;  %v894_v47 = vpop.f32.mrb[24].mxu1  ;;  %v7844_v44 = vcombine.low %v1280_v51, %v1284_v53 }
 0x2c5   :  { %v896_v2 = vpop.f32.mrb[25].mxu1  ;;  %v10431_v5 = vmax.bf16 %v1076_v61, %v1060_v56 }
 0x2c6   :  { %v10429_v3 = vmax.bf16 %v1077_v40, %v1061_v57  ;;  %2716 = vmatpush1.bf16.msra.mxu0 %v7804_v58  ;;  %2862 = vmatpush1.bf16.msra.mxu1 %v7806_v60  ;;  %v898_v59 = vpop.f32.mrb[26].mxu1  ;;  %v7836_v57 = vcombine.low %v1272_v25, %v1276_v10  ;;  %v7838_v58 = vcombine.low %v1273_v13, %v1277_v29  ;;  %v1289_v40 = vld [vmem:[%s12937_s7 + $0x5c8] sm:$0xff]  ;;  %v1316_v25 = vld [vmem:[%s12937_s7 + $0x6a0] sm:$0xff] }
 0x2c7   :  { %2717 = vmatprep.subr.bf16.mxu0 %v7813_v62  ;;  %2863 = vmatprep.subr.bf16.mxu1 %v7815_v63  ;;  %v994_v6 = vpack.c.bf16 %v898_v59, %v894_v47  ;;  %v900_v8 = vpop.f32.mrb[27].mxu1  ;;  %v7845_v62 = vcombine.high %v1280_v51, %v1284_v53  ;;  %v7847_v63 = vcombine.high %v1281_v54, %v1285_v55  ;;  %v1296_v59 = vld [vmem:[%s12937_s7 + $0x600] sm:$0xff]  ;;  %v10557_v51 = vsub.s32 3, %v9891_v33 }
 0x2c8   :  { %2682 = vmatprep.mubr.bf16.mxu0 %v10429_v3  ;;  %2828 = vmatprep.mubr.bf16.mxu1 %v10429_v3  ;;  %v995_v11 = vpack.c.bf16 %v900_v8, %v896_v2  ;;  %v7853_v2 = vcombine.high %v1288_v1, %v1292_v39  ;;  %v7852_v8 = vcombine.low %v1288_v1, %v1292_v39  ;;  %v1340_v39 = vld [vmem:[%s12937_s7 + $0x760] sm:$0xff] }
 0x2c9   :  { %2683 = vmatmul.mubr.bf16.gmra.mrb[12].mxu0 %v10431_v5  ;;  %2829 = vmatmul.mubr.bf16.gmra.mrb[52].mxu1 %v10431_v5  ;;  %v1064_v17 = vadd.bf16 %v10370_v20, %v994_v6  ;;  %v1297_v6 = vld [vmem:[%s12937_s7 + $0x608] sm:$0xff]  ;;  %v7868_v10 = vcombine.low %v1304_v15, %v1308_v16 }
 0x2ca   :  { %2718 = vmatpush1.bf16.msra.mxu0 %v7812_v48  ;;  %2864 = vmatpush1.bf16.msra.mxu1 %v7814_v37  ;;  %v1065_v14 = vadd.bf16 %v10373_v22, %v995_v11  ;;  %v7846_v48 = vcombine.low %v1281_v54, %v1285_v55  ;;  %v1328_v54 = vld [vmem:[%s12937_s7 + $0x700] sm:$0xff] }
 0x2cb   :  { %v1080_v21 = vmul.bf16 1045249613, %v1064_v17  ;;  %2719 = vmatprep.subr.bf16.mxu0 %v7821_v4  ;;  %2865 = vmatprep.subr.bf16.mxu1 %v7823_v7  ;;  %v1300_v4 = vld [vmem:[%s12937_s7 + $0x620] sm:$0xff]  ;;  %v1301_v7 = vld [vmem:[%s12937_s7 + $0x628] sm:$0xff] }
 0x2cc   :  { %v1081_v26 = vmul.bf16 1045249613, %v1065_v14  ;;  %v904_v27 = vpop.f32.mrb[28].mxu1  ;;  %v7861_v11 = vcombine.high %v1296_v59, %v1300_v4  ;;  %v7863_v12 = vcombine.high %v1297_v6, %v1301_v7  ;;  %v1332_v55 = vld [vmem:[%s12937_s7 + $0x720] sm:$0xff] }
 0x2cd   :  { %v10463_v30 = vmax.bf16 %v1080_v21, %v1064_v17  ;;  %v906_v31 = vpop.f32.mrb[29].mxu1  ;;  %v1305_v17 = vld [vmem:[%s12937_s7 + $0x648] sm:$0xff]  ;;  %v7869_v21 = vcombine.high %v1304_v15, %v1308_v16 }
 0x2ce   :  { %v10465_v34 = vmax.bf16 %v1081_v26, %v1065_v14  ;;  %2720 = vmatpush1.bf16.msra.mxu0 %v7820_v18  ;;  %2866 = vmatpush1.bf16.msra.mxu1 %v7822_v19  ;;  %v908_v38 = vpop.f32.mrb[30].mxu1  ;;  %v1309_v18 = vld [vmem:[%s12937_s7 + $0x668] sm:$0xff]  ;;  %v7860_v19 = vcombine.low %v1296_v59, %v1300_v4  ;;  %v7862_v14 = vcombine.low %v1297_v6, %v1301_v7  ;;  %v1344_v4 = vld [vmem:[%s12937_s7 + $0x780] sm:$0xff] }
 0x2cf   :  { %2721 = vmatprep.subr.bf16.mxu0 %v7829_v23  ;;  %2867 = vmatprep.subr.bf16.mxu1 %v7831_v24  ;;  %v998_v43 = vpack.c.bf16 %v908_v38, %v904_v27  ;;  %v910_v49 = vpop.f32.mrb[31].mxu1  ;;  %v7871_v23 = vcombine.high %v1305_v17, %v1309_v18  ;;  %v1312_v24 = vld [vmem:[%s12937_s7 + $0x680] sm:$0xff]  ;;  %v1313_v26 = vld [vmem:[%s12937_s7 + $0x688] sm:$0xff]  ;;  %v7870_v13 = vcombine.low %v1305_v17, %v1309_v18 }
 0x2d0   :  { %v999_v52 = vpack.c.bf16 %v910_v49, %v906_v31  ;;  %2692 = vmatprep.mubr.bf16.mxu0 %v10465_v34  ;;  %2838 = vmatprep.mubr.bf16.mxu1 %v10465_v34  ;;  %v1317_v27 = vld [vmem:[%s12937_s7 + $0x6a8] sm:$0xff]  ;;  %v7877_v29 = vcombine.high %v1312_v24, %v1316_v25  ;;  %v1348_v6 = vld [vmem:[%s12937_s7 + $0x7a0] sm:$0xff] }
 0x2d1   :  { %v1068_v56 = vadd.bf16 %v10370_v20, %v998_v43  ;;  %2693 = vmatmul.mubr.bf16.gmra.mrb[16].mxu0 %v10463_v30  ;;  %2839 = vmatmul.mubr.bf16.gmra.mrb[56].mxu1 %v10463_v30  ;;  %v7879_v31 = vcombine.high %v1313_v26, %v1317_v27  ;;  %v1321_v38 = vld [vmem:[%s12937_s7 + $0x6c8] sm:$0xff]  ;;  %v7878_v49 = vcombine.low %v1313_v26, %v1317_v27  ;;  %v1352_v18 = vld [vmem:[%s12937_s7 + $0x7c0] sm:$0xff] }
 0x2d2   :  { %2722 = vmatpush1.bf16.msra.mxu0 %v7828_v36  ;;  %2868 = vmatpush1.bf16.msra.mxu1 %v7830_v28  ;;  %v1069_v60 = vadd.bf16 %v10373_v22, %v999_v52  ;;  %v1293_v22 = vld [vmem:[%s12937_s7 + $0x5e8] sm:$0xff]  ;;  %v1320_v36 = vld [vmem:[%s12937_s7 + $0x6c0] sm:$0xff]  ;;  %v7909_v16 = vcombine.high %v1344_v4, %v1348_v6 }
 0x2d3   :  { %v1084_v61 = vmul.bf16 1045249613, %v1068_v56  ;;  %2723 = vmatprep.subr.bf16.mxu0 %v7837_v45  ;;  %2869 = vmatprep.subr.bf16.mxu1 %v7839_v46  ;;  %v7855_v37 = vcombine.high %v1289_v40, %v1293_v22  ;;  %v7854_v9 = vcombine.low %v1289_v40, %v1293_v22  ;;  %v1324_v28 = vld [vmem:[%s12937_s7 + $0x6e0] sm:$0xff]  ;;  %v1325_v43 = vld [vmem:[%s12937_s7 + $0x6e8] sm:$0xff]  ;;  %v10554_v45 = vsub.s32 2, %v9891_v33 }
 0x2d4   :  { %v1085_v20 = vmul.bf16 1045249613, %v1069_v60  ;;  %v7876_v46 = vcombine.low %v1312_v24, %v1316_v25  ;;  %v7885_v52 = vcombine.high %v1320_v36, %v1324_v28  ;;  %v7887_v53 = vcombine.high %v1321_v38, %v1325_v43  ;;  %v1337_v40 = vld [vmem:[%s12937_s7 + $0x748] sm:$0xff] }
 0x2d5   :  { %v10497_v47 = vmax.bf16 %v1084_v61, %v1068_v56  ;;  %v1329_v56 = vld [vmem:[%s12937_s7 + $0x708] sm:$0xff]  ;;  %v7886_v61 = vcombine.low %v1321_v38, %v1325_v43  ;;  %v1106_v38 = vld [vmem:[%s12937_s7 + $0x10] sm:$0xff] }
 0x2d6   :  { %v10499_v41 = vmax.bf16 %v1085_v20, %v1069_v60  ;;  %2724 = vmatpush1.bf16.msra.mxu0 %v7836_v57  ;;  %2870 = vmatpush1.bf16.msra.mxu1 %v7838_v58  ;;  %v1333_v57 = vld [vmem:[%s12937_s7 + $0x728] sm:$0xff]  ;;  %v1015_v58 = vrot.slane %v10363_v0, %v10554_v45  ;;  %v7884_v60 = vcombine.low %v1320_v36, %v1324_v28  ;;  %v1336_v20 = vld [vmem:[%s12937_s7 + $0x740] sm:$0xff] }
 0x2d7   :  { %2725 = vmatprep.subr.bf16.mxu0 %v7845_v62  ;;  %2871 = vmatprep.subr.bf16.mxu1 %v7847_v63  ;;  %v1019_v62 = vrot.slane %v10363_v0, %v10557_v51  ;;  %v7893_v63 = vcombine.high %v1328_v54, %v1332_v55  ;;  %v7895_v1 = vcombine.high %v1329_v56, %v1333_v57  ;;  %v1341_v0 = vld [vmem:[%s12937_s7 + $0x768] sm:$0xff] }
 0x2d8   :  { %2702 = vmatprep.mubr.bf16.mxu0 %v10499_v41  ;;  %2848 = vmatprep.mubr.bf16.mxu1 %v10499_v41  ;;  %v1026_v22 = vpack.c.bf16 %v1015_v58, %v1015_v58  ;;  %v7903_v59 = vcombine.high %v1337_v40, %v1341_v0  ;;  %v1345_v7 = vld [vmem:[%s12937_s7 + $0x788] sm:$0xff] }
 0x2d9   :  { %2703 = vmatmul.mubr.bf16.gmra.mrb[20].mxu0 %v10497_v47  ;;  %2849 = vmatmul.mubr.bf16.gmra.mrb[60].mxu1 %v10497_v47 }
 0x2da   :  { %2726 = vmatpush1.bf16.msra.mxu0 %v7844_v44  ;;  %2872 = vmatpush1.bf16.msra.mxu1 %v7846_v48  ;;  %v7892_v44 = vcombine.low %v1328_v54, %v1332_v55  ;;  %v7894_v48 = vcombine.low %v1329_v56, %v1333_v57 }
 0x2db   :  { %2727 = vmatprep.subr.bf16.mxu0 %v7853_v2  ;;  %2873 = vmatprep.subr.bf16.mxu1 %v7855_v37  ;;  %v1027_v2 = vpack.c.bf16 %v1019_v62, %v1019_v62  ;;  %v7901_v37 = vcombine.high %v1336_v20, %v1340_v39  ;;  %v1118_v62 = vld [vmem:[%s12937_s7 + $0x70] sm:$0xff] }
 0x2dd   :  { %v1050_v15 = vpack.i.b16 %v1027_v2, %v1027_v2 }
 0x2de   :  { %2728 = vmatpush1.bf16.msra.mxu0 %v7852_v8  ;;  %2874 = vmatpush1.bf16.msra.mxu1 %v7854_v9  ;;  %v1349_v8 = vld [vmem:[%s12937_s7 + $0x7a8] sm:$0xff]  ;;  %v1043_v9 = vpack.i.b16 %v1026_v22, %v1026_v22 }
 0x2df   :  { %2729 = vmatprep.subr.bf16.mxu0 %v7861_v11  ;;  %2875 = vmatprep.subr.bf16.mxu1 %v7863_v12  ;;  %v7900_v11 = vcombine.low %v1336_v20, %v1340_v39  ;;  %v7902_v12 = vcombine.low %v1337_v40, %v1341_v0  ;;  %v7911_v17 = vcombine.high %v1345_v7, %v1349_v8  ;;  %v1115_v20 = vld [vmem:[%s12937_s7 + $0x58] sm:$0xff] }
 0x2e0   :  { %v10612_v25 = vrot.slane %v1043_v9, %v9894_v35  ;;  %v10615_v27 = vrot.slane %v1050_v15, %v9894_v35  ;;  %v1119_v39 = vld [vmem:[%s12937_s7 + $0x78] sm:$0xff]  ;;  %v1126_v9 = vld [vmem:[%s12937_s7 + $0xb0] sm:$0xff] }
 0x2e2   :  { %2730 = vmatpush1.bf16.msra.mxu0 %v7860_v19  ;;  %2876 = vmatpush1.bf16.msra.mxu1 %v7862_v14  ;;  %v1356_v14 = vld [vmem:[%s12937_s7 + $0x7e0] sm:$0xff] }
 0x2e3   :  { %2731 = vmatprep.subr.bf16.mxu0 %v7869_v21  ;;  %2877 = vmatprep.subr.bf16.mxu1 %v7871_v23  ;;  %v1353_v21 = vld [vmem:[%s12937_s7 + $0x7c8] sm:$0xff]  ;;  %v7917_v36 = vcombine.high %v1352_v18, %v1356_v14  ;;  %v7916_v55 = vcombine.low %v1352_v18, %v1356_v14  ;;  %v7682_v18 = vcombine.low %v1115_v20, %v1119_v39 }
 0x2e4   :  { %v1357_v23 = vld [vmem:[%s12937_s7 + $0x7e8] sm:$0xff] }
 0x2e5   :  { %v7919_v28 = vcombine.high %v1353_v21, %v1357_v23  ;;  %v7918_v56 = vcombine.low %v1353_v21, %v1357_v23  ;;  %v1130_v23 = vld [vmem:[%s12937_s7 + $0xd0] sm:$0xff] }
 0x2e6   :  { %2732 = vmatpush1.bf16.msra.mxu0 %v7868_v10  ;;  %2878 = vmatpush1.bf16.msra.mxu1 %v7870_v13  ;;  %v7908_v10 = vcombine.low %v1344_v4, %v1348_v6  ;;  %v7910_v13 = vcombine.low %v1345_v7, %v1349_v8  ;;  %v7683_v6 = vcombine.high %v1115_v20, %v1119_v39  ;;  %v1122_v7 = vld [vmem:[%s12937_s7 + $0x90] sm:$0xff] }
 0x2e7   :  { %2733 = vmatprep.subr.bf16.mxu0 %v7877_v29  ;;  %2879 = vmatprep.subr.bf16.mxu1 %v7879_v31  ;;  %v7689_v14 = vcombine.high %v1122_v7, %v1126_v9 }
 0x2ea   :  { %2734 = vmatpush1.bf16.msra.mxu0 %v7876_v46  ;;  %2880 = vmatpush1.bf16.msra.mxu1 %v7878_v49  ;;  %v1110_v46 = vld [vmem:[%s12937_s7 + $0x30] sm:$0xff]  ;;  %v1107_v49 = vld [vmem:[%s12937_s7 + $0x18] sm:$0xff] }
 0x2eb   :  { %2735 = vmatprep.subr.bf16.mxu0 %v7885_v52  ;;  %2881 = vmatprep.subr.bf16.mxu1 %v7887_v53  ;;  %v1111_v52 = vld [vmem:[%s12937_s7 + $0x38] sm:$0xff]  ;;  %v7673_v58 = vcombine.high %v1106_v38, %v1110_v46  ;;  %v7672_v0 = vcombine.low %v1106_v38, %v1110_v46 }
 0x2ee   :  { %2736 = vmatpush1.bf16.msra.mxu0 %v7884_v60  ;;  %2882 = vmatpush1.bf16.msra.mxu1 %v7886_v61  ;;  %v7675_v60 = vcombine.high %v1107_v49, %v1111_v52  ;;  %v1114_v61 = vld [vmem:[%s12937_s7 + $0x50] sm:$0xff] }
 0x2ef   :  { %2737 = vmatprep.subr.bf16.mxu0 %v7893_v63  ;;  %2883 = vmatprep.subr.bf16.mxu1 %v7895_v1  ;;  %v7681_v2 = vcombine.high %v1114_v61, %v1118_v62 }
 0x2f2   :  { %2738 = vmatpush1.bf16.msra.mxu0 %v7892_v44  ;;  %2884 = vmatpush1.bf16.msra.mxu1 %v7894_v48  ;;  %v7674_v48 = vcombine.low %v1107_v49, %v1111_v52 }
 0x2f3   :  { %2739 = vmatprep.subr.bf16.mxu0 %v7901_v37  ;;  %2885 = vmatprep.subr.bf16.mxu1 %v7903_v59 }
 0x2f4   :  { %v947_v19 = vpop.f32.mrb[32].mxu1 }
 0x2f5   :  { %v949_v24 = vpop.f32.mrb[33].mxu1 }
 0x2f6   :  { %v951_v26 = vpop.f32.mrb[34].mxu1  ;;  %2740 = vmatpush1.bf16.msra.mxu0 %v7900_v11  ;;  %2886 = vmatpush1.bf16.msra.mxu1 %v7902_v12  ;;  %v1123_v11 = vld [vmem:[%s12937_s7 + $0x98] sm:$0xff] }
 0x2f7   :  { %v988_v29 = vpack.c.bf16 %v951_v26, %v947_v19  ;;  %v953_v31 = vpop.f32.mrb[35].mxu1  ;;  %2741 = vmatprep.subr.bf16.mxu0 %v7909_v16  ;;  %2887 = vmatprep.subr.bf16.mxu1 %v7911_v17  ;;  %v1127_v12 = vld [vmem:[%s12937_s7 + $0xb8] sm:$0xff]  ;;  %v7680_v17 = vcombine.low %v1114_v61, %v1118_v62 }
 0x2f8   :  { %v989_v43 = vpack.c.bf16 %v953_v31, %v949_v24  ;;  %v7691_v21 = vcombine.high %v1123_v11, %v1127_v12  ;;  %v1134_v24 = vld [vmem:[%s12937_s7 + $0xf0] sm:$0xff] }
 0x2f9   :  { %v1058_v53 = vadd.bf16 %v10612_v25, %v988_v29  ;;  %v1135_v29 = vld [vmem:[%s12937_s7 + $0xf8] sm:$0xff]  ;;  %v7697_v46 = vcombine.high %v1130_v23, %v1134_v24 }
 0x2fa   :  { %v1059_v54 = vadd.bf16 %v10615_v27, %v989_v43  ;;  %2742 = vmatpush1.bf16.msra.mxu0 %v7908_v10  ;;  %2888 = vmatpush1.bf16.msra.mxu1 %v7910_v13  ;;  %v1131_v13 = vld [vmem:[%s12937_s7 + $0xd8] sm:$0xff]  ;;  %v7690_v43 = vcombine.low %v1123_v11, %v1127_v12 }
 0x2fb   :  { %v1074_v57 = vmul.bf16 1045249613, %v1058_v53  ;;  %2743 = vmatprep.subr.bf16.mxu0 %v7917_v36  ;;  %2889 = vmatprep.subr.bf16.mxu1 %v7919_v28  ;;  %v7688_v36 = vcombine.low %v1122_v7, %v1126_v9 }
 0x2fc   :  { %v1075_v63 = vmul.bf16 1045249613, %v1059_v54  ;;  %v957_v1 = vpop.f32.mrb[36].mxu1 }
 0x2fd   :  { %v959_v40 = vpop.f32.mrb[37].mxu1  ;;  %v10645_v37 = vmax.bf16 %v1074_v57, %v1058_v53  ;;  %v1142_v57 = vld [vmem:[%s12937_s7 + $0x130] sm:$0xff] }
 0x2fe   :  { %v10643_v22 = vmax.bf16 %v1075_v63, %v1059_v54  ;;  %v961_v44 = vpop.f32.mrb[38].mxu1  ;;  %2744 = vmatpush1.bf16.msra.mxu0 %v7916_v55  ;;  %2890 = vmatpush1.bf16.msra.mxu1 %v7918_v56  ;;  %v7699_v54 = vcombine.high %v1131_v13, %v1135_v29  ;;  %v1138_v55 = vld [vmem:[%s12937_s7 + $0x110] sm:$0xff]  ;;  %v7696_v63 = vcombine.low %v1130_v23, %v1134_v24  ;;  %v1155_v23 = vld [vmem:[%s12937_s7 + $0x198] sm:$0xff] }
 0x2ff   :  { %v992_v59 = vpack.c.bf16 %v961_v44, %v957_v1  ;;  %v963_v4 = vpop.f32.mrb[39].mxu1  ;;  %2932 = vmatprep.subr.bf16.mxu0 %v7673_v58  ;;  %3078 = vmatprep.subr.bf16.mxu1 %v7675_v60  ;;  %v1139_v58 = vld [vmem:[%s12937_s7 + $0x118] sm:$0xff]  ;;  %v7698_v1 = vcombine.low %v1131_v13, %v1135_v29  ;;  %v7705_v39 = vcombine.high %v1138_v55, %v1142_v57  ;;  %v1150_v44 = vld [vmem:[%s12937_s7 + $0x170] sm:$0xff] }
 0x300   :  { %v993_v8 = vpack.c.bf16 %v963_v4, %v959_v40  ;;  %2745 = vmatprep.mubr.bf16.mxu0 %v10643_v22  ;;  %2891 = vmatprep.mubr.bf16.mxu1 %v10643_v22  ;;  %v1143_v60 = vld [vmem:[%s12937_s7 + $0x138] sm:$0xff]  ;;  %v7704_v7 = vcombine.low %v1138_v55, %v1142_v57 }
 0x301   :  { %v1062_v15 = vadd.bf16 %v10612_v25, %v992_v59  ;;  %2746 = vmatmul.mubr.bf16.vlgmr.msra.gmra.mrb[8].mxu0 %v10645_v37  ;;  %2892 = vmatmul.mubr.bf16.vlgmr.msra.gmra.mrb[48].mxu1 %v10645_v37  ;;  %v7707_v40 = vcombine.high %v1139_v58, %v1143_v60  ;;  %v1147_v59 = vld [vmem:[%s12937_s7 + $0x158] sm:$0xff]  ;;  %v7706_v11 = vcombine.low %v1139_v58, %v1143_v60  ;;  %v1170_v60 = vld [vmem:[%s12937_s7 + $0x210] sm:$0xff] }
 0x302   :  { %v1063_v16 = vadd.bf16 %v10615_v27, %v993_v8  ;;  %2933 = vmatpush1.bf16.msra.mxu0 %v7672_v0  ;;  %3079 = vmatpush1.bf16.msra.mxu1 %v7674_v48  ;;  %v1146_v0 = vld [vmem:[%s12937_s7 + $0x150] sm:$0xff]  ;;  %v1151_v4 = vld [vmem:[%s12937_s7 + $0x178] sm:$0xff] }
 0x303   :  { %v1078_v19 = vmul.bf16 1045249613, %v1062_v15  ;;  %2934 = vmatprep.subr.bf16.mxu0 %v7681_v2  ;;  %3080 = vmatprep.subr.bf16.mxu1 %v7683_v6  ;;  %v7713_v12 = vcombine.high %v1146_v0, %v1150_v44  ;;  %v1159_v24 = vld [vmem:[%s12937_s7 + $0x1b8] sm:$0xff]  ;;  %v7712_v13 = vcombine.low %v1146_v0, %v1150_v44  ;;  %v7714_v29 = vcombine.low %v1147_v59, %v1151_v4  ;;  %v1178_v0 = vld [vmem:[%s12937_s7 + $0x250] sm:$0xff] }
 0x304   :  { %v1079_v26 = vmul.bf16 1045249613, %v1063_v16  ;;  %v967_v10 = vpop.f32.mrb[40].mxu1  ;;  %v1182_v44 = vld [vmem:[%s12937_s7 + $0x270] sm:$0xff] }
 0x305   :  { %v969_v31 = vpop.f32.mrb[41].mxu1  ;;  %v10679_v49 = vmax.bf16 %v1078_v19, %v1062_v15  ;;  %v1154_v19 = vld [vmem:[%s12937_s7 + $0x190] sm:$0xff] }
 0x306   :  { %v10677_v28 = vmax.bf16 %v1079_v26, %v1063_v16  ;;  %v971_v38 = vpop.f32.mrb[42].mxu1  ;;  %2935 = vmatpush1.bf16.msra.mxu0 %v7680_v17  ;;  %3081 = vmatpush1.bf16.msra.mxu1 %v7682_v18  ;;  %v7715_v18 = vcombine.high %v1147_v59, %v1151_v4  ;;  %v7745_v4 = vcombine.high %v1178_v0, %v1182_v44 }
 0x307   :  { %v996_v52 = vpack.c.bf16 %v971_v38, %v967_v10  ;;  %v973_v53 = vpop.f32.mrb[43].mxu1  ;;  %2936 = vmatprep.subr.bf16.mxu0 %v7689_v14  ;;  %3082 = vmatprep.subr.bf16.mxu1 %v7691_v21  ;;  %v1158_v21 = vld [vmem:[%s12937_s7 + $0x1b0] sm:$0xff]  ;;  %v7723_v38 = vcombine.high %v1155_v23, %v1159_v24 }
 0x308   :  { %v997_v56 = vpack.c.bf16 %v973_v53, %v969_v31  ;;  %2755 = vmatprep.mubr.bf16.mxu0 %v10677_v28  ;;  %2901 = vmatprep.mubr.bf16.mxu1 %v10677_v28 }
 0x309   :  { %v1066_v61 = vadd.bf16 %v10612_v25, %v996_v52  ;;  %2756 = vmatmul.mubr.bf16.gmra.mrb[12].mxu0 %v10679_v49  ;;  %2902 = vmatmul.mubr.bf16.gmra.mrb[52].mxu1 %v10679_v49  ;;  %v1167_v52 = vld [vmem:[%s12937_s7 + $0x1f8] sm:$0xff] }
 0x30a   :  { %v1067_v62 = vadd.bf16 %v10615_v27, %v997_v56  ;;  %2937 = vmatpush1.bf16.msra.mxu0 %v7688_v36  ;;  %3083 = vmatpush1.bf16.msra.mxu1 %v7690_v43  ;;  %v7721_v36 = vcombine.high %v1154_v19, %v1158_v21  ;;  %v7722_v56 = vcombine.low %v1155_v23, %v1159_v24  ;;  %v1195_v23 = vld [vmem:[%s12937_s7 + $0x2d8] sm:$0xff] }
 0x30b   :  { %v1082_v20 = vmul.bf16 1045249613, %v1066_v61  ;;  %2938 = vmatprep.subr.bf16.mxu0 %v7697_v46  ;;  %3084 = vmatprep.subr.bf16.mxu1 %v7699_v54  ;;  %v1166_v46 = vld [vmem:[%s12937_s7 + $0x1f0] sm:$0xff]  ;;  %v7720_v54 = vcombine.low %v1154_v19, %v1158_v21  ;;  %v1199_v24 = vld [vmem:[%s12937_s7 + $0x2f8] sm:$0xff] }
 0x30c   :  { %v1083_v48 = vmul.bf16 1045249613, %v1067_v62  ;;  %v977_v2 = vpop.f32.mrb[44].mxu1  ;;  %v1198_v21 = vld [vmem:[%s12937_s7 + $0x2f0] sm:$0xff] }
 0x30d   :  { %v979_v6 = vpop.f32.mrb[45].mxu1  ;;  %v10713_v15 = vmax.bf16 %v1082_v20, %v1066_v61  ;;  %v1174_v61 = vld [vmem:[%s12937_s7 + $0x230] sm:$0xff] }
 0x30e   :  { %v10711_v8 = vmax.bf16 %v1083_v48, %v1067_v62  ;;  %v981_v9 = vpop.f32.mrb[46].mxu1  ;;  %2939 = vmatpush1.bf16.msra.mxu0 %v7696_v63  ;;  %3085 = vmatpush1.bf16.msra.mxu1 %v7698_v1  ;;  %v1171_v62 = vld [vmem:[%s12937_s7 + $0x218] sm:$0xff] }
 0x30f   :  { %v1000_v16 = vpack.c.bf16 %v981_v9, %v977_v2  ;;  %v983_v17 = vpop.f32.mrb[47].mxu1  ;;  %2940 = vmatprep.subr.bf16.mxu0 %v7705_v39  ;;  %3086 = vmatprep.subr.bf16.mxu1 %v7707_v40  ;;  %v1175_v63 = vld [vmem:[%s12937_s7 + $0x238] sm:$0xff]  ;;  %v7737_v39 = vcombine.high %v1170_v60, %v1174_v61  ;;  %v7736_v2 = vcombine.low %v1170_v60, %v1174_v61  ;;  %v1190_v9 = vld [vmem:[%s12937_s7 + $0x2b0] sm:$0xff] }
 0x310   :  { %v1001_v14 = vpack.c.bf16 %v983_v17, %v979_v6  ;;  %2765 = vmatprep.mubr.bf16.mxu0 %v10711_v8  ;;  %2911 = vmatprep.mubr.bf16.mxu1 %v10711_v8  ;;  %v7739_v40 = vcombine.high %v1171_v62, %v1175_v63  ;;  %v1179_v48 = vld [vmem:[%s12937_s7 + $0x258] sm:$0xff]  ;;  %v7738_v59 = vcombine.low %v1171_v62, %v1175_v63 }
 0x311   :  { %v1070_v26 = vadd.bf16 %v10612_v25, %v1000_v16  ;;  %2766 = vmatmul.mubr.bf16.gmra.mrb[16].mxu0 %v10713_v15  ;;  %2912 = vmatmul.mubr.bf16.gmra.mrb[56].mxu1 %v10713_v15  ;;  %v1162_v25 = vld [vmem:[%s12937_s7 + $0x1d0] sm:$0xff]  ;;  %v7744_v16 = vcombine.low %v1178_v0, %v1182_v44 }
 0x312   :  { %v1071_v10 = vadd.bf16 %v10615_v27, %v1001_v14  ;;  %2941 = vmatpush1.bf16.msra.mxu0 %v7704_v7  ;;  %3087 = vmatpush1.bf16.msra.mxu1 %v7706_v11  ;;  %v1163_v27 = vld [vmem:[%s12937_s7 + $0x1d8] sm:$0xff]  ;;  %v7729_v57 = vcombine.high %v1162_v25, %v1166_v46  ;;  %v7728_v1 = vcombine.low %v1162_v25, %v1166_v46  ;;  %v1186_v7 = vld [vmem:[%s12937_s7 + $0x290] sm:$0xff] }
 0x313   :  { %v1086_v31 = vmul.bf16 1045249613, %v1070_v26  ;;  %2942 = vmatprep.subr.bf16.mxu0 %v7713_v12  ;;  %3088 = vmatprep.subr.bf16.mxu1 %v7715_v18  ;;  %v7731_v58 = vcombine.high %v1163_v27, %v1167_v52  ;;  %v7730_v20 = vcombine.low %v1163_v27, %v1167_v52  ;;  %v1187_v11 = vld [vmem:[%s12937_s7 + $0x298] sm:$0xff]  ;;  %v7753_v18 = vcombine.high %v1186_v7, %v1190_v9  ;;  %v1194_v14 = vld [vmem:[%s12937_s7 + $0x2d0] sm:$0xff] }
 0x314   :  { %v1087_v43 = vmul.bf16 1045249613, %v1071_v10  ;;  %v1191_v12 = vld [vmem:[%s12937_s7 + $0x2b8] sm:$0xff]  ;;  %v7760_v25 = vcombine.low %v1194_v14, %v1198_v21  ;;  %v7762_v46 = vcombine.low %v1195_v23, %v1199_v24 }
 0x315   :  { %v10747_v55 = vmax.bf16 %v1086_v31, %v1070_v26  ;;  %v7755_v19 = vcombine.high %v1187_v11, %v1191_v12  ;;  %v7752_v26 = vcombine.low %v1186_v7, %v1190_v9  ;;  %v1202_v31 = vld [vmem:[%s12937_s7 + $0x310] sm:$0xff] }
 0x316   :  { %v10745_v53 = vmax.bf16 %v1087_v43, %v1071_v10  ;;  %2943 = vmatpush1.bf16.msra.mxu0 %v7712_v13  ;;  %3089 = vmatpush1.bf16.msra.mxu1 %v7714_v29  ;;  %v7754_v10 = vcombine.low %v1187_v11, %v1191_v12  ;;  %v7761_v13 = vcombine.high %v1194_v14, %v1198_v21  ;;  %v1207_v43 = vld [vmem:[%s12937_s7 + $0x338] sm:$0xff] }
 0x317   :  { %2944 = vmatprep.subr.bf16.mxu0 %v7721_v36  ;;  %3090 = vmatprep.subr.bf16.mxu1 %v7723_v38  ;;  %v7763_v29 = vcombine.high %v1195_v23, %v1199_v24  ;;  %v1206_v36 = vld [vmem:[%s12937_s7 + $0x330] sm:$0xff]  ;;  %v1203_v38 = vld [vmem:[%s12937_s7 + $0x318] sm:$0xff] }
 0x318   :  { %2775 = vmatprep.mubr.bf16.mxu0 %v10745_v53  ;;  %2921 = vmatprep.mubr.bf16.mxu1 %v10745_v53  ;;  %v7769_v27 = vcombine.high %v1202_v31, %v1206_v36  ;;  %v7771_v52 = vcombine.high %v1203_v38, %v1207_v43  ;;  %v7768_v60 = vcombine.low %v1202_v31, %v1206_v36 }
 0x319   :  { %2776 = vmatmul.mubr.bf16.gmra.mrb[20].mxu0 %v10747_v55  ;;  %2922 = vmatmul.mubr.bf16.gmra.mrb[60].mxu1 %v10747_v55  ;;  %v7770_v61 = vcombine.low %v1203_v38, %v1207_v43 }
 0x31a   :  { %2945 = vmatpush1.bf16.msra.mxu0 %v7720_v54  ;;  %2964 = vmatprep.mubr.bf16.mxu0 %v10389_v32  ;;  %v1210_v54 = vld [vmem:[%s12937_s7 + $0x350] sm:$0xff] }
 0x31b   :  { %3091 = vmatpush1.bf16.msra.mxu1 %v7722_v56  ;;  %3110 = vmatprep.mubr.bf16.mxu1 %v10389_v32  ;;  %v1183_v32 = vld [vmem:[%s12937_s7 + $0x278] sm:$0xff]  ;;  %v1214_v56 = vld [vmem:[%s12937_s7 + $0x370] sm:$0xff] }
 0x31c   :  { %2946 = vmatprep.subr.bf16.mxu0 %v7729_v57  ;;  %3092 = vmatprep.subr.bf16.mxu1 %v7731_v58  ;;  %v7747_v6 = vcombine.high %v1179_v48, %v1183_v32  ;;  %v7746_v17 = vcombine.low %v1179_v48, %v1183_v32  ;;  %v1211_v57 = vld [vmem:[%s12937_s7 + $0x358] sm:$0xff]  ;;  %v7777_v62 = vcombine.high %v1210_v54, %v1214_v56 }
 0x31d   :  { %v1215_v58 = vld [vmem:[%s12937_s7 + $0x378] sm:$0xff]  ;;  %v7776_v0 = vcombine.low %v1210_v54, %v1214_v56 }
 0x31e   :  { %2947 = vmatpush1.bf16.msra.mxu0 %v7728_v1  ;;  %v7779_v63 = vcombine.high %v1211_v57, %v1215_v58  ;;  %v1218_v1 = vld [vmem:[%s12937_s7 + $0x390] sm:$0xff]  ;;  %v7778_v44 = vcombine.low %v1211_v57, %v1215_v58 }
 0x31f   :  { %3093 = vmatpush1.bf16.msra.mxu1 %v7730_v20  ;;  %2948 = vmatprep.subr.bf16.mxu0 %v7737_v39  ;;  %v1222_v20 = vld [vmem:[%s12937_s7 + $0x3b0] sm:$0xff]  ;;  %v1219_v39 = vld [vmem:[%s12937_s7 + $0x398] sm:$0xff] }
 0x320   :  { %3094 = vmatprep.subr.bf16.mxu1 %v7739_v40  ;;  %v1223_v40 = vld [vmem:[%s12937_s7 + $0x3b8] sm:$0xff]  ;;  %v7785_v48 = vcombine.high %v1218_v1, %v1222_v20  ;;  %v7784_v7 = vcombine.low %v1218_v1, %v1222_v20  ;;  %v1258_v58 = vld [vmem:[%s12937_s7 + $0x4d0] sm:$0xff] }
 0x321   :  { %v7787_v32 = vcombine.high %v1219_v39, %v1223_v40  ;;  %v7786_v9 = vcombine.low %v1219_v39, %v1223_v40  ;;  %v1266_v39 = vld [vmem:[%s12937_s7 + $0x510] sm:$0xff] }
 0x322   :  { %2949 = vmatpush1.bf16.msra.mxu0 %v7736_v2  ;;  %v1226_v2 = vld [vmem:[%s12937_s7 + $0x3d0] sm:$0xff] }
 0x323   :  { %3095 = vmatpush1.bf16.msra.mxu1 %v7738_v59  ;;  %2950 = vmatprep.subr.bf16.mxu0 %v7745_v4  ;;  %v1230_v59 = vld [vmem:[%s12937_s7 + $0x3f0] sm:$0xff]  ;;  %v1227_v4 = vld [vmem:[%s12937_s7 + $0x3d8] sm:$0xff] }
 0x324   :  { %3096 = vmatprep.subr.bf16.mxu1 %v7747_v6  ;;  %v1231_v6 = vld [vmem:[%s12937_s7 + $0x3f8] sm:$0xff]  ;;  %v7793_v11 = vcombine.high %v1226_v2, %v1230_v59  ;;  %v7792_v14 = vcombine.low %v1226_v2, %v1230_v59  ;;  %v1270_v40 = vld [vmem:[%s12937_s7 + $0x530] sm:$0xff] }
 0x325   :  { %v7795_v12 = vcombine.high %v1227_v4, %v1231_v6  ;;  %v7794_v21 = vcombine.low %v1227_v4, %v1231_v6  ;;  %v7833_v2 = vcombine.high %v1266_v39, %v1270_v40  ;;  %v1274_v59 = vld [vmem:[%s12937_s7 + $0x550] sm:$0xff]  ;;  %v1275_v6 = vld [vmem:[%s12937_s7 + $0x558] sm:$0xff] }
 0x326   :  { %2951 = vmatpush1.bf16.msra.mxu0 %v7744_v16  ;;  %v1234_v16 = vld [vmem:[%s12937_s7 + $0x410] sm:$0xff] }
 0x327   :  { %3097 = vmatpush1.bf16.msra.mxu1 %v7746_v17  ;;  %2952 = vmatprep.subr.bf16.mxu0 %v7753_v18  ;;  %v1238_v17 = vld [vmem:[%s12937_s7 + $0x430] sm:$0xff]  ;;  %v1235_v18 = vld [vmem:[%s12937_s7 + $0x418] sm:$0xff] }
 0x328   :  { %3098 = vmatprep.subr.bf16.mxu1 %v7755_v19  ;;  %v1239_v19 = vld [vmem:[%s12937_s7 + $0x438] sm:$0xff]  ;;  %v7801_v23 = vcombine.high %v1234_v16, %v1238_v17  ;;  %v7800_v31 = vcombine.low %v1234_v16, %v1238_v17  ;;  %v1278_v4 = vld [vmem:[%s12937_s7 + $0x570] sm:$0xff] }
 0x329   :  { %v7803_v24 = vcombine.high %v1235_v18, %v1239_v19  ;;  %v7802_v36 = vcombine.low %v1235_v18, %v1239_v19  ;;  %v1282_v16 = vld [vmem:[%s12937_s7 + $0x590] sm:$0xff]  ;;  %v1283_v18 = vld [vmem:[%s12937_s7 + $0x598] sm:$0xff] }
 0x32a   :  { %2953 = vmatpush1.bf16.msra.mxu0 %v7752_v26  ;;  %v1242_v26 = vld [vmem:[%s12937_s7 + $0x450] sm:$0xff]  ;;  %v1287_v19 = vld [vmem:[%s12937_s7 + $0x5b8] sm:$0xff] }
 0x32b   :  { %3099 = vmatpush1.bf16.msra.mxu1 %v7754_v10  ;;  %2954 = vmatprep.subr.bf16.mxu0 %v7761_v13  ;;  %v1246_v10 = vld [vmem:[%s12937_s7 + $0x470] sm:$0xff]  ;;  %v1243_v13 = vld [vmem:[%s12937_s7 + $0x458] sm:$0xff] }
 0x32c   :  { %3100 = vmatprep.subr.bf16.mxu1 %v7763_v29  ;;  %v1247_v29 = vld [vmem:[%s12937_s7 + $0x478] sm:$0xff]  ;;  %v7809_v38 = vcombine.high %v1242_v26, %v1246_v10  ;;  %v7808_v54 = vcombine.low %v1242_v26, %v1246_v10  ;;  %v1286_v17 = vld [vmem:[%s12937_s7 + $0x5b0] sm:$0xff] }
 0x32d   :  { %v7811_v43 = vcombine.high %v1243_v13, %v1247_v29  ;;  %v7810_v56 = vcombine.low %v1243_v13, %v1247_v29  ;;  %v1294_v26 = vld [vmem:[%s12937_s7 + $0x5f0] sm:$0xff]  ;;  %v1291_v10 = vld [vmem:[%s12937_s7 + $0x5d8] sm:$0xff]  ;;  %v7848_v13 = vcombine.low %v1282_v16, %v1286_v17  ;;  %v7850_v29 = vcombine.low %v1283_v18, %v1287_v19 }
 0x32e   :  { %2955 = vmatpush1.bf16.msra.mxu0 %v7760_v25  ;;  %v1250_v25 = vld [vmem:[%s12937_s7 + $0x490] sm:$0xff] }
 0x32f   :  { %3101 = vmatpush1.bf16.msra.mxu1 %v7762_v46  ;;  %2956 = vmatprep.subr.bf16.mxu0 %v7769_v27  ;;  %v1254_v46 = vld [vmem:[%s12937_s7 + $0x4b0] sm:$0xff]  ;;  %v1251_v27 = vld [vmem:[%s12937_s7 + $0x498] sm:$0xff] }
 0x330   :  { %3102 = vmatprep.subr.bf16.mxu1 %v7771_v52  ;;  %v1255_v52 = vld [vmem:[%s12937_s7 + $0x4b8] sm:$0xff]  ;;  %v7817_v57 = vcombine.high %v1250_v25, %v1254_v46 }
 0x332   :  { %2957 = vmatpush1.bf16.msra.mxu0 %v7768_v60  ;;  %v1262_v60 = vld [vmem:[%s12937_s7 + $0x4f0] sm:$0xff] }
 0x333   :  { %3103 = vmatpush1.bf16.msra.mxu1 %v7770_v61  ;;  %2958 = vmatprep.subr.bf16.mxu0 %v7777_v62  ;;  %v1259_v61 = vld [vmem:[%s12937_s7 + $0x4d8] sm:$0xff]  ;;  %v7816_v62 = vcombine.low %v1250_v25, %v1254_v46  ;;  %v7825_v1 = vcombine.high %v1258_v58, %v1262_v60 }
 0x334   :  { %3104 = vmatprep.subr.bf16.mxu1 %v7779_v63  ;;  %v7818_v63 = vcombine.low %v1251_v27, %v1255_v52  ;;  %v1299_v25 = vld [vmem:[%s12937_s7 + $0x618] sm:$0xff] }
 0x335   :  { %v1303_v46 = vld [vmem:[%s12937_s7 + $0x638] sm:$0xff] }
 0x336   :  { %2959 = vmatpush1.bf16.msra.mxu0 %v7776_v0  ;;  %v1267_v0 = vld [vmem:[%s12937_s7 + $0x518] sm:$0xff] }
 0x337   :  { %3105 = vmatpush1.bf16.msra.mxu1 %v7778_v44  ;;  %2960 = vmatprep.subr.bf16.mxu0 %v7785_v48  ;;  %v1271_v44 = vld [vmem:[%s12937_s7 + $0x538] sm:$0xff]  ;;  %v7824_v48 = vcombine.low %v1258_v58, %v1262_v60  ;;  %v7866_v60 = vcombine.low %v1299_v25, %v1303_v46 }
 0x338   :  { %3106 = vmatprep.subr.bf16.mxu1 %v7787_v32 }
 0x33a   :  { %2961 = vmatpush1.bf16.msra.mxu0 %v7784_v7  ;;  %v7832_v7 = vcombine.low %v1266_v39, %v1270_v40 }
 0x33b   :  { %3107 = vmatpush1.bf16.msra.mxu1 %v7786_v9  ;;  %2962 = vmatprep.subr.bf16.mxu0 %v7793_v11  ;;  %v7834_v9 = vcombine.low %v1267_v0, %v1271_v44  ;;  %v7841_v11 = vcombine.high %v1274_v59, %v1278_v4 }
 0x33c   :  { %3108 = vmatprep.subr.bf16.mxu1 %v7795_v12 }
 0x33e   :  { %2963 = vmatpush1.bf16.msra.mxu0 %v7792_v14  ;;  %v7840_v14 = vcombine.low %v1274_v59, %v1278_v4 }
 0x33f   :  { %3109 = vmatpush1.bf16.msra.mxu1 %v7794_v21  ;;  %3005 = vmatprep.subr.bf16.mxu0 %v7801_v23  ;;  %v7849_v23 = vcombine.high %v1282_v16, %v1286_v17 }
 0x340   :  { %3151 = vmatprep.subr.bf16.mxu1 %v7803_v24  ;;  %v1290_v24 = vld [vmem:[%s12937_s7 + $0x5d0] sm:$0xff] }
 0x341   :  { %2965 = vmatmul.mubr.bf16.vlgmr.msra.gmra.mrb[24].mxu0 %v10391_v42 }
 0x342   :  { %3111 = vmatmul.mubr.bf16.vlgmr.msra.gmra.mrb[64].mxu1 %v10391_v42  ;;  %2974 = vmatprep.mubr.bf16.mxu0 %v10429_v3  ;;  %v7819_v42 = vcombine.high %v1251_v27, %v1255_v52  ;;  %v7856_v27 = vcombine.low %v1290_v24, %v1294_v26 }
 0x343   :  { %3006 = vmatpush1.bf16.msra.mxu0 %v7800_v31  ;;  %3120 = vmatprep.mubr.bf16.mxu1 %v10429_v3  ;;  %v1263_v3 = vld [vmem:[%s12937_s7 + $0x4f8] sm:$0xff]  ;;  %v7857_v31 = vcombine.high %v1290_v24, %v1294_v26 }
 0x344   :  { %3152 = vmatpush1.bf16.msra.mxu1 %v7802_v36  ;;  %3007 = vmatprep.subr.bf16.mxu0 %v7809_v38  ;;  %v7827_v20 = vcombine.high %v1259_v61, %v1263_v3  ;;  %v7826_v32 = vcombine.low %v1259_v61, %v1263_v3  ;;  %v1298_v38 = vld [vmem:[%s12937_s7 + $0x610] sm:$0xff] }
 0x345   :  { %3153 = vmatprep.subr.bf16.mxu1 %v7811_v43  ;;  %v1302_v43 = vld [vmem:[%s12937_s7 + $0x630] sm:$0xff] }
 0x346   :  { %v7864_v58 = vcombine.low %v1298_v38, %v1302_v43 }
 0x347   :  { %3008 = vmatpush1.bf16.msra.mxu0 %v7808_v54  ;;  %v7865_v54 = vcombine.high %v1298_v38, %v1302_v43 }
 0x348   :  { %3154 = vmatpush1.bf16.msra.mxu1 %v7810_v56  ;;  %3009 = vmatprep.subr.bf16.mxu0 %v7817_v57  ;;  %v1306_v56 = vld [vmem:[%s12937_s7 + $0x650] sm:$0xff] }
 0x349   :  { %2975 = vmatmul.mubr.bf16.gmra.mrb[28].mxu0 %v10431_v5  ;;  %3155 = vmatprep.subr.bf16.mxu1 %v7819_v42  ;;  %v1310_v57 = vld [vmem:[%s12937_s7 + $0x670] sm:$0xff]  ;;  %v1307_v42 = vld [vmem:[%s12937_s7 + $0x658] sm:$0xff] }
 0x34a   :  { %3121 = vmatmul.mubr.bf16.gmra.mrb[68].mxu1 %v10431_v5  ;;  %2984 = vmatprep.mubr.bf16.mxu0 %v10465_v34  ;;  %v7835_v5 = vcombine.high %v1267_v0, %v1271_v44  ;;  %v7873_v61 = vcombine.high %v1306_v56, %v1310_v57  ;;  %v7872_v39 = vcombine.low %v1306_v56, %v1310_v57 }
 0x34b   :  { %3010 = vmatpush1.bf16.msra.mxu0 %v7816_v62  ;;  %3130 = vmatprep.mubr.bf16.mxu1 %v10465_v34  ;;  %v1279_v34 = vld [vmem:[%s12937_s7 + $0x578] sm:$0xff]  ;;  %v1314_v62 = vld [vmem:[%s12937_s7 + $0x690] sm:$0xff] }
 0x34c   :  { %3156 = vmatpush1.bf16.msra.mxu1 %v7818_v63  ;;  %3011 = vmatprep.subr.bf16.mxu0 %v7825_v1  ;;  %v7843_v12 = vcombine.high %v1275_v6, %v1279_v34  ;;  %v7842_v21 = vcombine.low %v1275_v6, %v1279_v34  ;;  %v1318_v63 = vld [vmem:[%s12937_s7 + $0x6b0] sm:$0xff]  ;;  %v1315_v1 = vld [vmem:[%s12937_s7 + $0x698] sm:$0xff] }
 0x34d   :  { %3157 = vmatprep.subr.bf16.mxu1 %v7827_v20  ;;  %v1319_v20 = vld [vmem:[%s12937_s7 + $0x6b8] sm:$0xff]  ;;  %v7881_v0 = vcombine.high %v1314_v62, %v1318_v63  ;;  %v7880_v59 = vcombine.low %v1314_v62, %v1318_v63  ;;  %v8963_v63 = vld [vmem:[%s12939_s9 + $0x8] ss:$28 sps:$4 sm:$0xff]  }
 0x34e   :  { %v7883_v44 = vcombine.high %v1315_v1, %v1319_v20  ;;  %v7882_v4 = vcombine.low %v1315_v1, %v1319_v20  ;;  %v8960_v62 = vld [vmem:[%s12939_s9] ss:$28 sps:$4 sm:$0xff]  }
 0x34f   :  { %3012 = vmatpush1.bf16.msra.mxu0 %v7824_v48  ;;  %v1322_v48 = vld [vmem:[%s12937_s7 + $0x6d0] sm:$0xff]  ;;  %v8968_v1 = vld [vmem:[%s12939_s9 + $0x3c] ss:$28 sps:$4 sm:$0xff]   ;;  %v8971_v20 = vld [vmem:[%s12939_s9 + $0x44] ss:$28 sps:$4 sm:$0xff]  }
 0x350   :  { %3158 = vmatpush1.bf16.msra.mxu1 %v7826_v32  ;;  %3013 = vmatprep.subr.bf16.mxu0 %v7833_v2  ;;  %v1326_v32 = vld [vmem:[%s12937_s7 + $0x6f0] sm:$0xff]  ;;  %v1323_v2 = vld [vmem:[%s12937_s7 + $0x6d8] sm:$0xff] }
 0x351   :  { %2985 = vmatmul.mubr.bf16.gmra.mrb[32].mxu0 %v10463_v30  ;;  %3159 = vmatprep.subr.bf16.mxu1 %v7835_v5  ;;  %v1327_v5 = vld [vmem:[%s12937_s7 + $0x6f8] sm:$0xff]  ;;  %v7889_v6 = vcombine.high %v1322_v48, %v1326_v32  ;;  %v7888_v16 = vcombine.low %v1322_v48, %v1326_v32  ;;  %v8980_v48 = vld [vmem:[%s12939_s9 + $0xac] ss:$28 sps:$4 sm:$0xff]   ;;  %v8983_v32 = vld [vmem:[%s12939_s9 + $0xb4] ss:$28 sps:$4 sm:$0xff]  }
 0x352   :  { %3131 = vmatmul.mubr.bf16.gmra.mrb[72].mxu1 %v10463_v30  ;;  %2994 = vmatprep.mubr.bf16.mxu0 %v10499_v41  ;;  %v7851_v30 = vcombine.high %v1283_v18, %v1287_v19  ;;  %v7891_v34 = vcombine.high %v1323_v2, %v1327_v5  ;;  %v7890_v17 = vcombine.low %v1323_v2, %v1327_v5  ;;  %v8978_v2 = vld [vmem:[%s12939_s9 + $0xa8] ss:$28 sps:$4 sm:$0xff]   ;;  %v8981_v5 = vld [vmem:[%s12939_s9 + $0xb0] ss:$28 sps:$4 sm:$0xff]  }
 0x353   :  { %3014 = vmatpush1.bf16.msra.mxu0 %v7832_v7  ;;  %3140 = vmatprep.mubr.bf16.mxu1 %v10499_v41  ;;  %v1295_v41 = vld [vmem:[%s12937_s7 + $0x5f8] sm:$0xff]  ;;  %v1330_v7 = vld [vmem:[%s12937_s7 + $0x710] sm:$0xff] }
 0x354   :  { %3160 = vmatpush1.bf16.msra.mxu1 %v7834_v9  ;;  %3015 = vmatprep.subr.bf16.mxu0 %v7841_v11  ;;  %v7859_v36 = vcombine.high %v1291_v10, %v1295_v41  ;;  %v7858_v52 = vcombine.low %v1291_v10, %v1295_v41  ;;  %v1334_v9 = vld [vmem:[%s12937_s7 + $0x730] sm:$0xff]  ;;  %v1331_v11 = vld [vmem:[%s12937_s7 + $0x718] sm:$0xff] }
 0x355   :  { %3161 = vmatprep.subr.bf16.mxu1 %v7843_v12  ;;  %v1335_v12 = vld [vmem:[%s12937_s7 + $0x738] sm:$0xff]  ;;  %v7897_v18 = vcombine.high %v1330_v7, %v1334_v9  ;;  %v7896_v24 = vcombine.low %v1330_v7, %v1334_v9 }
 0x356   :  { %v7899_v19 = vcombine.high %v1331_v11, %v1335_v12  ;;  %v7898_v26 = vcombine.low %v1331_v11, %v1335_v12  ;;  %v8990_v7 = vld [vmem:[%s12939_s9 + $0x118] ss:$28 sps:$4 sm:$0xff]   ;;  %v8993_v9 = vld [vmem:[%s12939_s9 + $0x120] ss:$28 sps:$4 sm:$0xff]  }
 0x357   :  { %3016 = vmatpush1.bf16.msra.mxu0 %v7840_v14  ;;  %v1338_v14 = vld [vmem:[%s12937_s7 + $0x750] sm:$0xff] }
 0x358   :  { %3162 = vmatpush1.bf16.msra.mxu1 %v7842_v21  ;;  %3017 = vmatprep.subr.bf16.mxu0 %v7849_v23  ;;  %v1342_v21 = vld [vmem:[%s12937_s7 + $0x770] sm:$0xff]  ;;  %v1339_v23 = vld [vmem:[%s12937_s7 + $0x758] sm:$0xff] }
 0x359   :  { %2995 = vmatmul.mubr.bf16.gmra.mrb[36].mxu0 %v10497_v47  ;;  %3163 = vmatprep.subr.bf16.mxu1 %v7851_v30  ;;  %v1343_v30 = vld [vmem:[%s12937_s7 + $0x778] sm:$0xff]  ;;  %v7905_v10 = vcombine.high %v1338_v14, %v1342_v21  ;;  %v7904_v38 = vcombine.low %v1338_v14, %v1342_v21  ;;  %v8998_v11 = vld [vmem:[%s12939_s9 + $0x154] ss:$28 sps:$4 sm:$0xff]   ;;  %v9010_v14 = vld [vmem:[%s12939_s9 + $0x1c4] ss:$28 sps:$4 sm:$0xff]  }
 0x35a   :  { %3141 = vmatmul.mubr.bf16.gmra.mrb[76].mxu1 %v10497_v47  ;;  %3037 = vmatprep.mubr.bf16.mxu0 %v10643_v22  ;;  %v7867_v47 = vcombine.high %v1299_v25, %v1303_v46  ;;  %v7907_v41 = vcombine.high %v1339_v23, %v1343_v30  ;;  %v7906_v43 = vcombine.low %v1339_v23, %v1343_v30  ;;  %v8999_v12 = vld [vmem:[%s12939_s9 + $0x158] ss:$28 sps:$4 sm:$0xff]   ;;  %v9008_v21 = vld [vmem:[%s12939_s9 + $0x1c0] ss:$28 sps:$4 sm:$0xff]   ;;  %v9011_v23 = vld [vmem:[%s12939_s9 + $0x1c8] ss:$28 sps:$4 sm:$0xff]  }
 0x35b   :  { %3018 = vmatpush1.bf16.msra.mxu0 %v7848_v13  ;;  %3183 = vmatprep.mubr.bf16.mxu1 %v10643_v22  ;;  %v1311_v22 = vld [vmem:[%s12937_s7 + $0x678] sm:$0xff]  ;;  %v1346_v13 = vld [vmem:[%s12937_s7 + $0x790] sm:$0xff] }
 0x35c   :  { %3164 = vmatpush1.bf16.msra.mxu1 %v7850_v29  ;;  %3019 = vmatprep.subr.bf16.mxu0 %v7857_v31  ;;  %v7875_v3 = vcombine.high %v1307_v42, %v1311_v22  ;;  %v7874_v40 = vcombine.low %v1307_v42, %v1311_v22  ;;  %v1350_v29 = vld [vmem:[%s12937_s7 + $0x7b0] sm:$0xff]  ;;  %v1347_v31 = vld [vmem:[%s12937_s7 + $0x798] sm:$0xff] }
 0x35d   :  { %3165 = vmatprep.subr.bf16.mxu1 %v7859_v36  ;;  %v1351_v36 = vld [vmem:[%s12937_s7 + $0x7b8] sm:$0xff]  ;;  %v7913_v25 = vcombine.high %v1346_v13, %v1350_v29  ;;  %v7912_v56 = vcombine.low %v1346_v13, %v1350_v29  ;;  %v9020_v29 = vld [vmem:[%s12939_s9 + $0x230] ss:$28 sps:$4 sm:$0xff]  }
 0x35e   :  { %v7915_v46 = vcombine.high %v1347_v31, %v1351_v36  ;;  %v7914_v57 = vcombine.low %v1347_v31, %v1351_v36  ;;  %v9016_v30 = vld [vmem:[%s12939_s9 + $0x1fc] ss:$28 sps:$4 sm:$0xff]   ;;  %v9028_v36 = vld [vmem:[%s12939_s9 + $0x26c] ss:$28 sps:$4 sm:$0xff]  }
 0x35f   :  { %3020 = vmatpush1.bf16.msra.mxu0 %v7856_v27  ;;  %v1354_v27 = vld [vmem:[%s12937_s7 + $0x7d0] sm:$0xff]  ;;  %v9025_v13 = vld [vmem:[%s12939_s9 + $0x23c] ss:$28 sps:$4 sm:$0xff]  }
 0x360   :  { %3166 = vmatpush1.bf16.msra.mxu1 %v7858_v52  ;;  %3021 = vmatprep.subr.bf16.mxu0 %v7865_v54  ;;  %v1358_v52 = vld [vmem:[%s12937_s7 + $0x7f0] sm:$0xff]  ;;  %v1355_v54 = vld [vmem:[%s12937_s7 + $0x7d8] sm:$0xff] }
 0x361   :  { %3167 = vmatprep.subr.bf16.mxu1 %v7867_v47  ;;  %v1359_v47 = vld [vmem:[%s12937_s7 + $0x7f8] sm:$0xff]  ;;  %v7921_v42 = vcombine.high %v1354_v27, %v1358_v52 }
 0x362   :  { %v7923_v22 = vcombine.high %v1355_v54, %v1359_v47  ;;  %v9023_v31 = vld [vmem:[%s12939_s9 + $0x238] ss:$28 sps:$4 sm:$0xff]  }
 0x363   :  { %3022 = vmatpush1.bf16.msra.mxu0 %v7864_v58  ;;  %v7920_v58 = vcombine.low %v1354_v27, %v1358_v52  ;;  %v9037_v27 = vld [vmem:[%s12939_s9 + $0x2ac] ss:$28 sps:$4 sm:$0xff]   ;;  %v9032_v52 = vld [vmem:[%s12939_s9 + $0x2a0] ss:$28 sps:$4 sm:$0xff]  }
 0x364   :  { %3168 = vmatpush1.bf16.msra.mxu1 %v7866_v60  ;;  %3023 = vmatprep.subr.bf16.mxu0 %v7873_v61  ;;  %v7922_v60 = vcombine.low %v1355_v54, %v1359_v47  ;;  %v8962_v61 = vld [vmem:[%s12939_s9 + $0x4] ss:$28 sps:$4 sm:$0xff]   ;;  %v9040_v47 = vld [vmem:[%s12939_s9 + $0x2dc] ss:$28 sps:$4 sm:$0xff]  }
 0x365   :  { %3169 = vmatprep.subr.bf16.mxu1 %v7875_v3  ;;  %v8965_v3 = vld [vmem:[%s12939_s9 + $0xc] ss:$28 sps:$4 sm:$0xff]  }
 0x366   :  { %v9035_v54 = vld [vmem:[%s12939_s9 + $0x2a8] ss:$28 sps:$4 sm:$0xff]  }
 0x367   :  { %3024 = vmatpush1.bf16.msra.mxu0 %v7872_v39  ;;  %v8966_v39 = vld [vmem:[%s12939_s9 + $0x38] ss:$28 sps:$4 sm:$0xff]  }
 0x368   :  { %3170 = vmatpush1.bf16.msra.mxu1 %v7874_v40  ;;  %3025 = vmatprep.subr.bf16.mxu0 %v7881_v0  ;;  %v8969_v40 = vld [vmem:[%s12939_s9 + $0x40] ss:$28 sps:$4 sm:$0xff]   ;;  %v8974_v0 = vld [vmem:[%s12939_s9 + $0x74] ss:$28 sps:$4 sm:$0xff]  }
 0x369   :  { %3171 = vmatprep.subr.bf16.mxu1 %v7883_v44  ;;  %v8975_v44 = vld [vmem:[%s12939_s9 + $0x78] ss:$28 sps:$4 sm:$0xff]  }
 0x36b   :  { %3026 = vmatpush1.bf16.msra.mxu0 %v7880_v59  ;;  %v8986_v59 = vld [vmem:[%s12939_s9 + $0xe4] ss:$28 sps:$4 sm:$0xff]  }
 0x36c   :  { %3172 = vmatpush1.bf16.msra.mxu1 %v7882_v4  ;;  %3027 = vmatprep.subr.bf16.mxu0 %v7889_v6  ;;  %v8987_v4 = vld [vmem:[%s12939_s9 + $0xe8] ss:$28 sps:$4 sm:$0xff]   ;;  %v8992_v6 = vld [vmem:[%s12939_s9 + $0x11c] ss:$28 sps:$4 sm:$0xff]  }
 0x36d   :  { %3173 = vmatprep.subr.bf16.mxu1 %v7891_v34  ;;  %v8995_v34 = vld [vmem:[%s12939_s9 + $0x124] ss:$28 sps:$4 sm:$0xff]  }
 0x36f   :  { %3028 = vmatpush1.bf16.msra.mxu0 %v7888_v16  ;;  %v9004_v16 = vld [vmem:[%s12939_s9 + $0x18c] ss:$28 sps:$4 sm:$0xff]  }
 0x370   :  { %3174 = vmatpush1.bf16.msra.mxu1 %v7890_v17  ;;  %3029 = vmatprep.subr.bf16.mxu0 %v7897_v18  ;;  %v9007_v17 = vld [vmem:[%s12939_s9 + $0x194] ss:$28 sps:$4 sm:$0xff]   ;;  %v9002_v18 = vld [vmem:[%s12939_s9 + $0x188] ss:$28 sps:$4 sm:$0xff]  }
 0x371   :  { %3175 = vmatprep.subr.bf16.mxu1 %v7899_v19  ;;  %v9005_v19 = vld [vmem:[%s12939_s9 + $0x190] ss:$28 sps:$4 sm:$0xff]  }
 0x373   :  { %3030 = vmatpush1.bf16.msra.mxu0 %v7896_v24  ;;  %v9019_v24 = vld [vmem:[%s12939_s9 + $0x204] ss:$28 sps:$4 sm:$0xff]  }
 0x374   :  { %3176 = vmatpush1.bf16.msra.mxu1 %v7898_v26  ;;  %3031 = vmatprep.subr.bf16.mxu0 %v7905_v10  ;;  %v9014_v26 = vld [vmem:[%s12939_s9 + $0x1f8] ss:$28 sps:$4 sm:$0xff]   ;;  %v9017_v10 = vld [vmem:[%s12939_s9 + $0x200] ss:$28 sps:$4 sm:$0xff]  }
 0x375   :  { %3177 = vmatprep.subr.bf16.mxu1 %v7907_v41  ;;  %v9022_v41 = vld [vmem:[%s12939_s9 + $0x234] ss:$28 sps:$4 sm:$0xff]  }
 0x377   :  { %3032 = vmatpush1.bf16.msra.mxu0 %v7904_v38  ;;  %v9031_v38 = vld [vmem:[%s12939_s9 + $0x274] ss:$28 sps:$4 sm:$0xff]  }
 0x378   :  { %3178 = vmatpush1.bf16.msra.mxu1 %v7906_v43  ;;  %3033 = vmatprep.subr.bf16.mxu0 %v7913_v25  ;;  %v9026_v43 = vld [vmem:[%s12939_s9 + $0x268] ss:$28 sps:$4 sm:$0xff]   ;;  %v9029_v25 = vld [vmem:[%s12939_s9 + $0x270] ss:$28 sps:$4 sm:$0xff]  }
 0x379   :  { %3179 = vmatprep.subr.bf16.mxu1 %v7915_v46  ;;  %v9034_v46 = vld [vmem:[%s12939_s9 + $0x2a4] ss:$28 sps:$4 sm:$0xff]  }
 0x37b   :  { %3034 = vmatpush1.bf16.msra.mxu0 %v7912_v56  ;;  %v9043_v56 = vld [vmem:[%s12939_s9 + $0x2e4] ss:$28 sps:$4 sm:$0xff]  }
 0x37c   :  { %3180 = vmatpush1.bf16.msra.mxu1 %v7914_v57  ;;  %3035 = vmatprep.subr.bf16.mxu0 %v7921_v42  ;;  %v9038_v57 = vld [vmem:[%s12939_s9 + $0x2d8] ss:$28 sps:$4 sm:$0xff]   ;;  %v9041_v42 = vld [vmem:[%s12939_s9 + $0x2e0] ss:$28 sps:$4 sm:$0xff]  }
 0x37d   :  { %3181 = vmatprep.subr.bf16.mxu1 %v7923_v22  ;;  %v9046_v22 = vld [vmem:[%s12939_s9 + $0x314] ss:$28 sps:$4 sm:$0xff]  }
 0x37f   :  { %3036 = vmatpush1.bf16.msra.mxu0 %v7920_v58  ;;  %v9049_v58 = vld [vmem:[%s12939_s9 + $0x31c] ss:$28 sps:$4 sm:$0xff]  }
 0x380   :  { %3182 = vmatpush1.bf16.msra.mxu1 %v7922_v60  ;;  %6311 = vmatprep.subr.bf16.mxu0 %v8962_v61  ;;  %v9044_v60 = vld [vmem:[%s12939_s9 + $0x310] ss:$28 sps:$4 sm:$0xff]   ;;  %v9047_v61 = vld [vmem:[%s12939_s9 + $0x318] ss:$28 sps:$4 sm:$0xff]  }
 0x381   :  { %6603 = vmatprep.subr.bf16.mxu1 %v8965_v3  ;;  %v9052_v3 = vld [vmem:[%s12939_s9 + $0x34c] ss:$28 sps:$4 sm:$0xff]  }
 0x382   :  { %3038 = vmatmul.mubr.bf16.vlgmr.msra.gmra.mrb[24].mxu0 %v10645_v37 }
 0x383   :  { %3184 = vmatmul.mubr.bf16.vlgmr.msra.gmra.mrb[64].mxu1 %v10645_v37  ;;  %3047 = vmatprep.mubr.bf16.mxu0 %v10677_v28  ;;  %v8977_v37 = vld [vmem:[%s12939_s9 + $0x7c] ss:$28 sps:$4 sm:$0xff]  }
 0x384   :  { %3193 = vmatprep.mubr.bf16.mxu1 %v10677_v28  ;;  %6312 = vmatpush1.bf16.msra.mxu0 %v8960_v62  ;;  %v8972_v28 = vld [vmem:[%s12939_s9 + $0x70] ss:$28 sps:$4 sm:$0xff]  }
 0x385   :  { %6604 = vmatpush1.bf16.msra.mxu1 %v8963_v63  ;;  %6313 = vmatprep.subr.bf16.mxu0 %v8968_v1  ;;  %v9055_v62 = vld [vmem:[%s12939_s9 + $0x354] ss:$28 sps:$4 sm:$0xff]   ;;  %v9050_v63 = vld [vmem:[%s12939_s9 + $0x348] ss:$28 sps:$4 sm:$0xff]  }
 0x386   :  { %6605 = vmatprep.subr.bf16.mxu1 %v8971_v20  ;;  %v9053_v1 = vld [vmem:[%s12939_s9 + $0x350] ss:$28 sps:$4 sm:$0xff]   ;;  %v9058_v20 = vld [vmem:[%s12939_s9 + $0x384] ss:$28 sps:$4 sm:$0xff]  }
 0x388   :  { %6314 = vmatpush1.bf16.msra.mxu0 %v8966_v39  ;;  %v9061_v39 = vld [vmem:[%s12939_s9 + $0x38c] ss:$28 sps:$4 sm:$0xff]  }
 0x389   :  { %6606 = vmatpush1.bf16.msra.mxu1 %v8969_v40  ;;  %6315 = vmatprep.subr.bf16.mxu0 %v8974_v0  ;;  %v11274_v40 = vld [vmem:[%s12938_s8] sm:$0xff] }
 0x38a   :  { %3048 = vmatmul.mubr.bf16.gmra.mrb[28].mxu0 %v10679_v49  ;;  %6607 = vmatprep.subr.bf16.mxu1 %v8977_v37  ;;  %v3261_v0 = vrot.slane %v11274_v40, %v9894_v35  ;;  %v3265_v37 = vrot.slane %v11274_v40, %v10027_v50 }
 0x38b   :  { %3194 = vmatmul.mubr.bf16.gmra.mrb[68].mxu1 %v10679_v49  ;;  %3057 = vmatprep.mubr.bf16.mxu0 %v10711_v8  ;;  %v8989_v49 = vld [vmem:[%s12939_s9 + $0xec] ss:$28 sps:$4 sm:$0xff]  }
 0x38c   :  { %3203 = vmatprep.mubr.bf16.mxu1 %v10711_v8  ;;  %6316 = vmatpush1.bf16.msra.mxu0 %v8972_v28  ;;  %v8984_v8 = vld [vmem:[%s12939_s9 + $0xe0] ss:$28 sps:$4 sm:$0xff]   ;;  %v3298_v28 = vpack.c.bf16 %v3261_v0, %v3261_v0 }
 0x38d   :  { %6608 = vmatpush1.bf16.msra.mxu1 %v8975_v44  ;;  %6317 = vmatprep.subr.bf16.mxu0 %v8980_v48  ;;  %v3299_v44 = vpack.c.bf16 %v3265_v37, %v3265_v37  ;;  %v9068_v37 = vld [vmem:[%s12939_s9 + $0x3f0] ss:$28 sps:$4 sm:$0xff]  }
 0x38e   :  { %6609 = vmatprep.subr.bf16.mxu1 %v8983_v32  ;;  %v3307_v48 = vpack.i.b16 %v3298_v28, %v3298_v28  ;;  %v9071_v28 = vld [vmem:[%s12939_s9 + $0x3f8] ss:$28 sps:$4 sm:$0xff]  }
 0x38f   :  { %v3314_v32 = vpack.i.b16 %v3299_v44, %v3299_v44 }
 0x390   :  { %6318 = vmatpush1.bf16.msra.mxu0 %v8978_v2 }
 0x391   :  { %6610 = vmatpush1.bf16.msra.mxu1 %v8981_v5  ;;  %6319 = vmatprep.subr.bf16.mxu0 %v8986_v59 }
 0x392   :  { %3058 = vmatmul.mubr.bf16.gmra.mrb[32].mxu0 %v10713_v15  ;;  %6611 = vmatprep.subr.bf16.mxu1 %v8989_v49 }
 0x393   :  { %3204 = vmatmul.mubr.bf16.gmra.mrb[72].mxu1 %v10713_v15  ;;  %3067 = vmatprep.mubr.bf16.mxu0 %v10745_v53  ;;  %v9001_v15 = vld [vmem:[%s12939_s9 + $0x15c] ss:$28 sps:$4 sm:$0xff]  }
 0x394   :  { %3213 = vmatprep.mubr.bf16.mxu1 %v10745_v53  ;;  %6320 = vmatpush1.bf16.msra.mxu0 %v8984_v8  ;;  %v8996_v53 = vld [vmem:[%s12939_s9 + $0x150] ss:$28 sps:$4 sm:$0xff]   ;;  %v11285_v8 = vrot.slane %v3307_v48, %v9894_v35 }
 0x395   :  { %6612 = vmatpush1.bf16.msra.mxu1 %v8987_v4  ;;  %6321 = vmatprep.subr.bf16.mxu0 %v8992_v6 }
 0x396   :  { %6613 = vmatprep.subr.bf16.mxu1 %v8995_v34  ;;  %v11290_v34 = vrot.slane %v3314_v32, %v9894_v35 }
 0x398   :  { %6322 = vmatpush1.bf16.msra.mxu0 %v8990_v7 }
 0x399   :  { %6614 = vmatpush1.bf16.msra.mxu1 %v8993_v9  ;;  %6323 = vmatprep.subr.bf16.mxu0 %v8998_v11 }
 0x39a   :  { %3068 = vmatmul.mubr.bf16.gmra.mrb[36].mxu0 %v10747_v55  ;;  %6615 = vmatprep.subr.bf16.mxu1 %v9001_v15 }
 0x39b   :  { %3214 = vmatmul.mubr.bf16.gmra.mrb[76].mxu1 %v10747_v55  ;;  %v9013_v55 = vld [vmem:[%s12939_s9 + $0x1cc] ss:$28 sps:$4 sm:$0xff]  }
 0x39c   :  { %6324 = vmatpush1.bf16.msra.mxu0 %v8996_v53 }
 0x39d   :  { %6616 = vmatpush1.bf16.msra.mxu1 %v8999_v12  ;;  %6325 = vmatprep.subr.bf16.mxu0 %v9004_v16 }
 0x39e   :  { %6617 = vmatprep.subr.bf16.mxu1 %v9007_v17 }
 0x3a0   :  { %6326 = vmatpush1.bf16.msra.mxu0 %v9002_v18 }
 0x3a1   :  { %6618 = vmatpush1.bf16.msra.mxu1 %v9005_v19  ;;  %6327 = vmatprep.subr.bf16.mxu0 %v9010_v14 }
 0x3a2   :  { %6619 = vmatprep.subr.bf16.mxu1 %v9013_v55 }
 0x3a4   :  { %6328 = vmatpush1.bf16.msra.mxu0 %v9008_v21 }
 0x3a5   :  { %6620 = vmatpush1.bf16.msra.mxu1 %v9011_v23  ;;  %6329 = vmatprep.subr.bf16.mxu0 %v9016_v30 }
 0x3a6   :  { %6621 = vmatprep.subr.bf16.mxu1 %v9019_v24 }
 0x3a8   :  { %6330 = vmatpush1.bf16.msra.mxu0 %v9014_v26 }
 0x3a9   :  { %6622 = vmatpush1.bf16.msra.mxu1 %v9017_v10  ;;  %6331 = vmatprep.subr.bf16.mxu0 %v9022_v41  ;;  %v9056_v10 = vld [vmem:[%s12939_s9 + $0x380] ss:$28 sps:$4 sm:$0xff]   ;;  %v9059_v41 = vld [vmem:[%s12939_s9 + $0x388] ss:$28 sps:$4 sm:$0xff]  }
 0x3aa   :  { %6623 = vmatprep.subr.bf16.mxu1 %v9025_v13 }
 0x3ac   :  { %6332 = vmatpush1.bf16.msra.mxu0 %v9020_v29 }
 0x3ad   :  { %6624 = vmatpush1.bf16.msra.mxu1 %v9023_v31  ;;  %6333 = vmatprep.subr.bf16.mxu0 %v9028_v36 }
 0x3ae   :  { %6625 = vmatprep.subr.bf16.mxu1 %v9031_v38 }
 0x3b0   :  { %6334 = vmatpush1.bf16.msra.mxu0 %v9026_v43  ;;  %v9064_v43 = vld [vmem:[%s12939_s9 + $0x3bc] ss:$28 sps:$4 sm:$0xff]  }
 0x3b1   :  { %6626 = vmatpush1.bf16.msra.mxu1 %v9029_v25  ;;  %6335 = vmatprep.subr.bf16.mxu0 %v9034_v46  ;;  %v9067_v25 = vld [vmem:[%s12939_s9 + $0x3c4] ss:$28 sps:$4 sm:$0xff]  }
 0x3b2   :  { %6627 = vmatprep.subr.bf16.mxu1 %v9037_v27 }
 0x3b4   :  { %6336 = vmatpush1.bf16.msra.mxu0 %v9032_v52  ;;  %v3273_v52 = vrot.slane %v11274_v40, %v10557_v51 }
 0x3b5   :  { %6628 = vmatpush1.bf16.msra.mxu1 %v9035_v54  ;;  %6337 = vmatprep.subr.bf16.mxu0 %v9040_v47 }
 0x3b6   :  { %6629 = vmatprep.subr.bf16.mxu1 %v9043_v56  ;;  %v9062_v56 = vld [vmem:[%s12939_s9 + $0x3b8] ss:$28 sps:$4 sm:$0xff]  }
 0x3b8   :  { %6338 = vmatpush1.bf16.msra.mxu0 %v9038_v57  ;;  %v9065_v57 = vld [vmem:[%s12939_s9 + $0x3c0] ss:$28 sps:$4 sm:$0xff]  }
 0x3b9   :  { %6630 = vmatpush1.bf16.msra.mxu1 %v9041_v42  ;;  %6339 = vmatprep.subr.bf16.mxu0 %v9046_v22  ;;  %v9070_v22 = vld [vmem:[%s12939_s9 + $0x3f4] ss:$28 sps:$4 sm:$0xff]  }
 0x3ba   :  { %6631 = vmatprep.subr.bf16.mxu1 %v9049_v58  ;;  %v9073_v58 = vld [vmem:[%s12939_s9 + $0x3fc] ss:$28 sps:$4 sm:$0xff]  }
 0x3bc   :  { %6340 = vmatpush1.bf16.msra.mxu0 %v9044_v60 }
 0x3bd   :  { %6632 = vmatpush1.bf16.msra.mxu1 %v9047_v61  ;;  %6341 = vmatprep.subr.bf16.mxu0 %v9052_v3 }
 0x3be   :  { %6633 = vmatprep.subr.bf16.mxu1 %v9055_v62  ;;  %v3301_v62 = vpack.c.bf16 %v3273_v52, %v3273_v52 }
 0x3c0   :  { %6342 = vmatpush1.bf16.msra.mxu0 %v9050_v63 }
 0x3c1   :  { %6634 = vmatpush1.bf16.msra.mxu1 %v9053_v1  ;;  %6384 = vmatprep.subr.bf16.mxu0 %v9058_v20 }
 0x3c2   :  { %6676 = vmatprep.subr.bf16.mxu1 %v9061_v39 }
 0x3d4   :  { %v2747_v2 = vpop.f32.mrb[8].mxu0  ;;  %v11280_v5 = vpop.f32.mrb[48].mxu1 }
 0x3d5   :  { %v2749_v59 = vpop.f32.mrb[9].mxu0  ;;  %v11282_v49 = vpop.f32.mrb[49].mxu1 }
 0x3d6   :  { %v2751_v4 = vpop.f32.mrb[10].mxu0  ;;  %v11287_v6 = vpop.f32.mrb[50].mxu1 }
 0x3d7   :  { %v3224_v7 = vpack.c.bf16 %v2751_v4, %v2747_v2  ;;  %v3226_v9 = vpack.c.bf16 %v11287_v6, %v11280_v5  ;;  %v2753_v11 = vpop.f32.mrb[11].mxu0  ;;  %v11294_v15 = vpop.f32.mrb[51].mxu1  ;;  %v9076_v4 = vld [vmem:[%s12939_s9 + $0x42c] ss:$28 sps:$4 sm:$0xff]  }
 0x3d8   :  { %v3225_v53 = vpack.c.bf16 %v2753_v11, %v2749_v59  ;;  %v3227_v12 = vpack.c.bf16 %v11294_v15, %v11282_v49  ;;  %v9089_v49 = vld [vmem:[%s12939_s9 + $0x4a0] ss:$28 sps:$4 sm:$0xff]   ;;  %v9146_v5 = vld [vmem:[%s12939_s9 + $0x6c8] ss:$28 sps:$4 sm:$0xff]   ;;  %v9149_v6 = vld [vmem:[%s12939_s9 + $0x6d0] ss:$28 sps:$4 sm:$0xff]  }
 0x3d9   :  { %v3362_v16 = vadd.bf16 %v11285_v8, %v3224_v7  ;;  %v9079_v7 = vld [vmem:[%s12939_s9 + $0x434] ss:$28 sps:$4 sm:$0xff]  }
 0x3da   :  { %v3363_v17 = vadd.bf16 %v11290_v34, %v3225_v53 }
 0x3db   :  { %v3394_v18 = vmul.bf16 1045249613, %v3362_v16 }
 0x3dc   :  { %v3395_v19 = vmul.bf16 1045249613, %v3363_v17  ;;  %v2757_v14 = vpop.f32.mrb[12].mxu0  ;;  %v11300_v55 = vpop.f32.mrb[52].mxu1 }
 0x3dd   :  { %v2759_v21 = vpop.f32.mrb[13].mxu0  ;;  %v11302_v23 = vpop.f32.mrb[53].mxu1  ;;  %v11314_v13 = vmax.bf16 %v3394_v18, %v3362_v16  ;;  %v3328_v16 = vpack.i.b16 %v3301_v62, %v3301_v62  ;;  %v9088_v62 = vld [vmem:[%s12939_s9 + $0x49c] ss:$28 sps:$4 sm:$0xff]  }
 0x3de   :  { %v11304_v30 = vmax.bf16 %v3395_v19, %v3363_v17  ;;  %v2761_v24 = vpop.f32.mrb[14].mxu0  ;;  %v11306_v26 = vpop.f32.mrb[54].mxu1  ;;  %v9074_v19 = vld [vmem:[%s12939_s9 + $0x428] ss:$28 sps:$4 sm:$0xff]  }
 0x3df   :  { %v3232_v29 = vpack.c.bf16 %v2761_v24, %v2757_v14  ;;  %v3234_v31 = vpack.c.bf16 %v11306_v26, %v11300_v55  ;;  %v2763_v36 = vpop.f32.mrb[15].mxu0  ;;  %v11318_v38 = vpop.f32.mrb[55].mxu1  ;;  %v9077_v14 = vld [vmem:[%s12939_s9 + $0x430] ss:$28 sps:$4 sm:$0xff]   ;;  %v9082_v24 = vld [vmem:[%s12939_s9 + $0x464] ss:$28 sps:$4 sm:$0xff]  }
 0x3e0   :  { %v3233_v46 = vpack.c.bf16 %v2763_v36, %v2759_v21  ;;  %v3235_v27 = vpack.c.bf16 %v11318_v38, %v11302_v23  ;;  %6343 = vmatprep.mubr.bf16.mxu0 %v11304_v30  ;;  %6635 = vmatprep.mubr.bf16.mxu1 %v11304_v30  ;;  %v9157_v23 = vld [vmem:[%s12939_s9 + $0x70c] ss:$28 sps:$4 sm:$0xff]   ;;  %v9163_v55 = vld [vmem:[%s12939_s9 + $0x744] ss:$28 sps:$4 sm:$0xff]   ;;  %v9158_v26 = vld [vmem:[%s12939_s9 + $0x738] ss:$28 sps:$4 sm:$0xff]  }
 0x3e1   :  { %v3370_v54 = vadd.bf16 %v11285_v8, %v3232_v29  ;;  %6344 = vmatmul.mubr.bf16.vlgmr.msra.gmra.mrb[40].mxu0 %v11314_v13  ;;  %6636 = vmatmul.mubr.bf16.vlgmr.msra.gmra.mrb[80].mxu1 %v11314_v13 }
 0x3e2   :  { %v3371_v47 = vadd.bf16 %v11290_v34, %v3233_v46  ;;  %6385 = vmatpush1.bf16.msra.mxu0 %v9056_v10  ;;  %6677 = vmatpush1.bf16.msra.mxu1 %v9059_v41  ;;  %v9085_v10 = vld [vmem:[%s12939_s9 + $0x46c] ss:$28 sps:$4 sm:$0xff]  }
 0x3e3   :  { %v3402_v42 = vmul.bf16 1045249613, %v3370_v54  ;;  %6386 = vmatprep.subr.bf16.mxu0 %v9064_v43  ;;  %6678 = vmatprep.subr.bf16.mxu1 %v9067_v25  ;;  %v11397_v43 = vrot.slane %v3328_v16, %v9894_v35  ;;  %v9092_v16 = vld [vmem:[%s12939_s9 + $0x4d0] ss:$28 sps:$4 sm:$0xff]  }
 0x3e4   :  { %v3403_v60 = vmul.bf16 1045249613, %v3371_v47  ;;  %v2767_v61 = vpop.f32.mrb[16].mxu0  ;;  %v11348_v3 = vpop.f32.mrb[56].mxu1 }
 0x3e5   :  { %v2769_v63 = vpop.f32.mrb[17].mxu0  ;;  %v11350_v1 = vpop.f32.mrb[57].mxu1  ;;  %v11362_v44 = vmax.bf16 %v3402_v42, %v3370_v54 }
 0x3e6   :  { %v11352_v20 = vmax.bf16 %v3403_v60, %v3371_v47  ;;  %6387 = vmatpush1.bf16.msra.mxu0 %v9062_v56  ;;  %6679 = vmatpush1.bf16.msra.mxu1 %v9065_v57  ;;  %v2771_v39 = vpop.f32.mrb[18].mxu0  ;;  %v11354_v0 = vpop.f32.mrb[58].mxu1  ;;  %v9080_v56 = vld [vmem:[%s12939_s9 + $0x460] ss:$28 sps:$4 sm:$0xff]   ;;  %v9083_v57 = vld [vmem:[%s12939_s9 + $0x468] ss:$28 sps:$4 sm:$0xff]  }
 0x3e7   :  { %v3240_v48 = vpack.c.bf16 %v2771_v39, %v2767_v61  ;;  %v3242_v32 = vpack.c.bf16 %v11354_v0, %v11348_v3  ;;  %v2773_v2 = vpop.f32.mrb[19].mxu0  ;;  %v11366_v59 = vpop.f32.mrb[59].mxu1  ;;  %6388 = vmatprep.subr.bf16.mxu0 %v9070_v22  ;;  %6680 = vmatprep.subr.bf16.mxu1 %v9073_v58  ;;  %v9172_v3 = vld [vmem:[%s12939_s9 + $0x7ac] ss:$28 sps:$4 sm:$0xff]   ;;  %v9175_v0 = vld [vmem:[%s12939_s9 + $0x7b4] ss:$28 sps:$4 sm:$0xff]  }
 0x3e8   :  { %v3241_v11 = vpack.c.bf16 %v2773_v2, %v2769_v63  ;;  %v3243_v53 = vpack.c.bf16 %v11366_v59, %v11350_v1  ;;  %6353 = vmatprep.mubr.bf16.mxu0 %v11352_v20  ;;  %6645 = vmatprep.mubr.bf16.mxu1 %v11352_v20  ;;  %v9091_v63 = vld [vmem:[%s12939_s9 + $0x4a4] ss:$28 sps:$4 sm:$0xff]   ;;  %v9166_v59 = vld [vmem:[%s12939_s9 + $0x774] ss:$28 sps:$4 sm:$0xff]  }
 0x3e9   :  { %v3378_v17 = vadd.bf16 %v11285_v8, %v3240_v48  ;;  %6354 = vmatmul.mubr.bf16.gmra.mrb[44].mxu0 %v11362_v44  ;;  %6646 = vmatmul.mubr.bf16.gmra.mrb[84].mxu1 %v11362_v44  ;;  %v9161_v1 = vld [vmem:[%s12939_s9 + $0x740] ss:$28 sps:$4 sm:$0xff]  }
 0x3ea   :  { %v3379_v18 = vadd.bf16 %v11290_v34, %v3241_v11  ;;  %6389 = vmatpush1.bf16.msra.mxu0 %v9068_v37  ;;  %6681 = vmatpush1.bf16.msra.mxu1 %v9071_v28  ;;  %v3365_v28 = vadd.bf16 %v11397_v43, %v3227_v12 }
 0x3eb   :  { %v3410_v21 = vmul.bf16 1045249613, %v3378_v17  ;;  %6390 = vmatprep.subr.bf16.mxu0 %v9076_v4  ;;  %6682 = vmatprep.subr.bf16.mxu1 %v9079_v7  ;;  %v9086_v4 = vld [vmem:[%s12939_s9 + $0x498] ss:$28 sps:$4 sm:$0xff]  }
 0x3ec   :  { %v3411_v41 = vmul.bf16 1045249613, %v3379_v18  ;;  %v2777_v29 = vpop.f32.mrb[20].mxu0  ;;  %v11394_v36 = vpop.f32.mrb[60].mxu1  ;;  %v3397_v7 = vmul.bf16 1045249613, %v3365_v28 }
 0x3ed   :  { %v2779_v25 = vpop.f32.mrb[21].mxu0  ;;  %v11399_v46 = vpop.f32.mrb[61].mxu1  ;;  %v11411_v42 = vmax.bf16 %v3410_v21, %v3378_v17  ;;  %v9095_v17 = vld [vmem:[%s12939_s9 + $0x4d8] ss:$28 sps:$4 sm:$0xff]  }
 0x3ee   :  { %v11401_v52 = vmax.bf16 %v3411_v41, %v3379_v18  ;;  %6391 = vmatpush1.bf16.msra.mxu0 %v9074_v19  ;;  %6683 = vmatpush1.bf16.msra.mxu1 %v9077_v14  ;;  %v2781_v54 = vpop.f32.mrb[22].mxu0  ;;  %v11403_v47 = vpop.f32.mrb[62].mxu1  ;;  %v9100_v19 = vld [vmem:[%s12939_s9 + $0x50c] ss:$28 sps:$4 sm:$0xff]   ;;  %v9103_v14 = vld [vmem:[%s12939_s9 + $0x514] ss:$28 sps:$4 sm:$0xff]   ;;  %v11465_v21 = vmax.bf16 %v3397_v7, %v3365_v28 }
 0x3ef   :  { %v3248_v22 = vpack.c.bf16 %v2781_v54, %v2777_v29  ;;  %v3250_v58 = vpack.c.bf16 %v11403_v47, %v11394_v36  ;;  %v2783_v60 = vpop.f32.mrb[23].mxu0  ;;  %v11415_v61 = vpop.f32.mrb[63].mxu1  ;;  %6392 = vmatprep.subr.bf16.mxu0 %v9082_v24  ;;  %6684 = vmatprep.subr.bf16.mxu1 %v9085_v10  ;;  %v9098_v24 = vld [vmem:[%s12939_s9 + $0x508] ss:$28 sps:$4 sm:$0xff]   ;;  %v9101_v10 = vld [vmem:[%s12939_s9 + $0x510] ss:$28 sps:$4 sm:$0xff]  }
 0x3f0   :  { %v3249_v39 = vpack.c.bf16 %v2783_v60, %v2779_v25  ;;  %v3251_v37 = vpack.c.bf16 %v11415_v61, %v11399_v46  ;;  %6363 = vmatprep.mubr.bf16.mxu0 %v11401_v52  ;;  %6655 = vmatprep.mubr.bf16.mxu1 %v11401_v52  ;;  %v9106_v41 = vld [vmem:[%s12939_s9 + $0x544] ss:$28 sps:$4 sm:$0xff]   ;;  %v9109_v29 = vld [vmem:[%s12939_s9 + $0x54c] ss:$28 sps:$4 sm:$0xff]   ;;  %v9119_v28 = vld [vmem:[%s12939_s9 + $0x5b8] ss:$28 sps:$4 sm:$0xff]  }
 0x3f1   :  { %v3386_v48 = vadd.bf16 %v11285_v8, %v3248_v22  ;;  %6364 = vmatmul.mubr.bf16.gmra.mrb[48].mxu0 %v11411_v42  ;;  %6656 = vmatmul.mubr.bf16.gmra.mrb[88].mxu1 %v11411_v42  ;;  %v9094_v8 = vld [vmem:[%s12939_s9 + $0x4d4] ss:$28 sps:$4 sm:$0xff]   ;;  %v9104_v25 = vld [vmem:[%s12939_s9 + $0x540] ss:$28 sps:$4 sm:$0xff]   ;;  %v9107_v54 = vld [vmem:[%s12939_s9 + $0x548] ss:$28 sps:$4 sm:$0xff]  }
 0x3f2   :  { %v3387_v2 = vadd.bf16 %v11290_v34, %v3249_v39  ;;  %6393 = vmatpush1.bf16.msra.mxu0 %v9080_v56  ;;  %6685 = vmatpush1.bf16.msra.mxu1 %v9083_v57  ;;  %v9097_v34 = vld [vmem:[%s12939_s9 + $0x4dc] ss:$28 sps:$4 sm:$0xff]   ;;  %v9115_v57 = vld [vmem:[%s12939_s9 + $0x584] ss:$28 sps:$4 sm:$0xff]   ;;  %v9116_v39 = vld [vmem:[%s12939_s9 + $0x5b0] ss:$28 sps:$4 sm:$0xff]  }
 0x3f3   :  { %v3418_v15 = vmul.bf16 1045249613, %v3386_v48  ;;  %6394 = vmatprep.subr.bf16.mxu0 %v9088_v62  ;;  %6686 = vmatprep.subr.bf16.mxu1 %v9091_v63  ;;  %v9112_v56 = vld [vmem:[%s12939_s9 + $0x57c] ss:$28 sps:$4 sm:$0xff]   ;;  %v9118_v62 = vld [vmem:[%s12939_s9 + $0x5b4] ss:$28 sps:$4 sm:$0xff]  }
 0x3f4   :  { %v3419_v12 = vmul.bf16 1045249613, %v3387_v2  ;;  %v9110_v22 = vld [vmem:[%s12939_s9 + $0x578] ss:$28 sps:$4 sm:$0xff]   ;;  %v9113_v60 = vld [vmem:[%s12939_s9 + $0x580] ss:$28 sps:$4 sm:$0xff]  }
 0x3f5   :  { %v11455_v18 = vmax.bf16 %v3418_v15, %v3386_v48  ;;  %v9121_v63 = vld [vmem:[%s12939_s9 + $0x5bc] ss:$28 sps:$4 sm:$0xff]   ;;  %v3269_v48 = vrot.slane %v11274_v40, %v10554_v45  ;;  %v9125_v15 = vld [vmem:[%s12939_s9 + $0x5f0] ss:$28 sps:$4 sm:$0xff]   ;;  %v9178_v61 = vld [vmem:[%s12939_s9 + $0x7e4] ss:$28 sps:$4 sm:$0xff]  }
 0x3f6   :  { %v11447_v11 = vmax.bf16 %v3419_v12, %v3387_v2  ;;  %6395 = vmatpush1.bf16.msra.mxu0 %v9086_v4  ;;  %6687 = vmatpush1.bf16.msra.mxu1 %v9089_v49  ;;  %v9124_v2 = vld [vmem:[%s12939_s9 + $0x5ec] ss:$28 sps:$4 sm:$0xff]   ;;  %v9127_v4 = vld [vmem:[%s12939_s9 + $0x5f4] ss:$28 sps:$4 sm:$0xff]   ;;  %v9128_v7 = vld [vmem:[%s12939_s9 + $0x620] ss:$28 sps:$4 sm:$0xff]  }
 0x3f7   :  { %6396 = vmatprep.subr.bf16.mxu0 %v9094_v8  ;;  %6688 = vmatprep.subr.bf16.mxu1 %v9097_v34  ;;  %v9122_v49 = vld [vmem:[%s12939_s9 + $0x5e8] ss:$28 sps:$4 sm:$0xff]   ;;  %v3300_v8 = vpack.c.bf16 %v3269_v48, %v3269_v48  ;;  %v9173_v46 = vld [vmem:[%s12939_s9 + $0x7b0] ss:$28 sps:$4 sm:$0xff]   ;;  %v9182_v36 = vld [vmem:[%s12939_s9 + $0x818] ss:$28 sps:$4 sm:$0xff]  }
 0x3f8   :  { %6373 = vmatprep.mubr.bf16.mxu0 %v11447_v11  ;;  %6665 = vmatprep.mubr.bf16.mxu1 %v11447_v11  ;;  %v9130_v34 = vld [vmem:[%s12939_s9 + $0x624] ss:$28 sps:$4 sm:$0xff]   ;;  %v9133_v12 = vld [vmem:[%s12939_s9 + $0x62c] ss:$28 sps:$4 sm:$0xff]  }
 0x3f9   :  { %6374 = vmatmul.mubr.bf16.gmra.mrb[52].mxu0 %v11455_v18  ;;  %6666 = vmatmul.mubr.bf16.gmra.mrb[92].mxu1 %v11455_v18  ;;  %v9155_v48 = vld [vmem:[%s12939_s9 + $0x708] ss:$28 sps:$4 sm:$0xff]  }
 0x3fa   :  { %6397 = vmatpush1.bf16.msra.mxu0 %v9092_v16  ;;  %6689 = vmatpush1.bf16.msra.mxu1 %v9095_v17  ;;  %v9131_v16 = vld [vmem:[%s12939_s9 + $0x628] ss:$28 sps:$4 sm:$0xff]   ;;  %v3321_v17 = vpack.i.b16 %v3300_v8, %v3300_v8  ;;  %v9164_v8 = vld [vmem:[%s12939_s9 + $0x770] ss:$28 sps:$4 sm:$0xff]  }
 0x3fb   :  { %6416 = vmatprep.mubr.bf16.mxu0 %v11465_v21  ;;  %6708 = vmatprep.mubr.bf16.mxu1 %v11465_v21 }
 0x3fc   :  { %6398 = vmatprep.subr.bf16.mxu0 %v9100_v19  ;;  %6690 = vmatprep.subr.bf16.mxu1 %v9103_v14  ;;  %v9136_v19 = vld [vmem:[%s12939_s9 + $0x65c] ss:$28 sps:$4 sm:$0xff]   ;;  %v9139_v14 = vld [vmem:[%s12939_s9 + $0x664] ss:$28 sps:$4 sm:$0xff]  }
 0x3fe   :  { %6399 = vmatpush1.bf16.msra.mxu0 %v9098_v24  ;;  %6691 = vmatpush1.bf16.msra.mxu1 %v9101_v10  ;;  %v9134_v24 = vld [vmem:[%s12939_s9 + $0x658] ss:$28 sps:$4 sm:$0xff]   ;;  %v9137_v10 = vld [vmem:[%s12939_s9 + $0x660] ss:$28 sps:$4 sm:$0xff]  }
 0x3ff   :  { %6400 = vmatprep.subr.bf16.mxu0 %v9106_v41  ;;  %6692 = vmatprep.subr.bf16.mxu1 %v9109_v29  ;;  %v11552_v41 = vrot.slane %v3321_v17, %v9894_v35  ;;  %v9142_v29 = vld [vmem:[%s12939_s9 + $0x694] ss:$28 sps:$4 sm:$0xff]   ;;  %v3389_v17 = vadd.bf16 %v11397_v43, %v3251_v37 }
 0x401   :  { %v3421_v37 = vmul.bf16 1045249613, %v3389_v17 }
 0x402   :  { %6401 = vmatpush1.bf16.msra.mxu0 %v9104_v25  ;;  %6693 = vmatpush1.bf16.msra.mxu1 %v9107_v54  ;;  %v9145_v25 = vld [vmem:[%s12939_s9 + $0x69c] ss:$28 sps:$4 sm:$0xff]   ;;  %v9140_v54 = vld [vmem:[%s12939_s9 + $0x690] ss:$28 sps:$4 sm:$0xff]  }
 0x403   :  { %6402 = vmatprep.subr.bf16.mxu0 %v9112_v56  ;;  %6694 = vmatprep.subr.bf16.mxu1 %v9115_v57  ;;  %v9143_v56 = vld [vmem:[%s12939_s9 + $0x698] ss:$28 sps:$4 sm:$0xff]   ;;  %v3364_v57 = vadd.bf16 %v11552_v41, %v3226_v9 }
 0x405   :  { %v3396_v9 = vmul.bf16 1045249613, %v3364_v57 }
 0x406   :  { %6403 = vmatpush1.bf16.msra.mxu0 %v9110_v22  ;;  %6695 = vmatpush1.bf16.msra.mxu1 %v9113_v60  ;;  %v9148_v22 = vld [vmem:[%s12939_s9 + $0x6cc] ss:$28 sps:$4 sm:$0xff]   ;;  %v9151_v60 = vld [vmem:[%s12939_s9 + $0x6d4] ss:$28 sps:$4 sm:$0xff]  }
 0x407   :  { %6404 = vmatprep.subr.bf16.mxu0 %v9118_v62  ;;  %6696 = vmatprep.subr.bf16.mxu1 %v9121_v63  ;;  %v3373_v62 = vadd.bf16 %v11397_v43, %v3235_v27  ;;  %v9154_v63 = vld [vmem:[%s12939_s9 + $0x704] ss:$28 sps:$4 sm:$0xff]  }
 0x408   :  { %v9152_v27 = vld [vmem:[%s12939_s9 + $0x700] ss:$28 sps:$4 sm:$0xff]  }
 0x409   :  { %v3405_v38 = vmul.bf16 1045249613, %v3373_v62 }
 0x40a   :  { %6405 = vmatpush1.bf16.msra.mxu0 %v9116_v39  ;;  %6697 = vmatpush1.bf16.msra.mxu1 %v9119_v28  ;;  %v11595_v39 = vmax.bf16 %v3396_v9, %v3364_v57  ;;  %v3372_v28 = vadd.bf16 %v11552_v41, %v3234_v31  ;;  %v9193_v57 = vld [vmem:[%s12939_s9 + $0x85c] ss:$28 sps:$4 sm:$0xff]   ;;  %v9194_v9 = vld [vmem:[%s12939_s9 + $0x888] ss:$28 sps:$4 sm:$0xff]  }
 0x40b   :  { %6406 = vmatprep.subr.bf16.mxu0 %v9124_v2  ;;  %6698 = vmatprep.subr.bf16.mxu1 %v9127_v4  ;;  %v11604_v2 = vmax.bf16 %v3405_v38, %v3373_v62  ;;  %v3381_v4 = vadd.bf16 %v11397_v43, %v3243_v53  ;;  %v9191_v62 = vld [vmem:[%s12939_s9 + $0x858] ss:$28 sps:$4 sm:$0xff]   ;;  %v9205_v38 = vld [vmem:[%s12939_s9 + $0x8cc] ss:$28 sps:$4 sm:$0xff]  }
 0x40c   :  { %v3404_v31 = vmul.bf16 1045249613, %v3372_v28 }
 0x40d   :  { %v3413_v53 = vmul.bf16 1045249613, %v3381_v4 }
 0x40e   :  { %6407 = vmatpush1.bf16.msra.mxu0 %v9122_v49  ;;  %6699 = vmatpush1.bf16.msra.mxu1 %v9125_v15  ;;  %v9160_v49 = vld [vmem:[%s12939_s9 + $0x73c] ss:$28 sps:$4 sm:$0xff]  }
 0x40f   :  { %6408 = vmatprep.subr.bf16.mxu0 %v9130_v34  ;;  %6700 = vmatprep.subr.bf16.mxu1 %v9133_v12  ;;  %v9169_v15 = vld [vmem:[%s12939_s9 + $0x77c] ss:$28 sps:$4 sm:$0xff]   ;;  %v11635_v34 = vmax.bf16 %v3404_v31, %v3372_v28  ;;  %v3380_v12 = vadd.bf16 %v11552_v41, %v3242_v32  ;;  %v9170_v32 = vld [vmem:[%s12939_s9 + $0x7a8] ss:$28 sps:$4 sm:$0xff]  }
 0x410   :  { %v9203_v28 = vld [vmem:[%s12939_s9 + $0x8c8] ss:$28 sps:$4 sm:$0xff]   ;;  %v9217_v31 = vld [vmem:[%s12939_s9 + $0x93c] ss:$28 sps:$4 sm:$0xff]  }
 0x411   :  { %v3412_v43 = vmul.bf16 1045249613, %v3380_v12 }
 0x412   :  { %6409 = vmatpush1.bf16.msra.mxu0 %v9128_v7  ;;  %6701 = vmatpush1.bf16.msra.mxu1 %v9131_v16  ;;  %v9167_v7 = vld [vmem:[%s12939_s9 + $0x778] ss:$28 sps:$4 sm:$0xff]   ;;  %v11644_v16 = vmax.bf16 %v3413_v53, %v3381_v4  ;;  %v9211_v4 = vld [vmem:[%s12939_s9 + $0x904] ss:$28 sps:$4 sm:$0xff]  }
 0x413   :  { %6410 = vmatprep.subr.bf16.mxu0 %v9136_v19  ;;  %6702 = vmatprep.subr.bf16.mxu1 %v9139_v14  ;;  %v9181_v19 = vld [vmem:[%s12939_s9 + $0x7ec] ss:$28 sps:$4 sm:$0xff]   ;;  %v9176_v14 = vld [vmem:[%s12939_s9 + $0x7e0] ss:$28 sps:$4 sm:$0xff]   ;;  %v9215_v53 = vld [vmem:[%s12939_s9 + $0x938] ss:$28 sps:$4 sm:$0xff]  }
 0x416   :  { %6411 = vmatpush1.bf16.msra.mxu0 %v9134_v24  ;;  %6703 = vmatpush1.bf16.msra.mxu1 %v9137_v10  ;;  %v11675_v24 = vmax.bf16 %v3412_v43, %v3380_v12  ;;  %v3388_v10 = vadd.bf16 %v11552_v41, %v3250_v58  ;;  %v9185_v58 = vld [vmem:[%s12939_s9 + $0x820] ss:$28 sps:$4 sm:$0xff]   ;;  %v9190_v41 = vld [vmem:[%s12939_s9 + $0x854] ss:$28 sps:$4 sm:$0xff]   ;;  %v9229_v43 = vld [vmem:[%s12939_s9 + $0x9ac] ss:$28 sps:$4 sm:$0xff]  }
 0x417   :  { %6412 = vmatprep.subr.bf16.mxu0 %v9142_v29  ;;  %6704 = vmatprep.subr.bf16.mxu1 %v9145_v25  ;;  %v9179_v29 = vld [vmem:[%s12939_s9 + $0x7e8] ss:$28 sps:$4 sm:$0xff]   ;;  %v11684_v25 = vmax.bf16 %v3421_v37, %v3389_v17  ;;  %v9223_v12 = vld [vmem:[%s12939_s9 + $0x974] ss:$28 sps:$4 sm:$0xff]  }
 0x418   :  { %v3420_v47 = vmul.bf16 1045249613, %v3388_v10  ;;  %v9227_v37 = vld [vmem:[%s12939_s9 + $0x9a8] ss:$28 sps:$4 sm:$0xff]  }
 0x41a   :  { %6413 = vmatpush1.bf16.msra.mxu0 %v9140_v54  ;;  %6705 = vmatpush1.bf16.msra.mxu1 %v9143_v56  ;;  %v9184_v54 = vld [vmem:[%s12939_s9 + $0x81c] ss:$28 sps:$4 sm:$0xff]   ;;  %v9187_v56 = vld [vmem:[%s12939_s9 + $0x824] ss:$28 sps:$4 sm:$0xff]  }
 0x41b   :  { %6414 = vmatprep.subr.bf16.mxu0 %v9148_v22  ;;  %6706 = vmatprep.subr.bf16.mxu1 %v9151_v60  ;;  %v9188_v22 = vld [vmem:[%s12939_s9 + $0x850] ss:$28 sps:$4 sm:$0xff]   ;;  %v11711_v60 = vmax.bf16 %v3420_v47, %v3388_v10  ;;  %v9235_v10 = vld [vmem:[%s12939_s9 + $0x9e4] ss:$28 sps:$4 sm:$0xff]  }
 0x41c   :  { %v9238_v47 = vld [vmem:[%s12939_s9 + $0xa14] ss:$28 sps:$4 sm:$0xff]  }
 0x41e   :  { %6415 = vmatpush1.bf16.msra.mxu0 %v9146_v5  ;;  %6707 = vmatpush1.bf16.msra.mxu1 %v9149_v6  ;;  %v9196_v5 = vld [vmem:[%s12939_s9 + $0x88c] ss:$28 sps:$4 sm:$0xff]   ;;  %v9199_v6 = vld [vmem:[%s12939_s9 + $0x894] ss:$28 sps:$4 sm:$0xff]  }
 0x41f   :  { %6457 = vmatprep.subr.bf16.mxu0 %v9154_v63  ;;  %6749 = vmatprep.subr.bf16.mxu1 %v9157_v23  ;;  %v9197_v63 = vld [vmem:[%s12939_s9 + $0x890] ss:$28 sps:$4 sm:$0xff]   ;;  %v9202_v23 = vld [vmem:[%s12939_s9 + $0x8c4] ss:$28 sps:$4 sm:$0xff]  }
 0x421   :  { %6417 = vmatmul.mubr.bf16.vlgmr.msra.gmra.mrb[40].mxu0 %v11595_v39  ;;  %6709 = vmatmul.mubr.bf16.vlgmr.msra.gmra.mrb[80].mxu1 %v11595_v39 }
 0x422   :  { %6426 = vmatprep.mubr.bf16.mxu0 %v11604_v2  ;;  %6458 = vmatpush1.bf16.msra.mxu0 %v9152_v27  ;;  %v9200_v27 = vld [vmem:[%s12939_s9 + $0x8c0] ss:$28 sps:$4 sm:$0xff]  }
 0x423   :  { %6718 = vmatprep.mubr.bf16.mxu1 %v11604_v2  ;;  %6750 = vmatpush1.bf16.msra.mxu1 %v9155_v48  ;;  %v9208_v48 = vld [vmem:[%s12939_s9 + $0x8fc] ss:$28 sps:$4 sm:$0xff]  }
 0x424   :  { %6459 = vmatprep.subr.bf16.mxu0 %v9160_v49  ;;  %6751 = vmatprep.subr.bf16.mxu1 %v9163_v55  ;;  %v9206_v49 = vld [vmem:[%s12939_s9 + $0x8f8] ss:$28 sps:$4 sm:$0xff]   ;;  %v9209_v55 = vld [vmem:[%s12939_s9 + $0x900] ss:$28 sps:$4 sm:$0xff]  }
 0x426   :  { %6460 = vmatpush1.bf16.msra.mxu0 %v9158_v26  ;;  %v9214_v26 = vld [vmem:[%s12939_s9 + $0x934] ss:$28 sps:$4 sm:$0xff]  }
 0x427   :  { %6752 = vmatpush1.bf16.msra.mxu1 %v9161_v1  ;;  %6461 = vmatprep.subr.bf16.mxu0 %v9166_v59  ;;  %v9212_v1 = vld [vmem:[%s12939_s9 + $0x930] ss:$28 sps:$4 sm:$0xff]   ;;  %v12943_v59 = vsub.s32 4, %v9891_v33 }
 0x428   :  { %6753 = vmatprep.subr.bf16.mxu1 %v9169_v15  ;;  %v9220_v15 = vld [vmem:[%s12939_s9 + $0x96c] ss:$28 sps:$4 sm:$0xff]  }
 0x429   :  { %6427 = vmatmul.mubr.bf16.gmra.mrb[44].mxu0 %v11635_v34  ;;  %6719 = vmatmul.mubr.bf16.gmra.mrb[84].mxu1 %v11635_v34  ;;  %v3277_v17 = vrot.slane %v11274_v40, %v12943_v59 }
 0x42a   :  { %6436 = vmatprep.mubr.bf16.mxu0 %v11644_v16  ;;  %6462 = vmatpush1.bf16.msra.mxu0 %v9164_v8  ;;  %v12942_v8 = vsub.s32 5, %v9891_v33 }
 0x42b   :  { %6728 = vmatprep.mubr.bf16.mxu1 %v11644_v16  ;;  %6754 = vmatpush1.bf16.msra.mxu1 %v9167_v7  ;;  %v9218_v7 = vld [vmem:[%s12939_s9 + $0x968] ss:$28 sps:$4 sm:$0xff]  }
 0x42c   :  { %6463 = vmatprep.subr.bf16.mxu0 %v9172_v3  ;;  %6755 = vmatprep.subr.bf16.mxu1 %v9175_v0  ;;  %v9221_v3 = vld [vmem:[%s12939_s9 + $0x970] ss:$28 sps:$4 sm:$0xff]   ;;  %v9226_v0 = vld [vmem:[%s12939_s9 + $0x9a4] ss:$28 sps:$4 sm:$0xff]  }
 0x42e   :  { %6464 = vmatpush1.bf16.msra.mxu0 %v9170_v32  ;;  %v3281_v32 = vrot.slane %v11274_v40, %v12942_v8  ;;  %v9275_v8 = vld [vmem:[%s12939_s9 + $0xb68] ss:$28 sps:$4 sm:$0xff]  }
 0x42f   :  { %6756 = vmatpush1.bf16.msra.mxu1 %v9173_v46  ;;  %6465 = vmatprep.subr.bf16.mxu0 %v9178_v61  ;;  %v9224_v46 = vld [vmem:[%s12939_s9 + $0x9a0] ss:$28 sps:$4 sm:$0xff]   ;;  %v3302_v61 = vpack.c.bf16 %v3277_v17, %v3277_v17 }
 0x430   :  { %6757 = vmatprep.subr.bf16.mxu1 %v9181_v19  ;;  %v9232_v19 = vld [vmem:[%s12939_s9 + $0x9dc] ss:$28 sps:$4 sm:$0xff]  }
 0x431   :  { %6437 = vmatmul.mubr.bf16.gmra.mrb[48].mxu0 %v11675_v24  ;;  %6729 = vmatmul.mubr.bf16.gmra.mrb[88].mxu1 %v11675_v24 }
 0x432   :  { %6446 = vmatprep.mubr.bf16.mxu0 %v11684_v25  ;;  %6466 = vmatpush1.bf16.msra.mxu0 %v9176_v14  ;;  %v3303_v14 = vpack.c.bf16 %v3281_v32, %v3281_v32 }
 0x433   :  { %6738 = vmatprep.mubr.bf16.mxu1 %v11684_v25  ;;  %6758 = vmatpush1.bf16.msra.mxu1 %v9179_v29  ;;  %v9230_v29 = vld [vmem:[%s12939_s9 + $0x9d8] ss:$28 sps:$4 sm:$0xff]  }
 0x434   :  { %6467 = vmatprep.subr.bf16.mxu0 %v9184_v54  ;;  %6759 = vmatprep.subr.bf16.mxu1 %v9187_v56  ;;  %v3335_v54 = vpack.i.b16 %v3302_v61, %v3302_v61  ;;  %v9233_v56 = vld [vmem:[%s12939_s9 + $0x9e0] ss:$28 sps:$4 sm:$0xff]  }
 0x436   :  { %6468 = vmatpush1.bf16.msra.mxu0 %v9182_v36  ;;  %v3342_v36 = vpack.i.b16 %v3303_v14, %v3303_v14 }
 0x437   :  { %6760 = vmatpush1.bf16.msra.mxu1 %v9185_v58  ;;  %6469 = vmatprep.subr.bf16.mxu0 %v9190_v41  ;;  %v9241_v58 = vld [vmem:[%s12939_s9 + $0xa1c] ss:$28 sps:$4 sm:$0xff]  }
 0x438   :  { %6761 = vmatprep.subr.bf16.mxu1 %v9193_v57 }
 0x439   :  { %6447 = vmatmul.mubr.bf16.gmra.mrb[52].mxu0 %v11711_v60  ;;  %6739 = vmatmul.mubr.bf16.gmra.mrb[92].mxu1 %v11711_v60 }
 0x43a   :  { %6470 = vmatpush1.bf16.msra.mxu0 %v9188_v22 }
 0x43b   :  { %6762 = vmatpush1.bf16.msra.mxu1 %v9191_v62  ;;  %6471 = vmatprep.subr.bf16.mxu0 %v9196_v5  ;;  %v11819_v62 = vrot.slane %v3335_v54, %v9894_v35  ;;  %v9236_v5 = vld [vmem:[%s12939_s9 + $0xa10] ss:$28 sps:$4 sm:$0xff]  }
 0x43c   :  { %6763 = vmatprep.subr.bf16.mxu1 %v9199_v6 }
 0x43e   :  { %6472 = vmatpush1.bf16.msra.mxu0 %v9194_v9 }
 0x43f   :  { %6764 = vmatpush1.bf16.msra.mxu1 %v9197_v63  ;;  %6473 = vmatprep.subr.bf16.mxu0 %v9202_v23  ;;  %v11827_v63 = vrot.slane %v3342_v36, %v9894_v35  ;;  %v9239_v23 = vld [vmem:[%s12939_s9 + $0xa18] ss:$28 sps:$4 sm:$0xff]  }
 0x440   :  { %6765 = vmatprep.subr.bf16.mxu1 %v9205_v38  ;;  %v9244_v38 = vld [vmem:[%s12939_s9 + $0xa4c] ss:$28 sps:$4 sm:$0xff]  }
 0x442   :  { %6474 = vmatpush1.bf16.msra.mxu0 %v9200_v27 }
 0x443   :  { %6766 = vmatpush1.bf16.msra.mxu1 %v9203_v28  ;;  %6475 = vmatprep.subr.bf16.mxu0 %v9208_v48 }
 0x444   :  { %6767 = vmatprep.subr.bf16.mxu1 %v9211_v4  ;;  %v9247_v4 = vld [vmem:[%s12939_s9 + $0xa54] ss:$28 sps:$4 sm:$0xff]  }
 0x446   :  { %6476 = vmatpush1.bf16.msra.mxu0 %v9206_v49 }
 0x447   :  { %6768 = vmatpush1.bf16.msra.mxu1 %v9209_v55  ;;  %6477 = vmatprep.subr.bf16.mxu0 %v9214_v26 }
 0x448   :  { %6769 = vmatprep.subr.bf16.mxu1 %v9217_v31 }
 0x44a   :  { %6478 = vmatpush1.bf16.msra.mxu0 %v9212_v1 }
 0x44b   :  { %6770 = vmatpush1.bf16.msra.mxu1 %v9215_v53  ;;  %6479 = vmatprep.subr.bf16.mxu0 %v9220_v15  ;;  %v9242_v53 = vld [vmem:[%s12939_s9 + $0xa48] ss:$28 sps:$4 sm:$0xff]  }
 0x44c   :  { %6771 = vmatprep.subr.bf16.mxu1 %v9223_v12  ;;  %v9245_v12 = vld [vmem:[%s12939_s9 + $0xa50] ss:$28 sps:$4 sm:$0xff]  }
 0x44e   :  { %6480 = vmatpush1.bf16.msra.mxu0 %v9218_v7  ;;  %v9250_v7 = vld [vmem:[%s12939_s9 + $0xa84] ss:$28 sps:$4 sm:$0xff]  }
 0x44f   :  { %6772 = vmatpush1.bf16.msra.mxu1 %v9221_v3  ;;  %6481 = vmatprep.subr.bf16.mxu0 %v9226_v0  ;;  %v9253_v3 = vld [vmem:[%s12939_s9 + $0xa8c] ss:$28 sps:$4 sm:$0xff]  }
 0x450   :  { %6773 = vmatprep.subr.bf16.mxu1 %v9229_v43  ;;  %v3288_v43 = vsub.s32 7, %v9891_v33 }
 0x452   :  { %6482 = vmatpush1.bf16.msra.mxu0 %v9224_v46 }
 0x453   :  { %6774 = vmatpush1.bf16.msra.mxu1 %v9227_v37  ;;  %6483 = vmatprep.subr.bf16.mxu0 %v9232_v19 }
 0x454   :  { %6775 = vmatprep.subr.bf16.mxu1 %v9235_v10  ;;  %v9248_v10 = vld [vmem:[%s12939_s9 + $0xa80] ss:$28 sps:$4 sm:$0xff]  }
 0x455   :  { %v3039_v41 = vpop.f32.mrb[24].mxu0 }
 0x456   :  { %v11816_v57 = vpop.f32.mrb[64].mxu1  ;;  %v3041_v22 = vpop.f32.mrb[25].mxu0  ;;  %6484 = vmatpush1.bf16.msra.mxu0 %v9230_v29  ;;  %v9251_v29 = vld [vmem:[%s12939_s9 + $0xa88] ss:$28 sps:$4 sm:$0xff]  }
 0x457   :  { %v11824_v6 = vpop.f32.mrb[65].mxu1  ;;  %6776 = vmatpush1.bf16.msra.mxu1 %v9233_v56  ;;  %v3043_v9 = vpop.f32.mrb[26].mxu0  ;;  %6485 = vmatprep.subr.bf16.mxu0 %v9238_v47 }
 0x458   :  { %v3228_v27 = vpack.c.bf16 %v3043_v9, %v3039_v41  ;;  %v11835_v28 = vpop.f32.mrb[66].mxu1  ;;  %v3045_v48 = vpop.f32.mrb[27].mxu0  ;;  %6777 = vmatprep.subr.bf16.mxu1 %v9241_v58  ;;  %v9256_v58 = vld [vmem:[%s12939_s9 + $0xabc] ss:$28 sps:$4 sm:$0xff]   ;;  %v9259_v41 = vld [vmem:[%s12939_s9 + $0xac4] ss:$28 sps:$4 sm:$0xff]  }
 0x459   :  { %v3230_v49 = vpack.c.bf16 %v11835_v28, %v11816_v57  ;;  %v3229_v55 = vpack.c.bf16 %v3045_v48, %v3041_v22  ;;  %v11842_v26 = vpop.f32.mrb[67].mxu1  ;;  %v9338_v57 = vld [vmem:[%s12939_s9 + $0xdc8] ss:$28 sps:$4 sm:$0xff]   ;;  %v9341_v28 = vld [vmem:[%s12939_s9 + $0xdd0] ss:$28 sps:$4 sm:$0xff]  }
 0x45a   :  { %v3366_v31 = vadd.bf16 %v11819_v62, %v3228_v27  ;;  %v3231_v1 = vpack.c.bf16 %v11842_v26, %v11824_v6  ;;  %6486 = vmatpush1.bf16.msra.mxu0 %v9236_v5  ;;  %v9281_v6 = vld [vmem:[%s12939_s9 + $0xba0] ss:$28 sps:$4 sm:$0xff]  }
 0x45b   :  { %v3367_v15 = vadd.bf16 %v11827_v63, %v3229_v55  ;;  %6778 = vmatpush1.bf16.msra.mxu1 %v9239_v23  ;;  %6487 = vmatprep.subr.bf16.mxu0 %v9244_v38  ;;  %v3289_v23 = vrot.slane %v11274_v40, %v3288_v43  ;;  %v9257_v40 = vld [vmem:[%s12939_s9 + $0xac0] ss:$28 sps:$4 sm:$0xff]  }
 0x45c   :  { %v3398_v17 = vmul.bf16 1045249613, %v3366_v31  ;;  %6779 = vmatprep.subr.bf16.mxu1 %v9247_v4  ;;  %v9254_v4 = vld [vmem:[%s12939_s9 + $0xab8] ss:$28 sps:$4 sm:$0xff]  }
 0x45d   :  { %v3399_v0 = vmul.bf16 1045249613, %v3367_v15  ;;  %v3049_v32 = vpop.f32.mrb[28].mxu0 }
 0x45e   :  { %v11861_v46 = vpop.f32.mrb[68].mxu1  ;;  %v3051_v61 = vpop.f32.mrb[29].mxu0  ;;  %6488 = vmatpush1.bf16.msra.mxu0 %v9242_v53  ;;  %v11873_v54 = vmax.bf16 %v3398_v17, %v3366_v31  ;;  %v9262_v31 = vld [vmem:[%s12939_s9 + $0xaf4] ss:$28 sps:$4 sm:$0xff]   ;;  %v9265_v53 = vld [vmem:[%s12939_s9 + $0xafc] ss:$28 sps:$4 sm:$0xff]  }
 0x45f   :  { %v11863_v37 = vmax.bf16 %v3399_v0, %v3367_v15  ;;  %v11865_v19 = vpop.f32.mrb[69].mxu1  ;;  %6780 = vmatpush1.bf16.msra.mxu1 %v9245_v12  ;;  %v3053_v14 = vpop.f32.mrb[30].mxu0  ;;  %6530 = vmatprep.subr.bf16.mxu0 %v9250_v7  ;;  %v3305_v7 = vpack.c.bf16 %v3289_v23, %v3289_v23 }
 0x460   :  { %v3236_v56 = vpack.c.bf16 %v3053_v14, %v3049_v32  ;;  %v11875_v36 = vpop.f32.mrb[70].mxu1  ;;  %v3055_v47 = vpop.f32.mrb[31].mxu0  ;;  %6822 = vmatprep.subr.bf16.mxu1 %v9253_v3  ;;  %v9263_v14 = vld [vmem:[%s12939_s9 + $0xaf8] ss:$28 sps:$4 sm:$0xff]  }
 0x461   :  { %v3238_v22 = vpack.c.bf16 %v11875_v36, %v11861_v46  ;;  %v3237_v5 = vpack.c.bf16 %v3055_v47, %v3051_v61  ;;  %v11885_v9 = vpop.f32.mrb[71].mxu1  ;;  %6489 = vmatprep.mubr.bf16.mxu0 %v11863_v37  ;;  %6781 = vmatprep.mubr.bf16.mxu1 %v11863_v37  ;;  %v9260_v61 = vld [vmem:[%s12939_s9 + $0xaf0] ss:$28 sps:$4 sm:$0xff]  }
 0x462   :  { %v3374_v38 = vadd.bf16 %v11819_v62, %v3236_v56  ;;  %v3239_v27 = vpack.c.bf16 %v11885_v9, %v11865_v19  ;;  %6490 = vmatmul.mubr.bf16.vlgmr.msra.gmra.mrb[40].mxu0 %v11873_v54  ;;  %6782 = vmatmul.mubr.bf16.vlgmr.msra.gmra.mrb[80].mxu1 %v11873_v54  ;;  %v9347_v19 = vld [vmem:[%s12939_s9 + $0x1d8] ss:$28 sps:$4 sm:$0xff]   ;;  %v9351_v46 = vld [vmem:[%s12939_s9 + $0x4c] ss:$28 sps:$4 sm:$0xff]  }
 0x463   :  { %v3375_v48 = vadd.bf16 %v11827_v63, %v3237_v5  ;;  %6531 = vmatpush1.bf16.msra.mxu0 %v9248_v10  ;;  %6823 = vmatpush1.bf16.msra.mxu1 %v9251_v29  ;;  %v9352_v36 = vld [vmem:[%s12939_s9 + $0x210] ss:$28 sps:$4 sm:$0xff]  }
 0x464   :  { %v3406_v55 = vmul.bf16 1045249613, %v3374_v38  ;;  %6532 = vmatprep.subr.bf16.mxu0 %v9256_v58  ;;  %6824 = vmatprep.subr.bf16.mxu1 %v9259_v41  ;;  %v9268_v58 = vld [vmem:[%s12939_s9 + $0xb2c] ss:$28 sps:$4 sm:$0xff]   ;;  %v9271_v41 = vld [vmem:[%s12939_s9 + $0xb34] ss:$28 sps:$4 sm:$0xff]  }
 0x465   :  { %v3407_v15 = vmul.bf16 1045249613, %v3375_v48  ;;  %v3059_v12 = vpop.f32.mrb[32].mxu0 }
 0x466   :  { %v11908_v17 = vpop.f32.mrb[72].mxu1  ;;  %v3061_v3 = vpop.f32.mrb[33].mxu0  ;;  %v11920_v10 = vmax.bf16 %v3406_v55, %v3374_v38 }
 0x467   :  { %v11910_v0 = vmax.bf16 %v3407_v15, %v3375_v48  ;;  %v11912_v32 = vpop.f32.mrb[73].mxu1  ;;  %6533 = vmatpush1.bf16.msra.mxu0 %v9254_v4  ;;  %6825 = vmatpush1.bf16.msra.mxu1 %v9257_v40  ;;  %v3063_v43 = vpop.f32.mrb[34].mxu0  ;;  %v3356_v48 = vpack.i.b16 %v3305_v7, %v3305_v7  ;;  %v9277_v7 = vld [vmem:[%s12939_s9 + $0xb6c] ss:$28 sps:$4 sm:$0xff]  }
 0x468   :  { %v3244_v29 = vpack.c.bf16 %v3063_v43, %v3059_v12  ;;  %v11922_v56 = vpop.f32.mrb[74].mxu1  ;;  %v3065_v47 = vpop.f32.mrb[35].mxu0  ;;  %6534 = vmatprep.subr.bf16.mxu0 %v9262_v31  ;;  %6826 = vmatprep.subr.bf16.mxu1 %v9265_v53  ;;  %v9266_v31 = vld [vmem:[%s12939_s9 + $0xb28] ss:$28 sps:$4 sm:$0xff]   ;;  %v9269_v53 = vld [vmem:[%s12939_s9 + $0xb30] ss:$28 sps:$4 sm:$0xff]  }
 0x469   :  { %v3245_v23 = vpack.c.bf16 %v3065_v47, %v3061_v3  ;;  %v11932_v38 = vpop.f32.mrb[75].mxu1  ;;  %6499 = vmatprep.mubr.bf16.mxu0 %v11910_v0  ;;  %6791 = vmatprep.mubr.bf16.mxu1 %v11910_v0  ;;  %v9274_v12 = vld [vmem:[%s12939_s9 + $0xb64] ss:$28 sps:$4 sm:$0xff]  }
 0x46a   :  { %v3382_v4 = vadd.bf16 %v11819_v62, %v3244_v29  ;;  %6500 = vmatmul.mubr.bf16.gmra.mrb[44].mxu0 %v11920_v10  ;;  %6792 = vmatmul.mubr.bf16.gmra.mrb[84].mxu1 %v11920_v10 }
 0x46b   :  { %v3383_v55 = vadd.bf16 %v11827_v63, %v3245_v23  ;;  %6535 = vmatpush1.bf16.msra.mxu0 %v9260_v61  ;;  %6827 = vmatpush1.bf16.msra.mxu1 %v9263_v14  ;;  %v11955_v61 = vrot.slane %v3356_v48, %v9894_v35  ;;  %v9272_v23 = vld [vmem:[%s12939_s9 + $0xb60] ss:$28 sps:$4 sm:$0xff]  }
 0x46c   :  { %v3414_v15 = vmul.bf16 1045249613, %v3382_v4  ;;  %6536 = vmatprep.subr.bf16.mxu0 %v9268_v58  ;;  %6828 = vmatprep.subr.bf16.mxu1 %v9271_v41 }
 0x46d   :  { %v3415_v3 = vmul.bf16 1045249613, %v3383_v55  ;;  %v3069_v43 = vpop.f32.mrb[36].mxu0 }
 0x46e   :  { %v11957_v14 = vpop.f32.mrb[76].mxu1  ;;  %v3071_v29 = vpop.f32.mrb[37].mxu0  ;;  %v11969_v48 = vmax.bf16 %v3414_v15, %v3382_v4  ;;  %v3369_v15 = vadd.bf16 %v11955_v61, %v3231_v1 }
 0x46f   :  { %v11959_v47 = vmax.bf16 %v3415_v3, %v3383_v55  ;;  %v11961_v58 = vpop.f32.mrb[77].mxu1  ;;  %6537 = vmatpush1.bf16.msra.mxu0 %v9266_v31  ;;  %6829 = vmatpush1.bf16.msra.mxu1 %v9269_v53  ;;  %v3073_v41 = vpop.f32.mrb[38].mxu0  ;;  %v9280_v31 = vld [vmem:[%s12939_s9 + $0xb9c] ss:$28 sps:$4 sm:$0xff]   ;;  %v9283_v53 = vld [vmem:[%s12939_s9 + $0xba4] ss:$28 sps:$4 sm:$0xff]  }
 0x470   :  { %v3252_v59 = vpack.c.bf16 %v3073_v41, %v3069_v43  ;;  %v11971_v5 = vpop.f32.mrb[78].mxu1  ;;  %v3075_v55 = vpop.f32.mrb[39].mxu0  ;;  %6538 = vmatprep.subr.bf16.mxu0 %v9274_v12  ;;  %6830 = vmatprep.subr.bf16.mxu1 %v9277_v7  ;;  %v3401_v26 = vmul.bf16 1045249613, %v3369_v15  ;;  %v9287_v41 = vld [vmem:[%s12939_s9 + $0xbd8] ss:$28 sps:$4 sm:$0xff]  }
 0x471   :  { %v3254_v3 = vpack.c.bf16 %v11971_v5, %v11957_v14  ;;  %v3253_v40 = vpack.c.bf16 %v3075_v55, %v3071_v29  ;;  %v11981_v4 = vpop.f32.mrb[79].mxu1  ;;  %6509 = vmatprep.mubr.bf16.mxu0 %v11959_v47  ;;  %6801 = vmatprep.mubr.bf16.mxu1 %v11959_v47  ;;  %v9278_v29 = vld [vmem:[%s12939_s9 + $0xb98] ss:$28 sps:$4 sm:$0xff]   ;;  %v9292_v55 = vld [vmem:[%s12939_s9 + $0xc0c] ss:$28 sps:$4 sm:$0xff]  }
 0x472   :  { %v3390_v12 = vadd.bf16 %v11819_v62, %v3252_v59  ;;  %v3255_v7 = vpack.c.bf16 %v11981_v4, %v11961_v58  ;;  %6510 = vmatmul.mubr.bf16.gmra.mrb[48].mxu0 %v11969_v48  ;;  %6802 = vmatmul.mubr.bf16.gmra.mrb[88].mxu1 %v11969_v48  ;;  %v9286_v62 = vld [vmem:[%s12939_s9 + $0xbd4] ss:$28 sps:$4 sm:$0xff]   ;;  %v9363_v4 = vld [vmem:[%s12939_s9 + $0xc0] ss:$28 sps:$4 sm:$0xff]   ;;  %v9371_v5 = vld [vmem:[%s12939_s9 + $0x12c] ss:$28 sps:$4 sm:$0xff]  }
 0x473   :  { %v3391_v43 = vadd.bf16 %v11827_v63, %v3253_v40  ;;  %6539 = vmatpush1.bf16.msra.mxu0 %v9272_v23  ;;  %6831 = vmatpush1.bf16.msra.mxu1 %v9275_v8  ;;  %v9289_v63 = vld [vmem:[%s12939_s9 + $0xbdc] ss:$28 sps:$4 sm:$0xff]   ;;  %v9284_v40 = vld [vmem:[%s12939_s9 + $0xbd0] ss:$28 sps:$4 sm:$0xff]  }
 0x474   :  { %v3422_v59 = vmul.bf16 1045249613, %v3390_v12  ;;  %6540 = vmatprep.subr.bf16.mxu0 %v9280_v31  ;;  %6832 = vmatprep.subr.bf16.mxu1 %v9283_v53  ;;  %v9295_v31 = vld [vmem:[%s12939_s9 + $0xc14] ss:$28 sps:$4 sm:$0xff]   ;;  %v12025_v53 = vmax.bf16 %v3401_v26, %v3369_v15  ;;  %v9298_v15 = vld [vmem:[%s12939_s9 + $0xc44] ss:$28 sps:$4 sm:$0xff]  }
 0x475   :  { %v3423_v8 = vmul.bf16 1045249613, %v3391_v43  ;;  %v9305_v26 = vld [vmem:[%s12939_s9 + $0xc80] ss:$28 sps:$4 sm:$0xff]   ;;  %v9372_v14 = vld [vmem:[%s12939_s9 + $0x2f0] ss:$28 sps:$4 sm:$0xff]  }
 0x476   :  { %v12015_v23 = vmax.bf16 %v3422_v59, %v3390_v12  ;;  %v9290_v12 = vld [vmem:[%s12939_s9 + $0xc08] ss:$28 sps:$4 sm:$0xff]  }
 0x477   :  { %v12007_v1 = vmax.bf16 %v3423_v8, %v3391_v43  ;;  %6541 = vmatpush1.bf16.msra.mxu0 %v9278_v29  ;;  %6833 = vmatpush1.bf16.msra.mxu1 %v9281_v6  ;;  %v9293_v43 = vld [vmem:[%s12939_s9 + $0xc10] ss:$28 sps:$4 sm:$0xff]   ;;  %v9296_v6 = vld [vmem:[%s12939_s9 + $0xc40] ss:$28 sps:$4 sm:$0xff]   ;;  %v9299_v59 = vld [vmem:[%s12939_s9 + $0xc48] ss:$28 sps:$4 sm:$0xff]  }
 0x478   :  { %6542 = vmatprep.subr.bf16.mxu0 %v9286_v62  ;;  %6834 = vmatprep.subr.bf16.mxu1 %v9289_v63  ;;  %v9301_v29 = vld [vmem:[%s12939_s9 + $0xc4c] ss:$28 sps:$4 sm:$0xff]   ;;  %v9304_v62 = vld [vmem:[%s12939_s9 + $0xc7c] ss:$28 sps:$4 sm:$0xff]   ;;  %v9307_v63 = vld [vmem:[%s12939_s9 + $0xc84] ss:$28 sps:$4 sm:$0xff]  }
 0x479   :  { %6519 = vmatprep.mubr.bf16.mxu0 %v12007_v1  ;;  %6811 = vmatprep.mubr.bf16.mxu1 %v12007_v1  ;;  %v9302_v8 = vld [vmem:[%s12939_s9 + $0xc78] ss:$28 sps:$4 sm:$0xff]  }
 0x47a   :  { %6520 = vmatmul.mubr.bf16.gmra.mrb[52].mxu0 %v12015_v23  ;;  %6812 = vmatmul.mubr.bf16.gmra.mrb[92].mxu1 %v12015_v23 }
 0x47b   :  { %6543 = vmatpush1.bf16.msra.mxu0 %v9284_v40  ;;  %6835 = vmatpush1.bf16.msra.mxu1 %v9287_v41  ;;  %v3284_v40 = vsub.s32 6, %v9891_v33  ;;  %v9310_v41 = vld [vmem:[%s12939_s9 + $0xcb4] ss:$28 sps:$4 sm:$0xff]  }
 0x47c   :  { %6562 = vmatprep.mubr.bf16.mxu0 %v12025_v53  ;;  %6854 = vmatprep.mubr.bf16.mxu1 %v12025_v53 }
 0x47d   :  { %6544 = vmatprep.subr.bf16.mxu0 %v9292_v55  ;;  %6836 = vmatprep.subr.bf16.mxu1 %v9295_v31  ;;  %v9313_v55 = vld [vmem:[%s12939_s9 + $0xcbc] ss:$28 sps:$4 sm:$0xff]   ;;  %v9308_v31 = vld [vmem:[%s12939_s9 + $0xcb0] ss:$28 sps:$4 sm:$0xff]  }
 0x47f   :  { %6545 = vmatpush1.bf16.msra.mxu0 %v9290_v12  ;;  %6837 = vmatpush1.bf16.msra.mxu1 %v9293_v43  ;;  %v9311_v12 = vld [vmem:[%s12939_s9 + $0xcb8] ss:$28 sps:$4 sm:$0xff]   ;;  %v9712_v43 = vld [vmem:[%s12938_s8] sm:$0xff] }
 0x480   :  { %6546 = vmatprep.subr.bf16.mxu0 %v9298_v15  ;;  %6838 = vmatprep.subr.bf16.mxu1 %v9301_v29  ;;  %v3285_v15 = vrot.slane %v9712_v43, %v3284_v40  ;;  %v9316_v29 = vld [vmem:[%s12939_s9 + $0xcec] ss:$28 sps:$4 sm:$0xff]   ;;  %v9331_v43 = vld [vmem:[%s12939_s9 + $0xd64] ss:$28 sps:$4 sm:$0xff]  }
 0x483   :  { %6547 = vmatpush1.bf16.msra.mxu0 %v9296_v6  ;;  %6839 = vmatpush1.bf16.msra.mxu1 %v9299_v59  ;;  %v9319_v6 = vld [vmem:[%s12939_s9 + $0xcf4] ss:$28 sps:$4 sm:$0xff]   ;;  %v9314_v59 = vld [vmem:[%s12939_s9 + $0xce8] ss:$28 sps:$4 sm:$0xff]  }
 0x484   :  { %6548 = vmatprep.subr.bf16.mxu0 %v9304_v62  ;;  %6840 = vmatprep.subr.bf16.mxu1 %v9307_v63  ;;  %v9317_v62 = vld [vmem:[%s12939_s9 + $0xcf0] ss:$28 sps:$4 sm:$0xff]   ;;  %v3304_v63 = vpack.c.bf16 %v3285_v15, %v3285_v15  ;;  %v9326_v15 = vld [vmem:[%s12939_s9 + $0xd58] ss:$28 sps:$4 sm:$0xff]  }
 0x487   :  { %6549 = vmatpush1.bf16.msra.mxu0 %v9302_v8  ;;  %6841 = vmatpush1.bf16.msra.mxu1 %v9305_v26  ;;  %v9322_v8 = vld [vmem:[%s12939_s9 + $0xd24] ss:$28 sps:$4 sm:$0xff]   ;;  %v9325_v26 = vld [vmem:[%s12939_s9 + $0xd2c] ss:$28 sps:$4 sm:$0xff]  }
 0x488   :  { %6550 = vmatprep.subr.bf16.mxu0 %v9310_v41  ;;  %6842 = vmatprep.subr.bf16.mxu1 %v9313_v55  ;;  %v9320_v41 = vld [vmem:[%s12939_s9 + $0xd20] ss:$28 sps:$4 sm:$0xff]   ;;  %v9323_v55 = vld [vmem:[%s12939_s9 + $0xd28] ss:$28 sps:$4 sm:$0xff]  }
 0x48b   :  { %6551 = vmatpush1.bf16.msra.mxu0 %v9308_v31  ;;  %6843 = vmatpush1.bf16.msra.mxu1 %v9311_v12  ;;  %v3349_v31 = vpack.i.b16 %v3304_v63, %v3304_v63  ;;  %v9328_v12 = vld [vmem:[%s12939_s9 + $0xd5c] ss:$28 sps:$4 sm:$0xff]   ;;  %v9332_v63 = vld [vmem:[%s12939_s9 + $0xd90] ss:$28 sps:$4 sm:$0xff]  }
 0x48c   :  { %6552 = vmatprep.subr.bf16.mxu0 %v9316_v29  ;;  %6844 = vmatprep.subr.bf16.mxu1 %v9319_v6  ;;  %v9329_v29 = vld [vmem:[%s12939_s9 + $0xd60] ss:$28 sps:$4 sm:$0xff]  }
 0x48d   :  { %v12116_v6 = vrot.slane %v3349_v31, %v9894_v35  ;;  %v3377_v31 = vadd.bf16 %v11955_v61, %v3239_v27 }
 0x48f   :  { %6553 = vmatpush1.bf16.msra.mxu0 %v9314_v59  ;;  %6845 = vmatpush1.bf16.msra.mxu1 %v9317_v62  ;;  %v9334_v59 = vld [vmem:[%s12939_s9 + $0xd94] ss:$28 sps:$4 sm:$0xff]   ;;  %v9337_v62 = vld [vmem:[%s12939_s9 + $0xd9c] ss:$28 sps:$4 sm:$0xff]   ;;  %v3409_v9 = vmul.bf16 1045249613, %v3377_v31 }
 0x490   :  { %6554 = vmatprep.subr.bf16.mxu0 %v9322_v8  ;;  %6846 = vmatprep.subr.bf16.mxu1 %v9325_v26  ;;  %v9335_v8 = vld [vmem:[%s12939_s9 + $0xd98] ss:$28 sps:$4 sm:$0xff]   ;;  %v3368_v26 = vadd.bf16 %v12116_v6, %v3230_v49 }
 0x492   :  { %v3400_v49 = vmul.bf16 1045249613, %v3368_v26 }
 0x493   :  { %6555 = vmatpush1.bf16.msra.mxu0 %v9320_v41  ;;  %6847 = vmatpush1.bf16.msra.mxu1 %v9323_v55  ;;  %v9340_v41 = vld [vmem:[%s12939_s9 + $0xdcc] ss:$28 sps:$4 sm:$0xff]   ;;  %v9343_v55 = vld [vmem:[%s12939_s9 + $0xdd4] ss:$28 sps:$4 sm:$0xff]  }
 0x494   :  { %6556 = vmatprep.subr.bf16.mxu0 %v9328_v12  ;;  %6848 = vmatprep.subr.bf16.mxu1 %v9331_v43  ;;  %v9346_v12 = vld [vmem:[%s12939_s9 + $0x14] ss:$28 sps:$4 sm:$0xff]   ;;  %v12156_v27 = vmax.bf16 %v3400_v49, %v3368_v26  ;;  %v3376_v43 = vadd.bf16 %v12116_v6, %v3238_v22  ;;  %v9356_v26 = vld [vmem:[%s12939_s9 + $0x84] ss:$28 sps:$4 sm:$0xff]  }
 0x495   :  { %v9358_v49 = vld [vmem:[%s12939_s9 + $0x88] ss:$28 sps:$4 sm:$0xff]  }
 0x496   :  { %v3408_v22 = vmul.bf16 1045249613, %v3376_v43 }
 0x497   :  { %6557 = vmatpush1.bf16.msra.mxu0 %v9326_v15  ;;  %6849 = vmatpush1.bf16.msra.mxu1 %v9329_v29  ;;  %v9344_v15 = vld [vmem:[%s12939_s9 + $0x10] ss:$28 sps:$4 sm:$0xff]   ;;  %v9348_v29 = vld [vmem:[%s12939_s9 + $0x18] ss:$28 sps:$4 sm:$0xff]  }
 0x498   :  { %6558 = vmatprep.subr.bf16.mxu0 %v9334_v59  ;;  %6850 = vmatprep.subr.bf16.mxu1 %v9337_v62  ;;  %v12168_v59 = vmax.bf16 %v3409_v9, %v3377_v31  ;;  %v12944_v62 = vpack.c.bf16 %v11932_v38, %v11912_v32  ;;  %v9349_v32 = vld [vmem:[%s12939_s9 + $0x48] ss:$28 sps:$4 sm:$0xff]   ;;  %v9353_v38 = vld [vmem:[%s12939_s9 + $0x50] ss:$28 sps:$4 sm:$0xff]   ;;  %v12945_v31 = vpack.c.bf16 %v11922_v56, %v11908_v17  ;;  %v9361_v17 = vld [vmem:[%s12939_s9 + $0xbc] ss:$28 sps:$4 sm:$0xff]  }
 0x499   :  { %v9362_v56 = vld [vmem:[%s12939_s9 + $0x280] ss:$28 sps:$4 sm:$0xff]   ;;  %v9366_v9 = vld [vmem:[%s12939_s9 + $0xf4] ss:$28 sps:$4 sm:$0xff]  }
 0x49b   :  { %6559 = vmatpush1.bf16.msra.mxu0 %v9332_v63  ;;  %6851 = vmatpush1.bf16.msra.mxu1 %v9335_v8  ;;  %v3385_v63 = vadd.bf16 %v11955_v61, %v12944_v62  ;;  %v9364_v62 = vld [vmem:[%s12939_s9 + $0xf0] ss:$28 sps:$4 sm:$0xff]  }
 0x49c   :  { %6560 = vmatprep.subr.bf16.mxu0 %v9340_v41  ;;  %6852 = vmatprep.subr.bf16.mxu1 %v9343_v55  ;;  %v9357_v41 = vld [vmem:[%s12939_s9 + $0x248] ss:$28 sps:$4 sm:$0xff]   ;;  %v12196_v55 = vmax.bf16 %v3408_v22, %v3376_v43  ;;  %v9367_v43 = vld [vmem:[%s12939_s9 + $0x2b8] ss:$28 sps:$4 sm:$0xff]  }
 0x49d   :  { %v3417_v8 = vmul.bf16 1045249613, %v3385_v63  ;;  %v9376_v22 = vld [vmem:[%s12939_s9 + $0x164] ss:$28 sps:$4 sm:$0xff]  }
 0x49f   :  { %6561 = vmatpush1.bf16.msra.mxu0 %v9338_v57  ;;  %6853 = vmatpush1.bf16.msra.mxu1 %v9341_v28  ;;  %v3384_v57 = vadd.bf16 %v12116_v6, %v12945_v31  ;;  %v9354_v28 = vld [vmem:[%s12939_s9 + $0x80] ss:$28 sps:$4 sm:$0xff]  }
 0x4a0   :  { %6895 = vmatprep.subr.bf16.mxu0 %v9346_v12  ;;  %8384 = vmatprep.subr.bf16.mxu1 %v9347_v19  ;;  %v12208_v12 = vmax.bf16 %v3417_v8, %v3385_v63  ;;  %v3393_v19 = vadd.bf16 %v11955_v61, %v3255_v7  ;;  %v9359_v61 = vld [vmem:[%s12939_s9 + $0xb8] ss:$28 sps:$4 sm:$0xff]   ;;  %v9374_v8 = vld [vmem:[%s12939_s9 + $0x160] ss:$28 sps:$4 sm:$0xff]  }
 0x4a1   :  { %v3416_v58 = vmul.bf16 1045249613, %v3384_v57  ;;  %v9368_v63 = vld [vmem:[%s12939_s9 + $0xf8] ss:$28 sps:$4 sm:$0xff]   ;;  %v9382_v31 = vld [vmem:[%s12939_s9 + $0x360] ss:$28 sps:$4 sm:$0xff]  }
 0x4a2   :  { %6563 = vmatmul.mubr.bf16.vlgmr.msra.gmra.mrb[40].mxu0 %v12156_v27  ;;  %6855 = vmatmul.mubr.bf16.vlgmr.msra.gmra.mrb[80].mxu1 %v12156_v27  ;;  %v3425_v7 = vmul.bf16 1045249613, %v3393_v19 }
 0x4a3   :  { %6572 = vmatprep.mubr.bf16.mxu0 %v12168_v59  ;;  %6864 = vmatprep.mubr.bf16.mxu1 %v12168_v59 }
 0x4a4   :  { %6896 = vmatpush1.bf16.msra.mxu0 %v9344_v15  ;;  %8385 = vmatpush3.bf16.msra.mxu1 %v9348_v29  ;;  %v12236_v15 = vmax.bf16 %v3416_v58, %v3384_v57  ;;  %v3392_v29 = vadd.bf16 %v12116_v6, %v3254_v3  ;;  %v9369_v6 = vld [vmem:[%s12939_s9 + $0x128] ss:$28 sps:$4 sm:$0xff]   ;;  %v9379_v57 = vld [vmem:[%s12939_s9 + $0x198] ss:$28 sps:$4 sm:$0xff]   ;;  %v9392_v58 = vld [vmem:[%s12939_s9 + $0x590] ss:$28 sps:$4 sm:$0xff]  }
 0x4a5   :  { %6897 = vmatprep.subr.bf16.mxu0 %v9351_v46  ;;  %8386 = vmatprep.subr.bf16.mxu1 %v9352_v36  ;;  %v12248_v46 = vmax.bf16 %v3425_v7, %v3393_v19  ;;  %v9373_v36 = vld [vmem:[%s12939_s9 + $0x130] ss:$28 sps:$4 sm:$0xff]   ;;  %v9396_v7 = vld [vmem:[%s12939_s9 + $0x244] ss:$28 sps:$4 sm:$0xff]  }
 0x4a6   :  { %v3424_v3 = vmul.bf16 1045249613, %v3392_v29  ;;  %v9384_v19 = vld [vmem:[%s12939_s9 + $0x1d0] ss:$28 sps:$4 sm:$0xff]  }
 0x4a8   :  { %6898 = vmatpush1.bf16.msra.mxu0 %v9349_v32  ;;  %8387 = vmatpush3.bf16.msra.mxu1 %v9353_v38  ;;  %v9377_v32 = vld [vmem:[%s12939_s9 + $0x328] ss:$28 sps:$4 sm:$0xff]   ;;  %v12272_v38 = vmax.bf16 %v3424_v3, %v3392_v29  ;;  %v9406_v3 = vld [vmem:[%s12939_s9 + $0x2b4] ss:$28 sps:$4 sm:$0xff]  }
 0x4a9   :  { %6899 = vmatprep.subr.bf16.mxu0 %v9356_v26  ;;  %8388 = vmatprep.subr.bf16.mxu1 %v9357_v41  ;;  %v9378_v26 = vld [vmem:[%s12939_s9 + $0x168] ss:$28 sps:$4 sm:$0xff]   ;;  %v9381_v41 = vld [vmem:[%s12939_s9 + $0x19c] ss:$28 sps:$4 sm:$0xff]  }
 0x4aa   :  { %6573 = vmatmul.mubr.bf16.gmra.mrb[44].mxu0 %v12196_v55  ;;  %6865 = vmatmul.mubr.bf16.gmra.mrb[84].mxu1 %v12196_v55  ;;  %v9398_v29 = vld [vmem:[%s12939_s9 + $0x408] ss:$28 sps:$4 sm:$0xff]  }
 0x4ab   :  { %6582 = vmatprep.mubr.bf16.mxu0 %v12208_v12  ;;  %6874 = vmatprep.mubr.bf16.mxu1 %v12208_v12 }
 0x4ac   :  { %6900 = vmatpush1.bf16.msra.mxu0 %v9354_v28  ;;  %8389 = vmatpush3.bf16.msra.mxu1 %v9358_v49  ;;  %v9383_v28 = vld [vmem:[%s12939_s9 + $0x1a0] ss:$28 sps:$4 sm:$0xff]   ;;  %v9386_v49 = vld [vmem:[%s12939_s9 + $0x1d4] ss:$28 sps:$4 sm:$0xff]  }
 0x4ad   :  { %6901 = vmatprep.subr.bf16.mxu0 %v9361_v17  ;;  %8390 = vmatprep.subr.bf16.mxu1 %v9362_v56  ;;  %v9388_v17 = vld [vmem:[%s12939_s9 + $0x398] ss:$28 sps:$4 sm:$0xff]   ;;  %v9391_v56 = vld [vmem:[%s12939_s9 + $0x20c] ss:$28 sps:$4 sm:$0xff]  }
 0x4b0   :  { %6902 = vmatpush1.bf16.msra.mxu0 %v9359_v61  ;;  %8391 = vmatpush3.bf16.msra.mxu1 %v9363_v4  ;;  %v9389_v61 = vld [vmem:[%s12939_s9 + $0x208] ss:$28 sps:$4 sm:$0xff]   ;;  %v9393_v4 = vld [vmem:[%s12939_s9 + $0x3d0] ss:$28 sps:$4 sm:$0xff]  }
 0x4b1   :  { %6903 = vmatprep.subr.bf16.mxu0 %v9366_v9  ;;  %8392 = vmatprep.subr.bf16.mxu1 %v9367_v43  ;;  %v9397_v9 = vld [vmem:[%s12939_s9 + $0x5c8] ss:$28 sps:$4 sm:$0xff]   ;;  %v9394_v43 = vld [vmem:[%s12939_s9 + $0x240] ss:$28 sps:$4 sm:$0xff]  }
 0x4b2   :  { %6583 = vmatmul.mubr.bf16.gmra.mrb[48].mxu0 %v12236_v15  ;;  %6875 = vmatmul.mubr.bf16.gmra.mrb[88].mxu1 %v12236_v15 }
 0x4b3   :  { %6592 = vmatprep.mubr.bf16.mxu0 %v12248_v46  ;;  %6884 = vmatprep.mubr.bf16.mxu1 %v12248_v46 }
 0x4b4   :  { %6904 = vmatpush1.bf16.msra.mxu0 %v9364_v62  ;;  %8393 = vmatpush3.bf16.msra.mxu1 %v9368_v63  ;;  %v9401_v62 = vld [vmem:[%s12939_s9 + $0x27c] ss:$28 sps:$4 sm:$0xff]  }
 0x4b5   :  { %6905 = vmatprep.subr.bf16.mxu0 %v9371_v5  ;;  %8394 = vmatprep.subr.bf16.mxu1 %v9372_v14  ;;  %v9402_v63 = vld [vmem:[%s12939_s9 + $0x600] ss:$28 sps:$4 sm:$0xff]   ;;  %v9399_v5 = vld [vmem:[%s12939_s9 + $0x278] ss:$28 sps:$4 sm:$0xff]  }
 0x4b6   :  { %v9403_v14 = vld [vmem:[%s12939_s9 + $0x440] ss:$28 sps:$4 sm:$0xff]  }
 0x4b8   :  { %6906 = vmatpush1.bf16.msra.mxu0 %v9369_v6  ;;  %8395 = vmatpush3.bf16.msra.mxu1 %v9373_v36  ;;  %v9407_v6 = vld [vmem:[%s12939_s9 + $0x638] ss:$28 sps:$4 sm:$0xff]   ;;  %v9404_v36 = vld [vmem:[%s12939_s9 + $0x2b0] ss:$28 sps:$4 sm:$0xff]  }
 0x4b9   :  { %6907 = vmatprep.subr.bf16.mxu0 %v9376_v22  ;;  %8396 = vmatprep.subr.bf16.mxu1 %v9377_v32  ;;  %v9408_v22 = vld [vmem:[%s12939_s9 + $0x478] ss:$28 sps:$4 sm:$0xff]   ;;  %v9411_v32 = vld [vmem:[%s12939_s9 + $0x2ec] ss:$28 sps:$4 sm:$0xff]  }
 0x4ba   :  { %6593 = vmatmul.mubr.bf16.gmra.mrb[52].mxu0 %v12272_v38  ;;  %6885 = vmatmul.mubr.bf16.gmra.mrb[92].mxu1 %v12272_v38 }
 0x4bb   :  { %6927 = vmatprep.mubr.bf16.mxu0 %v11304_v30  ;;  %7219 = vmatprep.mubr.bf16.mxu1 %v11304_v30  ;;  %v9387_v30 = vld [vmem:[%s12939_s9 + $0x558] ss:$28 sps:$4 sm:$0xff]  }
 0x4bc   :  { %6908 = vmatpush1.bf16.msra.mxu0 %v9374_v8  ;;  %8397 = vmatpush3.bf16.msra.mxu1 %v9378_v26  ;;  %v9412_v8 = vld [vmem:[%s12939_s9 + $0x670] ss:$28 sps:$4 sm:$0xff]   ;;  %v9409_v26 = vld [vmem:[%s12939_s9 + $0x2e8] ss:$28 sps:$4 sm:$0xff]  }
 0x4bd   :  { %6909 = vmatprep.subr.bf16.mxu0 %v9381_v41  ;;  %8398 = vmatprep.subr.bf16.mxu1 %v9382_v31  ;;  %v9413_v41 = vld [vmem:[%s12939_s9 + $0x4b0] ss:$28 sps:$4 sm:$0xff]   ;;  %v9416_v31 = vld [vmem:[%s12939_s9 + $0x324] ss:$28 sps:$4 sm:$0xff]  }
 0x4c0   :  { %6910 = vmatpush1.bf16.msra.mxu0 %v9379_v57  ;;  %8399 = vmatpush3.bf16.msra.mxu1 %v9383_v28  ;;  %v9417_v57 = vld [vmem:[%s12939_s9 + $0x6a8] ss:$28 sps:$4 sm:$0xff]   ;;  %v9414_v28 = vld [vmem:[%s12939_s9 + $0x320] ss:$28 sps:$4 sm:$0xff]  }
 0x4c1   :  { %6911 = vmatprep.subr.bf16.mxu0 %v9386_v49  ;;  %8424 = vmatprep.subr.bf16.mxu1 %v9387_v30  ;;  %v9418_v49 = vld [vmem:[%s12939_s9 + $0x4e8] ss:$28 sps:$4 sm:$0xff]   ;;  %v9421_v30 = vld [vmem:[%s12939_s9 + $0x35c] ss:$28 sps:$4 sm:$0xff]  }
 0x4c3   :  { %7220 = vmatmul.mubr.bf16.vlgmr.msra.gmra.mrb[96].mxu1 %v11314_v13 }
 0x4c4   :  { %6912 = vmatpush1.bf16.msra.mxu0 %v9384_v19  ;;  %7227 = vmatprep.mubr.bf16.mxu1 %v11352_v20  ;;  %v9422_v19 = vld [vmem:[%s12939_s9 + $0x6e0] ss:$28 sps:$4 sm:$0xff]  }
 0x4c5   :  { %8425 = vmatpush3.bf16.msra.mxu1 %v9388_v17  ;;  %6913 = vmatprep.subr.bf16.mxu0 %v9391_v56  ;;  %v9419_v17 = vld [vmem:[%s12939_s9 + $0x358] ss:$28 sps:$4 sm:$0xff]   ;;  %v9423_v56 = vld [vmem:[%s12939_s9 + $0x520] ss:$28 sps:$4 sm:$0xff]  }
 0x4c6   :  { %8426 = vmatprep.subr.bf16.mxu1 %v9392_v58  ;;  %v9426_v58 = vld [vmem:[%s12939_s9 + $0x394] ss:$28 sps:$4 sm:$0xff]  }
 0x4c8   :  { %6914 = vmatpush1.bf16.msra.mxu0 %v9389_v61  ;;  %v9427_v61 = vld [vmem:[%s12939_s9 + $0x8d8] ss:$28 sps:$4 sm:$0xff]  }
 0x4c9   :  { %8427 = vmatpush3.bf16.msra.mxu1 %v9393_v4  ;;  %6915 = vmatprep.subr.bf16.mxu0 %v9396_v7  ;;  %v9424_v4 = vld [vmem:[%s12939_s9 + $0x390] ss:$28 sps:$4 sm:$0xff]   ;;  %v9428_v7 = vld [vmem:[%s12939_s9 + $0x718] ss:$28 sps:$4 sm:$0xff]  }
 0x4ca   :  { %8428 = vmatprep.subr.bf16.mxu1 %v9397_v9  ;;  %v9431_v9 = vld [vmem:[%s12939_s9 + $0x3cc] ss:$28 sps:$4 sm:$0xff]  }
 0x4cb   :  { %7228 = vmatmul.mubr.bf16.gmra.mrb[100].mxu1 %v11362_v44 }
 0x4cc   :  { %6916 = vmatpush1.bf16.msra.mxu0 %v9394_v43  ;;  %7235 = vmatprep.mubr.bf16.mxu1 %v11401_v52  ;;  %v9432_v43 = vld [vmem:[%s12939_s9 + $0x910] ss:$28 sps:$4 sm:$0xff]  }
 0x4cd   :  { %8429 = vmatpush3.bf16.msra.mxu1 %v9398_v29  ;;  %6917 = vmatprep.subr.bf16.mxu0 %v9401_v62  ;;  %v9429_v29 = vld [vmem:[%s12939_s9 + $0x3c8] ss:$28 sps:$4 sm:$0xff]  }
 0x4ce   :  { %8430 = vmatprep.subr.bf16.mxu1 %v9402_v63  ;;  %v9436_v62 = vld [vmem:[%s12939_s9 + $0x404] ss:$28 sps:$4 sm:$0xff]  }
 0x4cf   :  { %v9434_v63 = vld [vmem:[%s12939_s9 + $0x400] ss:$28 sps:$4 sm:$0xff]  }
 0x4d0   :  { %6918 = vmatpush1.bf16.msra.mxu0 %v9399_v5  ;;  %v9438_v5 = vld [vmem:[%s12939_s9 + $0x788] ss:$28 sps:$4 sm:$0xff]  }
 0x4d1   :  { %8431 = vmatpush3.bf16.msra.mxu1 %v9403_v14  ;;  %6919 = vmatprep.subr.bf16.mxu0 %v9406_v3  ;;  %v9441_v14 = vld [vmem:[%s12939_s9 + $0x43c] ss:$28 sps:$4 sm:$0xff]  }
 0x4d2   :  { %8432 = vmatprep.subr.bf16.mxu1 %v9407_v6  ;;  %v9442_v3 = vld [vmem:[%s12939_s9 + $0x980] ss:$28 sps:$4 sm:$0xff]   ;;  %v9439_v6 = vld [vmem:[%s12939_s9 + $0x438] ss:$28 sps:$4 sm:$0xff]  }
 0x4d3   :  { %7236 = vmatmul.mubr.bf16.gmra.mrb[104].mxu1 %v11411_v42 }
 0x4d4   :  { %6920 = vmatpush1.bf16.msra.mxu0 %v9404_v36  ;;  %7243 = vmatprep.mubr.bf16.mxu1 %v11447_v11  ;;  %v9446_v36 = vld [vmem:[%s12939_s9 + $0x474] ss:$28 sps:$4 sm:$0xff]  }
 0x4d5   :  { %8433 = vmatpush3.bf16.msra.mxu1 %v9408_v22  ;;  %6921 = vmatprep.subr.bf16.mxu0 %v9411_v32  ;;  %v9444_v22 = vld [vmem:[%s12939_s9 + $0x470] ss:$28 sps:$4 sm:$0xff]   ;;  %v9448_v32 = vld [vmem:[%s12939_s9 + $0x7f8] ss:$28 sps:$4 sm:$0xff]  }
 0x4d6   :  { %8434 = vmatprep.subr.bf16.mxu1 %v9412_v8  ;;  %v9451_v8 = vld [vmem:[%s12939_s9 + $0x4ac] ss:$28 sps:$4 sm:$0xff]  }
 0x4d8   :  { %6922 = vmatpush1.bf16.msra.mxu0 %v9409_v26  ;;  %v9452_v26 = vld [vmem:[%s12939_s9 + $0x9f0] ss:$28 sps:$4 sm:$0xff]  }
 0x4d9   :  { %8435 = vmatpush3.bf16.msra.mxu1 %v9413_v41  ;;  %6923 = vmatprep.subr.bf16.mxu0 %v9416_v31  ;;  %v9449_v41 = vld [vmem:[%s12939_s9 + $0x4a8] ss:$28 sps:$4 sm:$0xff]  }
 0x4da   :  { %8436 = vmatprep.subr.bf16.mxu1 %v9417_v57  ;;  %v9456_v31 = vld [vmem:[%s12939_s9 + $0x4e4] ss:$28 sps:$4 sm:$0xff]  }
 0x4db   :  { %7244 = vmatmul.mubr.bf16.gmra.mrb[108].mxu1 %v11455_v18  ;;  %v9454_v57 = vld [vmem:[%s12939_s9 + $0x4e0] ss:$28 sps:$4 sm:$0xff]  }
 0x4dc   :  { %6924 = vmatpush1.bf16.msra.mxu0 %v9414_v28  ;;  %7284 = vmatprep.mubr.bf16.mxu1 %v11465_v21  ;;  %v9458_v28 = vld [vmem:[%s12939_s9 + $0x868] ss:$28 sps:$4 sm:$0xff]  }
 0x4dd   :  { %8437 = vmatpush3.bf16.msra.mxu1 %v9418_v49  ;;  %6925 = vmatprep.subr.bf16.mxu0 %v9421_v30  ;;  %v9461_v49 = vld [vmem:[%s12939_s9 + $0x51c] ss:$28 sps:$4 sm:$0xff]  }
 0x4de   :  { %8438 = vmatprep.subr.bf16.mxu1 %v9422_v19  ;;  %v9462_v30 = vld [vmem:[%s12939_s9 + $0xa60] ss:$28 sps:$4 sm:$0xff]   ;;  %v9459_v19 = vld [vmem:[%s12939_s9 + $0x518] ss:$28 sps:$4 sm:$0xff]  }
 0x4e0   :  { %6926 = vmatpush1.bf16.msra.mxu0 %v9419_v17  ;;  %v9466_v17 = vld [vmem:[%s12939_s9 + $0x554] ss:$28 sps:$4 sm:$0xff]  }
 0x4e1   :  { %8439 = vmatpush3.bf16.msra.mxu1 %v9423_v56  ;;  %6968 = vmatprep.subr.bf16.mxu0 %v9426_v58  ;;  %v9464_v56 = vld [vmem:[%s12939_s9 + $0x550] ss:$28 sps:$4 sm:$0xff]   ;;  %v9468_v58 = vld [vmem:[%s12939_s9 + $0xa98] ss:$28 sps:$4 sm:$0xff]  }
 0x4e2   :  { %8464 = vmatprep.subr.bf16.mxu1 %v9427_v61  ;;  %v9471_v61 = vld [vmem:[%s12939_s9 + $0x58c] ss:$28 sps:$4 sm:$0xff]  }
 0x4e3   :  { %6928 = vmatmul.mubr.bf16.vlgmr.msra.gmra.mrb[56].mxu0 %v11314_v13  ;;  %v9433_v13 = vld [vmem:[%s12939_s9 + $0x750] ss:$28 sps:$4 sm:$0xff]  }
 0x4e4   :  { %7285 = vmatmul.mubr.bf16.vlgmr.msra.gmra.mrb[112].mxu1 %v11595_v39  ;;  %6937 = vmatprep.mubr.bf16.mxu0 %v11352_v20  ;;  %v9437_v20 = vld [vmem:[%s12939_s9 + $0x948] ss:$28 sps:$4 sm:$0xff]  }
 0x4e5   :  { %6969 = vmatpush1.bf16.msra.mxu0 %v9424_v4  ;;  %7292 = vmatprep.mubr.bf16.mxu1 %v11604_v2  ;;  %v9472_v4 = vld [vmem:[%s12939_s9 + $0xc90] ss:$28 sps:$4 sm:$0xff]  }
 0x4e6   :  { %8465 = vmatpush3.bf16.msra.mxu1 %v9428_v7  ;;  %6970 = vmatprep.subr.bf16.mxu0 %v9431_v9  ;;  %v9469_v7 = vld [vmem:[%s12939_s9 + $0x588] ss:$28 sps:$4 sm:$0xff]   ;;  %v9473_v9 = vld [vmem:[%s12939_s9 + $0xad0] ss:$28 sps:$4 sm:$0xff]  }
 0x4e7   :  { %8466 = vmatprep.subr.bf16.mxu1 %v9432_v43  ;;  %v9476_v43 = vld [vmem:[%s12939_s9 + $0x5c4] ss:$28 sps:$4 sm:$0xff]  }
 0x4e9   :  { %6971 = vmatpush1.bf16.msra.mxu0 %v9429_v29  ;;  %v9477_v29 = vld [vmem:[%s12939_s9 + $0xcc8] ss:$28 sps:$4 sm:$0xff]  }
 0x4ea   :  { %8467 = vmatpush3.bf16.msra.mxu1 %v9433_v13  ;;  %6972 = vmatprep.subr.bf16.mxu0 %v9436_v62  ;;  %v9474_v13 = vld [vmem:[%s12939_s9 + $0x5c0] ss:$28 sps:$4 sm:$0xff]   ;;  %v9478_v62 = vld [vmem:[%s12939_s9 + $0xb08] ss:$28 sps:$4 sm:$0xff]  }
 0x4eb   :  { %6938 = vmatmul.mubr.bf16.gmra.mrb[60].mxu0 %v11362_v44  ;;  %8468 = vmatprep.subr.bf16.mxu1 %v9437_v20  ;;  %v9443_v44 = vld [vmem:[%s12939_s9 + $0x7c0] ss:$28 sps:$4 sm:$0xff]  }
 0x4ec   :  { %7293 = vmatmul.mubr.bf16.gmra.mrb[116].mxu1 %v11635_v34  ;;  %6947 = vmatprep.mubr.bf16.mxu0 %v11401_v52  ;;  %v9447_v52 = vld [vmem:[%s12939_s9 + $0x9b8] ss:$28 sps:$4 sm:$0xff]  }
 0x4ed   :  { %6973 = vmatpush1.bf16.msra.mxu0 %v9434_v63  ;;  %7300 = vmatprep.mubr.bf16.mxu1 %v11644_v16  ;;  %v9481_v20 = vld [vmem:[%s12939_s9 + $0x5fc] ss:$28 sps:$4 sm:$0xff]  }
 0x4ee   :  { %8469 = vmatpush3.bf16.msra.mxu1 %v9438_v5  ;;  %6974 = vmatprep.subr.bf16.mxu0 %v9441_v14  ;;  %v9482_v63 = vld [vmem:[%s12939_s9 + $0xd00] ss:$28 sps:$4 sm:$0xff]   ;;  %v9479_v5 = vld [vmem:[%s12939_s9 + $0x5f8] ss:$28 sps:$4 sm:$0xff]  }
 0x4ef   :  { %8470 = vmatprep.subr.bf16.mxu1 %v9442_v3  ;;  %v9483_v14 = vld [vmem:[%s12939_s9 + $0xb40] ss:$28 sps:$4 sm:$0xff]   ;;  %v9486_v3 = vld [vmem:[%s12939_s9 + $0x634] ss:$28 sps:$4 sm:$0xff]  }
 0x4f1   :  { %6975 = vmatpush1.bf16.msra.mxu0 %v9439_v6  ;;  %v9487_v6 = vld [vmem:[%s12939_s9 + $0xd38] ss:$28 sps:$4 sm:$0xff]  }
 0x4f2   :  { %8471 = vmatpush3.bf16.msra.mxu1 %v9443_v44  ;;  %6976 = vmatprep.subr.bf16.mxu0 %v9446_v36  ;;  %v9484_v44 = vld [vmem:[%s12939_s9 + $0x630] ss:$28 sps:$4 sm:$0xff]   ;;  %v9488_v36 = vld [vmem:[%s12939_s9 + $0xb78] ss:$28 sps:$4 sm:$0xff]  }
 0x4f3   :  { %6948 = vmatmul.mubr.bf16.gmra.mrb[64].mxu0 %v11411_v42  ;;  %8472 = vmatprep.subr.bf16.mxu1 %v9447_v52  ;;  %v9453_v42 = vld [vmem:[%s12939_s9 + $0x830] ss:$28 sps:$4 sm:$0xff]  }
 0x4f4   :  { %7301 = vmatmul.mubr.bf16.gmra.mrb[120].mxu1 %v11675_v24  ;;  %6957 = vmatprep.mubr.bf16.mxu0 %v11447_v11  ;;  %v9457_v11 = vld [vmem:[%s12939_s9 + $0xa28] ss:$28 sps:$4 sm:$0xff]  }
 0x4f5   :  { %6977 = vmatpush1.bf16.msra.mxu0 %v9444_v22  ;;  %7308 = vmatprep.mubr.bf16.mxu1 %v11684_v25  ;;  %v9491_v52 = vld [vmem:[%s12939_s9 + $0x66c] ss:$28 sps:$4 sm:$0xff]  }
 0x4f6   :  { %8473 = vmatpush3.bf16.msra.mxu1 %v9448_v32  ;;  %6978 = vmatprep.subr.bf16.mxu0 %v9451_v8  ;;  %v9492_v22 = vld [vmem:[%s12939_s9 + $0xd70] ss:$28 sps:$4 sm:$0xff]   ;;  %v9489_v32 = vld [vmem:[%s12939_s9 + $0x668] ss:$28 sps:$4 sm:$0xff]  }
 0x4f7   :  { %8474 = vmatprep.subr.bf16.mxu1 %v9452_v26  ;;  %v9493_v8 = vld [vmem:[%s12939_s9 + $0xbb0] ss:$28 sps:$4 sm:$0xff]   ;;  %v9496_v26 = vld [vmem:[%s12939_s9 + $0x6a4] ss:$28 sps:$4 sm:$0xff]  }
 0x4f9   :  { %6979 = vmatpush1.bf16.msra.mxu0 %v9449_v41  ;;  %v9497_v41 = vld [vmem:[%s12939_s9 + $0xda8] ss:$28 sps:$4 sm:$0xff]  }
 0x4fa   :  { %8475 = vmatpush3.bf16.msra.mxu1 %v9453_v42  ;;  %6980 = vmatprep.subr.bf16.mxu0 %v9456_v31  ;;  %v9494_v42 = vld [vmem:[%s12939_s9 + $0x6a0] ss:$28 sps:$4 sm:$0xff]   ;;  %v9498_v31 = vld [vmem:[%s12939_s9 + $0xbe8] ss:$28 sps:$4 sm:$0xff]  }
 0x4fb   :  { %6958 = vmatmul.mubr.bf16.gmra.mrb[68].mxu0 %v11455_v18  ;;  %8476 = vmatprep.subr.bf16.mxu1 %v9457_v11  ;;  %v9463_v18 = vld [vmem:[%s12939_s9 + $0x8a0] ss:$28 sps:$4 sm:$0xff]  }
 0x4fc   :  { %7309 = vmatmul.mubr.bf16.gmra.mrb[124].mxu1 %v11711_v60  ;;  %7000 = vmatprep.mubr.bf16.mxu0 %v11465_v21  ;;  %v9467_v21 = vld [vmem:[%s12939_s9 + $0xc58] ss:$28 sps:$4 sm:$0xff]  }
 0x4fd   :  { %6981 = vmatpush1.bf16.msra.mxu0 %v9454_v57  ;;  %7349 = vmatprep.mubr.bf16.mxu1 %v11863_v37  ;;  %v9501_v11 = vld [vmem:[%s12939_s9 + $0x6dc] ss:$28 sps:$4 sm:$0xff]  }
 0x4fe   :  { %8477 = vmatpush3.bf16.msra.mxu1 %v9458_v28  ;;  %6982 = vmatprep.subr.bf16.mxu0 %v9461_v49  ;;  %v9502_v57 = vld [vmem:[%s12939_s9 + $0xde0] ss:$28 sps:$4 sm:$0xff]   ;;  %v9499_v28 = vld [vmem:[%s12939_s9 + $0x6d8] ss:$28 sps:$4 sm:$0xff]  }
 0x4ff   :  { %8478 = vmatprep.subr.bf16.mxu1 %v9462_v30  ;;  %v9503_v49 = vld [vmem:[%s12939_s9 + $0xc20] ss:$28 sps:$4 sm:$0xff]   ;;  %v9506_v30 = vld [vmem:[%s12939_s9 + $0x714] ss:$28 sps:$4 sm:$0xff]  }
 0x501   :  { %6983 = vmatpush1.bf16.msra.mxu0 %v9459_v19  ;;  %v9504_v19 = vld [vmem:[%s12939_s9 + $0x710] ss:$28 sps:$4 sm:$0xff]  }
 0x502   :  { %8479 = vmatpush3.bf16.msra.mxu1 %v9463_v18  ;;  %6984 = vmatprep.subr.bf16.mxu0 %v9466_v17  ;;  %v9509_v18 = vld [vmem:[%s12939_s9 + $0x74c] ss:$28 sps:$4 sm:$0xff]  }
 0x503   :  { %8504 = vmatprep.subr.bf16.mxu1 %v9467_v21  ;;  %v9507_v17 = vld [vmem:[%s12939_s9 + $0x748] ss:$28 sps:$4 sm:$0xff]  }
 0x504   :  { %v9512_v21 = vld [vmem:[%s12939_s9 + $0x784] ss:$28 sps:$4 sm:$0xff]  }
 0x505   :  { %7350 = vmatmul.mubr.bf16.vlgmr.msra.gmra.mrb[128].mxu1 %v11873_v54  ;;  %6985 = vmatpush1.bf16.msra.mxu0 %v9464_v56  ;;  %v9513_v56 = vld [vmem:[%s12939_s9 + $0x7b8] ss:$28 sps:$4 sm:$0xff]  }
 0x506   :  { %7357 = vmatprep.mubr.bf16.mxu1 %v11910_v0  ;;  %8505 = vmatpush3.bf16.msra.mxu1 %v9468_v58  ;;  %v9518_v58 = vld [vmem:[%s12939_s9 + $0x7f4] ss:$28 sps:$4 sm:$0xff]  }
 0x507   :  { %6986 = vmatprep.subr.bf16.mxu0 %v9471_v61  ;;  %8506 = vmatprep.subr.bf16.mxu1 %v9472_v4  ;;  %v9519_v61 = vld [vmem:[%s12939_s9 + $0x828] ss:$28 sps:$4 sm:$0xff]  }
 0x508   :  { %v9524_v4 = vld [vmem:[%s12939_s9 + $0x864] ss:$28 sps:$4 sm:$0xff]  }
 0x509   :  { %6987 = vmatpush1.bf16.msra.mxu0 %v9469_v7  ;;  %v9525_v7 = vld [vmem:[%s12939_s9 + $0x898] ss:$28 sps:$4 sm:$0xff]  }
 0x50a   :  { %8507 = vmatpush3.bf16.msra.mxu1 %v9473_v9  ;;  %6988 = vmatprep.subr.bf16.mxu0 %v9476_v43  ;;  %v9530_v9 = vld [vmem:[%s12939_s9 + $0x8d4] ss:$28 sps:$4 sm:$0xff]  }
 0x50b   :  { %8508 = vmatprep.subr.bf16.mxu1 %v9477_v29  ;;  %v9528_v43 = vld [vmem:[%s12939_s9 + $0x8d0] ss:$28 sps:$4 sm:$0xff]   ;;  %v9536_v29 = vld [vmem:[%s12939_s9 + $0x944] ss:$28 sps:$4 sm:$0xff]  }
 0x50d   :  { %7358 = vmatmul.mubr.bf16.gmra.mrb[132].mxu1 %v11920_v10  ;;  %6989 = vmatpush1.bf16.msra.mxu0 %v9474_v13  ;;  %v9534_v13 = vld [vmem:[%s12939_s9 + $0x940] ss:$28 sps:$4 sm:$0xff]  }
 0x50e   :  { %7365 = vmatprep.mubr.bf16.mxu1 %v11959_v47  ;;  %8509 = vmatpush3.bf16.msra.mxu1 %v9478_v62  ;;  %v9539_v62 = vld [vmem:[%s12939_s9 + $0x97c] ss:$28 sps:$4 sm:$0xff]  }
 0x50f   :  { %6990 = vmatprep.subr.bf16.mxu0 %v9481_v20  ;;  %8510 = vmatprep.subr.bf16.mxu1 %v9482_v63  ;;  %v9537_v20 = vld [vmem:[%s12939_s9 + $0x978] ss:$28 sps:$4 sm:$0xff]  }
 0x510   :  { %v9542_v63 = vld [vmem:[%s12939_s9 + $0x9b4] ss:$28 sps:$4 sm:$0xff]  }
 0x511   :  { %6991 = vmatpush1.bf16.msra.mxu0 %v9479_v5  ;;  %v9540_v5 = vld [vmem:[%s12939_s9 + $0x9b0] ss:$28 sps:$4 sm:$0xff]  }
 0x512   :  { %8511 = vmatpush3.bf16.msra.mxu1 %v9483_v14  ;;  %6992 = vmatprep.subr.bf16.mxu0 %v9486_v3  ;;  %v9545_v14 = vld [vmem:[%s12939_s9 + $0x9ec] ss:$28 sps:$4 sm:$0xff]  }
 0x513   :  { %8512 = vmatprep.subr.bf16.mxu1 %v9487_v6  ;;  %v9543_v3 = vld [vmem:[%s12939_s9 + $0x9e8] ss:$28 sps:$4 sm:$0xff]  }
 0x514   :  { %v9548_v6 = vld [vmem:[%s12939_s9 + $0xa24] ss:$28 sps:$4 sm:$0xff]  }
 0x515   :  { %7366 = vmatmul.mubr.bf16.gmra.mrb[136].mxu1 %v11969_v48  ;;  %6993 = vmatpush1.bf16.msra.mxu0 %v9484_v44  ;;  %v9546_v44 = vld [vmem:[%s12939_s9 + $0xa20] ss:$28 sps:$4 sm:$0xff]  }
 0x516   :  { %7373 = vmatprep.mubr.bf16.mxu1 %v12007_v1  ;;  %8513 = vmatpush3.bf16.msra.mxu1 %v9488_v36  ;;  %v9551_v36 = vld [vmem:[%s12939_s9 + $0xa5c] ss:$28 sps:$4 sm:$0xff]  }
 0x517   :  { %6994 = vmatprep.subr.bf16.mxu0 %v9491_v52  ;;  %8514 = vmatprep.subr.bf16.mxu1 %v9492_v22  ;;  %v9549_v52 = vld [vmem:[%s12939_s9 + $0xa58] ss:$28 sps:$4 sm:$0xff]  }
 0x518   :  { %v9554_v22 = vld [vmem:[%s12939_s9 + $0xa94] ss:$28 sps:$4 sm:$0xff]  }
 0x519   :  { %6995 = vmatpush1.bf16.msra.mxu0 %v9489_v32  ;;  %v9552_v32 = vld [vmem:[%s12939_s9 + $0xa90] ss:$28 sps:$4 sm:$0xff]  }
 0x51a   :  { %8515 = vmatpush3.bf16.msra.mxu1 %v9493_v8  ;;  %6996 = vmatprep.subr.bf16.mxu0 %v9496_v26  ;;  %v9557_v8 = vld [vmem:[%s12939_s9 + $0xacc] ss:$28 sps:$4 sm:$0xff]  }
 0x51b   :  { %8516 = vmatprep.subr.bf16.mxu1 %v9497_v41  ;;  %v9555_v26 = vld [vmem:[%s12939_s9 + $0xac8] ss:$28 sps:$4 sm:$0xff]  }
 0x51c   :  { %v9560_v41 = vld [vmem:[%s12939_s9 + $0xb04] ss:$28 sps:$4 sm:$0xff]  }
 0x51d   :  { %7374 = vmatmul.mubr.bf16.gmra.mrb[140].mxu1 %v12015_v23  ;;  %6997 = vmatpush1.bf16.msra.mxu0 %v9494_v42  ;;  %v9558_v42 = vld [vmem:[%s12939_s9 + $0xb00] ss:$28 sps:$4 sm:$0xff]  }
 0x51e   :  { %8517 = vmatpush3.bf16.msra.mxu1 %v9498_v31  ;;  %7414 = vmatprep.mubr.bf16.mxu1 %v12025_v53  ;;  %v12758_v31 = vld [vmem:[%s12940_s10] sm:$0x7f] }
 0x51f   :  { %6998 = vmatprep.subr.bf16.mxu0 %v9501_v11  ;;  %8518 = vmatprep.subr.bf16.mxu1 %v9502_v57  ;;  %v9566_v11 = vld [vmem:[%s12939_s9 + $0xb74] ss:$28 sps:$4 sm:$0xff]   ;;  %v12772_v57 = vrot.slane %v12758_v31, %v9894_v35 }
 0x521   :  { %6999 = vmatpush1.bf16.msra.mxu0 %v9499_v28  ;;  %v12776_v28 = vrot.slane %v12758_v31, %v10027_v50 }
 0x522   :  { %8519 = vmatpush3.bf16.msra.mxu1 %v9503_v49  ;;  %7041 = vmatprep.subr.bf16.mxu0 %v9506_v30  ;;  %v12780_v49 = vrot.slane %v12758_v31, %v10557_v51  ;;  %v9567_v51 = vld [vmem:[%s12939_s9 + $0xba8] ss:$28 sps:$4 sm:$0xff]  }
 0x524   :  { %7001 = vmatmul.mubr.bf16.vlgmr.msra.gmra.mrb[56].mxu0 %v11595_v39  ;;  %v9510_v39 = vld [vmem:[%s12939_s9 + $0x780] ss:$28 sps:$4 sm:$0xff]  }
 0x525   :  { %7415 = vmatmul.mubr.bf16.vlgmr.msra.gmra.mrb[144].mxu1 %v12156_v27  ;;  %7010 = vmatprep.mubr.bf16.mxu0 %v11604_v2  ;;  %v9515_v2 = vld [vmem:[%s12939_s9 + $0x7bc] ss:$28 sps:$4 sm:$0xff]  }
 0x526   :  { %7042 = vmatpush1.bf16.msra.mxu0 %v9504_v19  ;;  %7422 = vmatprep.mubr.bf16.mxu1 %v12168_v59 }
 0x527   :  { %7043 = vmatprep.subr.bf16.mxu0 %v9509_v18 }
 0x52a   :  { %7044 = vmatpush1.bf16.msra.mxu0 %v9507_v17 }
 0x52b   :  { %7045 = vmatprep.subr.bf16.mxu0 %v9512_v21 }
 0x52c   :  { %7011 = vmatmul.mubr.bf16.gmra.mrb[60].mxu0 %v11635_v34  ;;  %v9516_v34 = vld [vmem:[%s12939_s9 + $0x7f0] ss:$28 sps:$4 sm:$0xff]  }
 0x52d   :  { %7423 = vmatmul.mubr.bf16.gmra.mrb[148].mxu1 %v12196_v55  ;;  %7020 = vmatprep.mubr.bf16.mxu0 %v11644_v16  ;;  %v9521_v16 = vld [vmem:[%s12939_s9 + $0x82c] ss:$28 sps:$4 sm:$0xff]  }
 0x52e   :  { %7046 = vmatpush1.bf16.msra.mxu0 %v9510_v39  ;;  %7430 = vmatprep.mubr.bf16.mxu1 %v12208_v12 }
 0x52f   :  { %7047 = vmatprep.subr.bf16.mxu0 %v9515_v2 }
 0x532   :  { %7048 = vmatpush1.bf16.msra.mxu0 %v9513_v56 }
 0x533   :  { %7049 = vmatprep.subr.bf16.mxu0 %v9518_v58 }
 0x534   :  { %7021 = vmatmul.mubr.bf16.gmra.mrb[64].mxu0 %v11675_v24  ;;  %v9522_v24 = vld [vmem:[%s12939_s9 + $0x860] ss:$28 sps:$4 sm:$0xff]  }
 0x535   :  { %7431 = vmatmul.mubr.bf16.gmra.mrb[152].mxu1 %v12236_v15  ;;  %7030 = vmatprep.mubr.bf16.mxu0 %v11684_v25  ;;  %v9527_v25 = vld [vmem:[%s12939_s9 + $0x89c] ss:$28 sps:$4 sm:$0xff]  }
 0x536   :  { %7050 = vmatpush1.bf16.msra.mxu0 %v9516_v34  ;;  %7438 = vmatprep.mubr.bf16.mxu1 %v12248_v46 }
 0x537   :  { %7051 = vmatprep.subr.bf16.mxu0 %v9521_v16 }
 0x53a   :  { %7052 = vmatpush1.bf16.msra.mxu0 %v9519_v61 }
 0x53b   :  { %7053 = vmatprep.subr.bf16.mxu0 %v9524_v4  ;;  %v9570_v4 = vld [vmem:[%s12939_s9 + $0xbe0] ss:$28 sps:$4 sm:$0xff]  }
 0x53c   :  { %7031 = vmatmul.mubr.bf16.gmra.mrb[68].mxu0 %v11711_v60  ;;  %v9533_v60 = vld [vmem:[%s12939_s9 + $0x90c] ss:$28 sps:$4 sm:$0xff]  }
 0x53d   :  { %7439 = vmatmul.mubr.bf16.gmra.mrb[156].mxu1 %v12272_v38  ;;  %7073 = vmatprep.mubr.bf16.mxu0 %v11863_v37  ;;  %v9531_v37 = vld [vmem:[%s12939_s9 + $0x908] ss:$28 sps:$4 sm:$0xff]  }
 0x53e   :  { %7054 = vmatpush1.bf16.msra.mxu0 %v9522_v24 }
 0x53f   :  { %7055 = vmatprep.subr.bf16.mxu0 %v9527_v25  ;;  %v9575_v25 = vld [vmem:[%s12939_s9 + $0xc1c] ss:$28 sps:$4 sm:$0xff]  }
 0x542   :  { %7056 = vmatpush1.bf16.msra.mxu0 %v9525_v7 }
 0x543   :  { %7057 = vmatprep.subr.bf16.mxu0 %v9530_v9 }
 0x546   :  { %7058 = vmatpush1.bf16.msra.mxu0 %v9528_v43 }
 0x547   :  { %7059 = vmatprep.subr.bf16.mxu0 %v9533_v60 }
 0x54a   :  { %7060 = vmatpush1.bf16.msra.mxu0 %v9531_v37 }
 0x54b   :  { %7061 = vmatprep.subr.bf16.mxu0 %v9536_v29 }
 0x54e   :  { %7062 = vmatpush1.bf16.msra.mxu0 %v9534_v13  ;;  %v9573_v13 = vld [vmem:[%s12939_s9 + $0xc18] ss:$28 sps:$4 sm:$0xff]  }
 0x54f   :  { %7063 = vmatprep.subr.bf16.mxu0 %v9539_v62 }
 0x552   :  { %7064 = vmatpush1.bf16.msra.mxu0 %v9537_v20 }
 0x553   :  { %7065 = vmatprep.subr.bf16.mxu0 %v9542_v63 }
 0x556   :  { %7066 = vmatpush1.bf16.msra.mxu0 %v9540_v5 }
 0x557   :  { %7067 = vmatprep.subr.bf16.mxu0 %v9545_v14 }
 0x55a   :  { %7068 = vmatpush1.bf16.msra.mxu0 %v9543_v3 }
 0x55b   :  { %7069 = vmatprep.subr.bf16.mxu0 %v9548_v6 }
 0x55e   :  { %7070 = vmatpush1.bf16.msra.mxu0 %v9546_v44 }
 0x55f   :  { %7071 = vmatprep.subr.bf16.mxu0 %v9551_v36 }
 0x562   :  { %7072 = vmatpush1.bf16.msra.mxu0 %v9549_v52  ;;  %v9576_v52 = vld [vmem:[%s12939_s9 + $0xc50] ss:$28 sps:$4 sm:$0xff]  }
 0x563   :  { %7114 = vmatprep.subr.bf16.mxu0 %v9554_v22 }
 0x565   :  { %7074 = vmatmul.mubr.bf16.vlgmr.msra.gmra.mrb[56].mxu0 %v11873_v54  ;;  %v9563_v54 = vld [vmem:[%s12939_s9 + $0xb3c] ss:$28 sps:$4 sm:$0xff]  }
 0x566   :  { %7083 = vmatprep.mubr.bf16.mxu0 %v11910_v0  ;;  %7115 = vmatpush1.bf16.msra.mxu0 %v9552_v32  ;;  %v9561_v0 = vld [vmem:[%s12939_s9 + $0xb38] ss:$28 sps:$4 sm:$0xff]  }
 0x567   :  { %7116 = vmatprep.subr.bf16.mxu0 %v9557_v8  ;;  %v9581_v8 = vld [vmem:[%s12939_s9 + $0xc8c] ss:$28 sps:$4 sm:$0xff]  }
 0x56a   :  { %7117 = vmatpush1.bf16.msra.mxu0 %v9555_v26 }
 0x56b   :  { %7118 = vmatprep.subr.bf16.mxu0 %v9560_v41 }
 0x56d   :  { %7084 = vmatmul.mubr.bf16.gmra.mrb[60].mxu0 %v11920_v10  ;;  %v12765_v10 = vrot.slane %v12758_v31, %v10554_v45  ;;  %v9569_v45 = vld [vmem:[%s12939_s9 + $0xbac] ss:$28 sps:$4 sm:$0xff]  }
 0x56e   :  { %7093 = vmatprep.mubr.bf16.mxu0 %v11959_v47  ;;  %7119 = vmatpush1.bf16.msra.mxu0 %v9558_v42  ;;  %v9564_v47 = vld [vmem:[%s12939_s9 + $0xb70] ss:$28 sps:$4 sm:$0xff]  }
 0x56f   :  { %7120 = vmatprep.subr.bf16.mxu0 %v9563_v54 }
 0x572   :  { %7121 = vmatpush1.bf16.msra.mxu0 %v9561_v0 }
 0x573   :  { %7122 = vmatprep.subr.bf16.mxu0 %v9566_v11 }
 0x575   :  { %7094 = vmatmul.mubr.bf16.gmra.mrb[64].mxu0 %v11969_v48  ;;  %v6564_v30 = vpop.f32.mrb[40].mxu0  ;;  %v6856_v19 = vpop.f32.mrb[80].mxu1 }
 0x576   :  { %7103 = vmatprep.mubr.bf16.mxu0 %v12007_v1  ;;  %7123 = vmatpush1.bf16.msra.mxu0 %v9564_v47  ;;  %v8568_v35 = vadd.f32 %v6564_v30, %v12772_v57  ;;  %v8584_v50 = vadd.f32 %v6856_v19, %v12765_v10  ;;  %v6566_v18 = vpop.f32.mrb[41].mxu0  ;;  %v6858_v17 = vpop.f32.mrb[81].mxu1  ;;  %v9572_v1 = vld [vmem:[%s12939_s9 + $0xbe4] ss:$28 sps:$4 sm:$0xff]  }
 0x577   :  { %v8569_v21 = vadd.f32 %v6566_v18, %v12776_v28  ;;  %v8585_v39 = vadd.f32 %v6858_v17, %v12780_v49  ;;  %7124 = vmatprep.subr.bf16.mxu0 %v9569_v45  ;;  %v6568_v48 = vpop.f32.mrb[42].mxu0  ;;  %v6860_v2 = vpop.f32.mrb[82].mxu1  ;;  %v9579_v19 = vld [vmem:[%s12939_s9 + $0xc88] ss:$28 sps:$4 sm:$0xff]  }
 0x578   :  { %9600 = vtanh.f32 %v8568_v35  ;;  %v8570_v56 = vadd.f32 %v6568_v48, %v12772_v57  ;;  %v6570_v58 = vpop.f32.mrb[43].mxu0  ;;  %v6862_v34 = vpop.f32.mrb[83].mxu1  ;;  %v8586_v16 = vadd.f32 %v6860_v2, %v12765_v10 }
 0x579   :  { %9602 = vtanh.f32 %v8584_v50  ;;  %v8571_v61 = vadd.f32 %v6570_v58, %v12776_v28  ;;  %v8587_v24 = vadd.f32 %v6862_v34, %v12780_v49 }
 0x57a   :  { %9604 = vtanh.f32 %v8569_v21  ;;  %7125 = vmatpush1.bf16.msra.mxu0 %v9567_v51  ;;  %v9584_v21 = vld [vmem:[%s12939_s9 + $0xcc4] ss:$28 sps:$4 sm:$0xff]  }
 0x57b   :  { %9606 = vtanh.f32 %v8585_v39  ;;  %7126 = vmatprep.subr.bf16.mxu0 %v9572_v1 }
 0x57c   :  { %9608 = vtanh.f32 %v8570_v56 }
 0x57d   :  { %9610 = vtanh.f32 %v8586_v16  ;;  %7104 = vmatmul.mubr.bf16.gmra.mrb[68].mxu0 %v12015_v23  ;;  %v6574_v7 = vpop.f32.mrb[44].mxu0  ;;  %v6866_v9 = vpop.f32.mrb[84].mxu1 }
 0x57e   :  { %9612 = vtanh.f32 %v8571_v61  ;;  %7127 = vmatpush1.bf16.msra.mxu0 %v9570_v4  ;;  %7146 = vmatprep.mubr.bf16.mxu0 %v12025_v53  ;;  %v8572_v43 = vadd.f32 %v6574_v7, %v12772_v57  ;;  %v8588_v60 = vadd.f32 %v6866_v9, %v12765_v10  ;;  %v6576_v37 = vpop.f32.mrb[45].mxu0  ;;  %v6868_v29 = vpop.f32.mrb[85].mxu1  ;;  %v9578_v53 = vld [vmem:[%s12939_s9 + $0xc54] ss:$28 sps:$4 sm:$0xff]   ;;  %v9582_v61 = vld [vmem:[%s12939_s9 + $0xcc0] ss:$28 sps:$4 sm:$0xff]  }
 0x57f   :  { %9614 = vtanh.f32 %v8587_v24  ;;  %v8573_v62 = vadd.f32 %v6576_v37, %v12776_v28  ;;  %v8589_v23 = vadd.f32 %v6868_v29, %v12780_v49  ;;  %7128 = vmatprep.subr.bf16.mxu0 %v9575_v25  ;;  %v6578_v20 = vpop.f32.mrb[46].mxu0  ;;  %v6870_v63 = vpop.f32.mrb[86].mxu1  ;;  %v9587_v25 = vld [vmem:[%s12939_s9 + $0xcfc] ss:$28 sps:$4 sm:$0xff]  }
 0x580   :  { %9616 = vtanh.f32 %v8572_v43  ;;  %v8574_v5 = vadd.f32 %v6578_v20, %v12772_v57  ;;  %v6580_v14 = vpop.f32.mrb[47].mxu0  ;;  %v6872_v3 = vpop.f32.mrb[87].mxu1  ;;  %v8590_v6 = vadd.f32 %v6870_v63, %v12765_v10  ;;  %v9585_v20 = vld [vmem:[%s12939_s9 + $0xcf8] ss:$28 sps:$4 sm:$0xff]  }
 0x581   :  { %9618 = vtanh.f32 %v8588_v60  ;;  %v8575_v36 = vadd.f32 %v6580_v14, %v12776_v28  ;;  %v8591_v32 = vadd.f32 %v6872_v3, %v12780_v49 }
 0x582   :  { %v9601_v44 = vpop.eup %9600  ;;  %9620 = vtanh.f32 %v8573_v62  ;;  %7129 = vmatpush1.bf16.msra.mxu0 %v9573_v13 }
 0x583   :  { %v9603_v22 = vpop.eup %9602  ;;  %7503 = vst [vmem:[#allocation2] sm:$0xff] %v9601_v44  ;;  %9622 = vtanh.f32 %v8589_v23  ;;  %7130 = vmatprep.subr.bf16.mxu0 %v9578_v53 }
 0x584   :  { %v9605_v26 = vpop.eup %9604  ;;  %7505 = vst [vmem:[#allocation2 + $0x10] sm:$0xff] %v9603_v22  ;;  %9624 = vtanh.f32 %v8574_v5 }
 0x585   :  { %v9607_v41 = vpop.eup %9606  ;;  %7504 = vst [vmem:[#allocation2 + $0x8] sm:$0xff] %v9605_v26  ;;  %9626 = vtanh.f32 %v8590_v6  ;;  %v6584_v42 = vpop.f32.mrb[48].mxu0  ;;  %v9590_v6 = vld [vmem:[%s12939_s9 + $0xd34] ss:$28 sps:$4 sm:$0xff]  }
 0x586   :  { %v6876_v54 = vpop.f32.mrb[88].mxu1  ;;  %v9609_v0 = vpop.eup %9608  ;;  %7506 = vst [vmem:[#allocation2 + $0x18] sm:$0xff] %v9607_v41  ;;  %9628 = vtanh.f32 %v8575_v36  ;;  %7131 = vmatpush1.bf16.msra.mxu0 %v9576_v52  ;;  %v8576_v11 = vadd.f32 %v6584_v42, %v12772_v57  ;;  %v9588_v42 = vld [vmem:[%s12939_s9 + $0xd30] ss:$28 sps:$4 sm:$0xff]  }
 0x587   :  { %v8592_v47 = vadd.f32 %v6876_v54, %v12765_v10  ;;  %v6586_v45 = vpop.f32.mrb[49].mxu0  ;;  %v6878_v30 = vpop.f32.mrb[89].mxu1  ;;  %7511 = vst [vmem:[#allocation2 + $0x38] sm:$0xff] %v9609_v0  ;;  %9630 = vtanh.f32 %v8591_v32  ;;  %7132 = vmatprep.subr.bf16.mxu0 %v9581_v8 }
 0x588   :  { %v9611_v35 = vpop.eup %9610  ;;  %v8577_v50 = vadd.f32 %v6586_v45, %v12776_v28  ;;  %v8593_v18 = vadd.f32 %v6878_v30, %v12780_v49  ;;  %v6588_v17 = vpop.f32.mrb[50].mxu0  ;;  %9632 = vtanh.f32 %v8576_v11  ;;  %v9591_v45 = vld [vmem:[%s12939_s9 + $0xd68] ss:$28 sps:$4 sm:$0xff]  }
 0x589   :  { %v6880_v51 = vpop.f32.mrb[90].mxu1  ;;  %v9613_v39 = vpop.eup %9612  ;;  %7513 = vst [vmem:[#allocation2 + $0x48] sm:$0xff] %v9611_v35  ;;  %v8578_v48 = vadd.f32 %v6588_v17, %v12772_v57  ;;  %9634 = vtanh.f32 %v8592_v47  ;;  %v12872_v47 = vrot.slane %v12758_v31, %v3284_v40  ;;  %v9596_v35 = vld [vmem:[%s12939_s9 + $0xda4] ss:$28 sps:$4 sm:$0xff]  }
 0x58a   :  { %v6590_v2 = vpop.f32.mrb[51].mxu0  ;;  %v6882_v1 = vpop.f32.mrb[91].mxu1  ;;  %7512 = vst [vmem:[#allocation2 + $0x40] sm:$0xff] %v9613_v39  ;;  %v8594_v58 = vadd.f32 %v6880_v51, %v12765_v10  ;;  %9636 = vtanh.f32 %v8577_v50  ;;  %7133 = vmatpush1.bf16.msra.mxu0 %v9579_v19 }
 0x58b   :  { %v9615_v56 = vpop.eup %9614  ;;  %v8579_v16 = vadd.f32 %v6590_v2, %v12776_v28  ;;  %9638 = vtanh.f32 %v8593_v18  ;;  %v8595_v24 = vadd.f32 %v6882_v1, %v12780_v49  ;;  %7134 = vmatprep.subr.bf16.mxu0 %v9584_v21  ;;  %v9594_v2 = vld [vmem:[%s12939_s9 + $0xda0] ss:$28 sps:$4 sm:$0xff]  }
 0x58c   :  { %v9617_v34 = vpop.eup %9616  ;;  %7514 = vst [vmem:[#allocation2 + $0x50] sm:$0xff] %v9615_v56  ;;  %9640 = vtanh.f32 %v8578_v48  ;;  %v9599_v56 = vld [vmem:[%s12939_s9 + $0xddc] ss:$28 sps:$4 sm:$0xff]  }
 0x58d   :  { %v9619_v4 = vpop.eup %9618  ;;  %7518 = vst [vmem:[#allocation2 + $0x70] sm:$0xff] %v9617_v34  ;;  %9642 = vtanh.f32 %v8594_v58  ;;  %v6594_v43 = vpop.f32.mrb[52].mxu0 }
 0x58e   :  { %v9621_v7 = vpop.eup %9620  ;;  %7520 = vst [vmem:[#allocation2 + $0x80] sm:$0xff] %v9619_v4  ;;  %v6886_v60 = vpop.f32.mrb[92].mxu1  ;;  %9644 = vtanh.f32 %v8579_v16  ;;  %7135 = vmatpush1.bf16.msra.mxu0 %v9582_v61  ;;  %v8580_v29 = vadd.f32 %v6594_v43, %v12772_v57 }
 0x58f   :  { %v9623_v9 = vpop.eup %9622  ;;  %7519 = vst [vmem:[#allocation2 + $0x78] sm:$0xff] %v9621_v7  ;;  %v8596_v13 = vadd.f32 %v6886_v60, %v12765_v10  ;;  %v6596_v62 = vpop.f32.mrb[53].mxu0  ;;  %9646 = vtanh.f32 %v8595_v24  ;;  %7136 = vmatprep.subr.bf16.mxu0 %v9587_v25  ;;  %v9597_v24 = vld [vmem:[%s12939_s9 + $0xdd8] ss:$28 sps:$4 sm:$0xff]  }
 0x590   :  { %v9625_v37 = vpop.eup %9624  ;;  %7521 = vst [vmem:[#allocation2 + $0x88] sm:$0xff] %v9623_v9  ;;  %v6888_v23 = vpop.f32.mrb[93].mxu1  ;;  %v8581_v53 = vadd.f32 %v6596_v62, %v12776_v28  ;;  %9648 = vtanh.f32 %v8580_v29 }
 0x591   :  { %v9627_v63 = vpop.eup %9626  ;;  %7525 = vst [vmem:[#allocation2 + $0xa8] sm:$0xff] %v9625_v37  ;;  %v8597_v5 = vadd.f32 %v6888_v23, %v12780_v49  ;;  %v6598_v14 = vpop.f32.mrb[54].mxu0  ;;  %9650 = vtanh.f32 %v8596_v13 }
 0x592   :  { %v6890_v3 = vpop.f32.mrb[94].mxu1  ;;  %v9629_v44 = vpop.eup %9628  ;;  %7527 = vst [vmem:[#allocation2 + $0xb8] sm:$0xff] %v9627_v63  ;;  %v8582_v36 = vadd.f32 %v6598_v14, %v12772_v57  ;;  %9652 = vtanh.f32 %v8581_v53  ;;  %7137 = vmatpush1.bf16.msra.mxu0 %v9585_v20 }
 0x593   :  { %v6600_v52 = vpop.f32.mrb[55].mxu0  ;;  %v6892_v22 = vpop.f32.mrb[95].mxu1  ;;  %7526 = vst [vmem:[#allocation2 + $0xb0] sm:$0xff] %v9629_v44  ;;  %v8598_v8 = vadd.f32 %v6890_v3, %v12765_v10  ;;  %9654 = vtanh.f32 %v8597_v5  ;;  %7138 = vmatprep.subr.bf16.mxu0 %v9590_v6  ;;  %v9593_v10 = vld [vmem:[%s12939_s9 + $0xd6c] ss:$28 sps:$4 sm:$0xff]   ;;  %s9738_s9 = smov [#allocation2]  }
 0x594   :  { %v9631_v32 = vpop.eup %9630  ;;  %v8583_v41 = vadd.f32 %v6600_v52, %v12776_v28  ;;  %v8599_v57 = vadd.f32 %v6892_v22, %v12780_v49  ;;  %9656 = vtanh.f32 %v8582_v36  ;;  %s7565_s21 = sshll.u32 %s9738_s9, 4  ;;  %s7566_s21 = int_to_ptr.vmem [resolvable:$true] %s7565_s21 }
 0x595   :  { %v9633_v26 = vpop.eup %9632  ;;  %7528 = vst [vmem:[#allocation2 + $0xc0] sm:$0xff] %v9631_v32  ;;  %9658 = vtanh.f32 %v8598_v8  ;;  %s9713_s22 = scalar_lea.vmem %s7566_s21, 7168  ;;  %p9718_p1 = scmp.lt.s32.totalorder %s7566_s21, %s7566_s21 }
 0x596   :  { %v9635_v54 = vpop.eup %9634  ;;  %7532 = vst [vmem:[#allocation2 + $0xe0] sm:$0xff] %v9633_v26  ;;  %9660 = vtanh.f32 %v8583_v41  ;;  %7139 = vmatpush1.bf16.msra.mxu0 %v9588_v42  ;;  %v8400_v49 = vpop.f32.mrb[96].mxu1  ;;  %p9714_p0 = scmp.ne.s32.totalorder %s7566_s21, %s9713_s22  ;;  %p9719_p2 = scmp.lt.s32.totalorder %s9713_s22, %s9713_s22 }
 0x597   :  { %v9637_v0 = vpop.eup %9636  ;;  %7534 = vst [vmem:[#allocation2 + $0xf0] sm:$0xff] %v9635_v54  ;;  %9662 = vtanh.f32 %v8599_v57  ;;  %7140 = vmatprep.subr.bf16.mxu0 %v9593_v10  ;;  %v8401_v19 = vpop.f32.mrb[97].mxu1 }
 0x598   :  { %v9639_v11 = vpop.eup %9638  ;;  %7533 = vst [vmem:[#allocation2 + $0xe8] sm:$0xff] %v9637_v0  ;;  %v8402_v40 = vadd.f32 %v8401_v19, %v8400_v49  ;;  %v8403_v18 = vpop.f32.mrb[98].mxu1  ;;  %p9720_p3 = por %p9719_p2, %p9718_p1 }
 0x599   :  { %v9641_v28 = vpop.eup %9640  ;;  %7535 = vst [vmem:[#allocation2 + $0xf8] sm:$0xff] %v9639_v11  ;;  %v8404_v51 = vpop.f32.mrb[99].mxu1 }
 0x59a   :  { %v9643_v30 = vpop.eup %9642  ;;  %7539 = vst [vmem:[#allocation2 + $0x118] sm:$0xff] %v9641_v28  ;;  %v7222_v39 = vadd.f32 %v8402_v40, %v12872_v47  ;;  %7141 = vmatpush1.bf16.msra.mxu0 %v9591_v45  ;;  %v8405_v48 = vadd.f32 %v8404_v51, %v8403_v18  ;;  %p9721_p4 = pnand %p9720_p3, %p9714_p0 }
 0x59b   :  { %v9645_v50 = vpop.eup %9644  ;;  %7541 = vst [vmem:[#allocation2 + $0x128] sm:$0xff] %v9643_v30  ;;  %7142 = vmatprep.subr.bf16.mxu0 %v9596_v35 }
 0x59c   :  { %v9647_v17 = vpop.eup %9646  ;;  %7540 = vst [vmem:[#allocation2 + $0x120] sm:$0xff] %v9645_v50  ;;  %v7225_v34 = vadd.f32 %v8405_v48, %v12872_v47 }
 0x59d   :  { %v9649_v21 = vpop.eup %9648  ;;  %7542 = vst [vmem:[#allocation2 + $0x130] sm:$0xff] %v9647_v17 }
 0x59e   :  { %v9651_v1 = vpop.eup %9650  ;;  %7546 = vst [vmem:[#allocation2 + $0x150] sm:$0xff] %v9649_v21  ;;  %7143 = vmatpush1.bf16.msra.mxu0 %v9594_v2  ;;  %v8406_v4 = vpop.f32.mrb[100].mxu1 }
 0x59f   :  { %v9653_v58 = vpop.eup %9652  ;;  %7548 = vst [vmem:[#allocation2 + $0x160] sm:$0xff] %v9651_v1  ;;  %7144 = vmatprep.subr.bf16.mxu0 %v9599_v56  ;;  %v8407_v7 = vpop.f32.mrb[101].mxu1 }
 0x5a0   :  { %v9655_v16 = vpop.eup %9654  ;;  %7547 = vst [vmem:[#allocation2 + $0x158] sm:$0xff] %v9653_v58  ;;  %v8408_v43 = vadd.f32 %v8407_v7, %v8406_v4  ;;  %v8409_v60 = vpop.f32.mrb[102].mxu1 }
 0x5a1   :  { %v9657_v61 = vpop.eup %9656  ;;  %7549 = vst [vmem:[#allocation2 + $0x168] sm:$0xff] %v9655_v16  ;;  %v8410_v29 = vpop.f32.mrb[103].mxu1 }
 0x5a2   :  { %v9659_v25 = vpop.eup %9658  ;;  %7553 = vst [vmem:[#allocation2 + $0x188] sm:$0xff] %v9657_v61  ;;  %v7230_v13 = vadd.f32 %v8408_v43, %v12872_v47  ;;  %7145 = vmatpush1.bf16.msra.mxu0 %v9597_v24  ;;  %v8411_v62 = vadd.f32 %v8410_v29, %v8409_v60 }
 0x5a3   :  { %v9661_v9 = vpop.eup %9660  ;;  %7555 = vst [vmem:[#allocation2 + $0x198] sm:$0xff] %v9659_v25 }
 0x5a4   :  { %v9663_v37 = vpop.eup %9662  ;;  %7554 = vst [vmem:[#allocation2 + $0x190] sm:$0xff] %v9661_v9  ;;  %v7233_v23 = vadd.f32 %v8411_v62, %v12872_v47 }
 0x5a5   :  { %7556 = vst [vmem:[#allocation2 + $0x1a0] sm:$0xff] %v9663_v37  ;;  %7147 = vmatmul.mubr.bf16.vlgmr.msra.gmra.mrb[56].mxu0 %v12156_v27 }
 0x5a6   :  { %7156 = vmatprep.mubr.bf16.mxu0 %v12168_v59  ;;  %v8412_v20 = vpop.f32.mrb[104].mxu1 }
 0x5a7   :  { %v8413_v63 = vpop.f32.mrb[105].mxu1 }
 0x5a8   :  { %v8414_v53 = vadd.f32 %v8413_v63, %v8412_v20  ;;  %v8415_v5 = vpop.f32.mrb[106].mxu1 }
 0x5a9   :  { %v8416_v14 = vpop.f32.mrb[107].mxu1 }
 0x5aa   :  { %v7238_v3 = vadd.f32 %v8414_v53, %v12872_v47  ;;  %v8417_v6 = vadd.f32 %v8416_v14, %v8415_v5 }
 0x5ac   :  { %v7241_v44 = vadd.f32 %v8417_v6, %v12872_v47 }
 0x5ad   :  { %7157 = vmatmul.mubr.bf16.gmra.mrb[60].mxu0 %v12196_v55 }
 0x5ae   :  { %7166 = vmatprep.mubr.bf16.mxu0 %v12208_v12  ;;  %v8418_v36 = vpop.f32.mrb[108].mxu1 }
 0x5af   :  { %v8419_v52 = vpop.f32.mrb[109].mxu1 }
 0x5b0   :  { %v8420_v22 = vadd.f32 %v8419_v52, %v8418_v36  ;;  %v8421_v27 = vpop.f32.mrb[110].mxu1 }
 0x5b1   :  { %v8422_v32 = vpop.f32.mrb[111].mxu1 }
 0x5b2   :  { %v7246_v59 = vadd.f32 %v8420_v22, %v12872_v47  ;;  %v8423_v8 = vadd.f32 %v8422_v32, %v8421_v27 }
 0x5b4   :  { %v7249_v26 = vadd.f32 %v8423_v8, %v12872_v47 }
 0x5b5   :  { %7167 = vmatmul.mubr.bf16.gmra.mrb[64].mxu0 %v12236_v15 }
 0x5b6   :  { %7176 = vmatprep.mubr.bf16.mxu0 %v12248_v46 }
 0x5b7   :  { %v8440_v41 = vpop.f32.mrb[112].mxu1 }
 0x5b8   :  { %v8441_v42 = vpop.f32.mrb[113].mxu1 }
 0x5b9   :  { %v8442_v54 = vadd.f32 %v8441_v42, %v8440_v41  ;;  %v8443_v55 = vpop.f32.mrb[114].mxu1 }
 0x5ba   :  { %v8444_v57 = vpop.f32.mrb[115].mxu1 }
 0x5bb   :  { %v7287_v12 = vadd.f32 %v8442_v54, %v7222_v39  ;;  %v8445_v10 = vadd.f32 %v8444_v57, %v8443_v55 }
 0x5bd   :  { %v7290_v0 = vadd.f32 %v8445_v10, %v7225_v34  ;;  %7177 = vmatmul.mubr.bf16.gmra.mrb[68].mxu0 %v12272_v38 }
 0x5bf   :  { %v8446_v11 = vpop.f32.mrb[116].mxu1 }
 0x5c0   :  { %v8447_v28 = vpop.f32.mrb[117].mxu1 }
 0x5c1   :  { %v8448_v49 = vadd.f32 %v8447_v28, %v8446_v11  ;;  %v8449_v45 = vpop.f32.mrb[118].mxu1 }
 0x5c2   :  { %v8450_v30 = vpop.f32.mrb[119].mxu1 }
 0x5c3   :  { %v7295_v47 = vadd.f32 %v8448_v49, %v7230_v13  ;;  %v8451_v19 = vadd.f32 %v8450_v30, %v8449_v45 }
 0x5c5   :  { %v7298_v15 = vadd.f32 %v8451_v19, %v7233_v23 }
 0x5c7   :  { %v8452_v35 = vpop.f32.mrb[120].mxu1 }
 0x5c8   :  { %v8453_v46 = vpop.f32.mrb[121].mxu1 }
 0x5c9   :  { %v8454_v50 = vadd.f32 %v8453_v46, %v8452_v35  ;;  %v8455_v40 = vpop.f32.mrb[122].mxu1 }
 0x5ca   :  { %v8456_v18 = vpop.f32.mrb[123].mxu1 }
 0x5cb   :  { %v7303_v17 = vadd.f32 %v8454_v50, %v7238_v3  ;;  %v8457_v51 = vadd.f32 %v8456_v18, %v8455_v40 }
 0x5cd   :  { %v7306_v21 = vadd.f32 %v8457_v51, %v7241_v44 }
 0x5cf   :  { %v8458_v39 = vpop.f32.mrb[124].mxu1 }
 0x5d0   :  { %v8459_v48 = vpop.f32.mrb[125].mxu1 }
 0x5d1   :  { %v8460_v2 = vadd.f32 %v8459_v48, %v8458_v39  ;;  %v8461_v38 = vpop.f32.mrb[126].mxu1 }
 0x5d2   :  { %v8462_v1 = vpop.f32.mrb[127].mxu1 }
 0x5d3   :  { %v7311_v56 = vadd.f32 %v8460_v2, %v7246_v59  ;;  %v8463_v58 = vadd.f32 %v8462_v1, %v8461_v38 }
 0x5d5   :  { %v7314_v34 = vadd.f32 %v8463_v58, %v7249_v26 }
 0x5d8   :  { %v8480_v16 = vpop.f32.mrb[128].mxu1 }
 0x5d9   :  { %v8481_v61 = vpop.f32.mrb[129].mxu1 }
 0x5da   :  { %v8482_v4 = vadd.f32 %v8481_v61, %v8480_v16  ;;  %v8483_v24 = vpop.f32.mrb[130].mxu1 }
 0x5db   :  { %v8484_v25 = vpop.f32.mrb[131].mxu1 }
 0x5dc   :  { %v7352_v7 = vadd.f32 %v8482_v4, %v7287_v12  ;;  %v8485_v9 = vadd.f32 %v8484_v25, %v8483_v24 }
 0x5de   :  { %v7355_v43 = vadd.f32 %v8485_v9, %v7290_v0 }
 0x5e0   :  { %v8486_v60 = vpop.f32.mrb[132].mxu1 }
 0x5e1   :  { %v8487_v37 = vpop.f32.mrb[133].mxu1 }
 0x5e2   :  { %v8488_v29 = vadd.f32 %v8487_v37, %v8486_v60  ;;  %v8489_v13 = vpop.f32.mrb[134].mxu1 }
 0x5e3   :  { %v8490_v62 = vpop.f32.mrb[135].mxu1 }
 0x5e4   :  { %v7360_v23 = vadd.f32 %v8488_v29, %v7295_v47  ;;  %v8491_v20 = vadd.f32 %v8490_v62, %v8489_v13  ;;  %v12946_v29 = vsub.s32 4, %v9891_v33  ;;  %v12947_v62 = vsub.s32 5, %v9891_v33 }
 0x5e6   :  { %v7363_v63 = vadd.f32 %v8491_v20, %v7298_v15  ;;  %v3991_v13 = vrot.slane %v12758_v31, %v12946_v29 }
 0x5e8   :  { %v8492_v53 = vpop.f32.mrb[136].mxu1 }
 0x5e9   :  { %v8493_v5 = vpop.f32.mrb[137].mxu1 }
 0x5ea   :  { %v8494_v14 = vadd.f32 %v8493_v5, %v8492_v53  ;;  %v8495_v3 = vpop.f32.mrb[138].mxu1 }
 0x5eb   :  { %v8496_v6 = vpop.f32.mrb[139].mxu1 }
 0x5ec   :  { %v7368_v44 = vadd.f32 %v8494_v14, %v7303_v17  ;;  %v8497_v36 = vadd.f32 %v8496_v6, %v8495_v3 }
 0x5ee   :  { %v7371_v52 = vadd.f32 %v8497_v36, %v7306_v21 }
 0x5f0   :  { %v8498_v22 = vpop.f32.mrb[140].mxu1 }
 0x5f1   :  { %v8499_v27 = vpop.f32.mrb[141].mxu1 }
 0x5f2   :  { %v8500_v32 = vadd.f32 %v8499_v27, %v8498_v22  ;;  %v8501_v59 = vpop.f32.mrb[142].mxu1 }
 0x5f3   :  { %v8502_v8 = vpop.f32.mrb[143].mxu1 }
 0x5f4   :  { %v7376_v26 = vadd.f32 %v8500_v32, %v7311_v56  ;;  %v8503_v41 = vadd.f32 %v8502_v8, %v8501_v59 }
 0x5f6   :  { %v7379_v42 = vadd.f32 %v8503_v41, %v7314_v34 }
 0x5f8   :  { %v8520_v54 = vpop.f32.mrb[144].mxu1 }
 0x5f9   :  { %v8521_v55 = vpop.f32.mrb[145].mxu1 }
 0x5fa   :  { %v8522_v57 = vadd.f32 %v8521_v55, %v8520_v54  ;;  %v8523_v12 = vpop.f32.mrb[146].mxu1 }
 0x5fb   :  { %v8524_v10 = vpop.f32.mrb[147].mxu1 }
 0x5fc   :  { %v7417_v0 = vadd.f32 %v8522_v57, %v7352_v7  ;;  %v8525_v11 = vadd.f32 %v8524_v10, %v8523_v12 }
 0x5fe   :  { %9664 = vtanh.f32 %v7417_v0  ;;  %v7420_v28 = vadd.f32 %v8525_v11, %v7355_v43 }
 0x600   :  { %9666 = vtanh.f32 %v7420_v28  ;;  %v8526_v49 = vpop.f32.mrb[148].mxu1 }
 0x601   :  { %v8527_v45 = vpop.f32.mrb[149].mxu1 }
 0x602   :  { %v8528_v30 = vadd.f32 %v8527_v45, %v8526_v49  ;;  %v8529_v47 = vpop.f32.mrb[150].mxu1 }
 0x603   :  { %v8530_v19 = vpop.f32.mrb[151].mxu1 }
 0x604   :  { %v7425_v15 = vadd.f32 %v8528_v30, %v7360_v23  ;;  %v8531_v35 = vadd.f32 %v8530_v19, %v8529_v47  ;;  %v3995_v23 = vrot.slane %v12758_v31, %v12947_v62 }
 0x606   :  { %9668 = vtanh.f32 %v7425_v15  ;;  %v7428_v46 = vadd.f32 %v8531_v35, %v7363_v63 }
 0x608   :  { %v9665_v50 = vpop.eup %9664  ;;  %9670 = vtanh.f32 %v7428_v46  ;;  %v8532_v40 = vpop.f32.mrb[152].mxu1 }
 0x609   :  { %7510 = vst.msk [vmem:[#allocation2 + $0x30] sm:$0xff] %vm7509_vm0, %v9665_v50  ;;  %v8533_v18 = vpop.f32.mrb[153].mxu1 }
 0x60a   :  { %v9667_v17 = vpop.eup %9666  ;;  %v8534_v51 = vadd.f32 %v8533_v18, %v8532_v40  ;;  %v8535_v21 = vpop.f32.mrb[154].mxu1 }
 0x60b   :  { %7517 = vst.msk [vmem:[#allocation2 + $0x68] sm:$0xff] %vm7509_vm0, %v9667_v17  ;;  %v8536_v39 = vpop.f32.mrb[155].mxu1 }
 0x60c   :  { %v7433_v48 = vadd.f32 %v8534_v51, %v7368_v44  ;;  %v8537_v2 = vadd.f32 %v8536_v39, %v8535_v21 }
 0x60e   :  { %9672 = vtanh.f32 %v7433_v48  ;;  %v7436_v38 = vadd.f32 %v8537_v2, %v7371_v52 }
 0x610   :  { %v9669_v1 = vpop.eup %9668  ;;  %9674 = vtanh.f32 %v7436_v38  ;;  %v8538_v56 = vpop.f32.mrb[156].mxu1 }
 0x611   :  { %7524 = vst.msk [vmem:[#allocation2 + $0xa0] sm:$0xff] %vm7509_vm0, %v9669_v1  ;;  %v8539_v58 = vpop.f32.mrb[157].mxu1 }
 0x612   :  { %v9671_v34 = vpop.eup %9670  ;;  %v8540_v16 = vadd.f32 %v8539_v58, %v8538_v56  ;;  %v8541_v61 = vpop.f32.mrb[158].mxu1 }
 0x613   :  { %7531 = vst.msk [vmem:[#allocation2 + $0xd8] sm:$0xff] %vm7509_vm0, %v9671_v34  ;;  %v8542_v4 = vpop.f32.mrb[159].mxu1 }
 0x614   :  { %v7441_v24 = vadd.f32 %v8540_v16, %v7376_v26  ;;  %v8543_v25 = vadd.f32 %v8542_v4, %v8541_v61 }
 0x616   :  { %9676 = vtanh.f32 %v7441_v24  ;;  %v7444_v7 = vadd.f32 %v8543_v25, %v7379_v42 }
 0x618   :  { %v9673_v9 = vpop.eup %9672  ;;  %9678 = vtanh.f32 %v7444_v7 }
 0x619   :  { %7538 = vst.msk [vmem:[#allocation2 + $0x110] sm:$0xff] %vm7509_vm0, %v9673_v9 }
 0x61a   :  { %v9675_v43 = vpop.eup %9674 }
 0x61b   :  { %7545 = vst.msk [vmem:[#allocation2 + $0x148] sm:$0xff] %vm7509_vm0, %v9675_v43 }
 0x620   :  { %v9677_v60 = vpop.eup %9676 }
 0x621   :  { %7552 = vst.msk [vmem:[#allocation2 + $0x180] sm:$0xff] %vm7509_vm0, %v9677_v60 }
 0x622   :  { %v9679_v37 = vpop.eup %9678 }
 0x623   :  { %7559 = vst.msk [vmem:[#allocation2 + $0x1b8] sm:$0xff] %vm7509_vm0, %v9679_v37 }
 0x678   :  { %v7148_v20 = vpop.f32.mrb[56].mxu0 }
 0x679   :  { %v8600_v63 = vadd.f32 %v7148_v20, %v3991_v13  ;;  %v7150_v53 = vpop.f32.mrb[57].mxu0 }
 0x67a   :  { %v8601_v5 = vadd.f32 %v7150_v53, %v3995_v23  ;;  %v7152_v14 = vpop.f32.mrb[58].mxu0 }
 0x67b   :  { %9680 = vtanh.f32 %v8600_v63  ;;  %v8602_v3 = vadd.f32 %v7152_v14, %v3991_v13  ;;  %v7154_v6 = vpop.f32.mrb[59].mxu0 }
 0x67c   :  { %9682 = vtanh.f32 %v8601_v5  ;;  %v8603_v44 = vadd.f32 %v7154_v6, %v3995_v23 }
 0x67d   :  { %9684 = vtanh.f32 %v8602_v3 }
 0x67e   :  { %9686 = vtanh.f32 %v8603_v44 }
 0x680   :  { %v7158_v36 = vpop.f32.mrb[60].mxu0 }
 0x681   :  { %v8604_v52 = vadd.f32 %v7158_v36, %v3991_v13  ;;  %v7160_v22 = vpop.f32.mrb[61].mxu0 }
 0x682   :  { %v8605_v27 = vadd.f32 %v7160_v22, %v3995_v23  ;;  %v7162_v32 = vpop.f32.mrb[62].mxu0 }
 0x683   :  { %9688 = vtanh.f32 %v8604_v52  ;;  %v8606_v33 = vadd.f32 %v7162_v32, %v3991_v13  ;;  %v7164_v31 = vpop.f32.mrb[63].mxu0 }
 0x684   :  { %9690 = vtanh.f32 %v8605_v27  ;;  %v8607_v59 = vadd.f32 %v7164_v31, %v3995_v23 }
 0x685   :  { %v9681_v8 = vpop.eup %9680  ;;  %9692 = vtanh.f32 %v8606_v33 }
 0x686   :  { %v9683_v26 = vpop.eup %9682  ;;  %7507 = vst [vmem:[#allocation2 + $0x20] sm:$0xff] %v9681_v8  ;;  %9694 = vtanh.f32 %v8607_v59 }
 0x687   :  { %v9685_v41 = vpop.eup %9684  ;;  %7508 = vst [vmem:[#allocation2 + $0x28] sm:$0xff] %v9683_v26 }
 0x688   :  { %v9687_v42 = vpop.eup %9686  ;;  %7515 = vst [vmem:[#allocation2 + $0x58] sm:$0xff] %v9685_v41  ;;  %v7168_v54 = vpop.f32.mrb[64].mxu0 }
 0x689   :  { %7516 = vst [vmem:[#allocation2 + $0x60] sm:$0xff] %v9687_v42  ;;  %v8608_v55 = vadd.f32 %v7168_v54, %v3991_v13  ;;  %v7170_v57 = vpop.f32.mrb[65].mxu0 }
 0x68a   :  { %v8609_v12 = vadd.f32 %v7170_v57, %v3995_v23  ;;  %v7172_v10 = vpop.f32.mrb[66].mxu0 }
 0x68b   :  { %9696 = vtanh.f32 %v8608_v55  ;;  %v8610_v0 = vadd.f32 %v7172_v10, %v3991_v13  ;;  %v7174_v11 = vpop.f32.mrb[67].mxu0 }
 0x68c   :  { %9698 = vtanh.f32 %v8609_v12  ;;  %v8611_v28 = vadd.f32 %v7174_v11, %v3995_v23 }
 0x68d   :  { %v9689_v49 = vpop.eup %9688  ;;  %9700 = vtanh.f32 %v8610_v0 }
 0x68e   :  { %v9691_v45 = vpop.eup %9690  ;;  %7522 = vst [vmem:[#allocation2 + $0x90] sm:$0xff] %v9689_v49  ;;  %9702 = vtanh.f32 %v8611_v28 }
 0x68f   :  { %v9693_v30 = vpop.eup %9692  ;;  %7523 = vst [vmem:[#allocation2 + $0x98] sm:$0xff] %v9691_v45 }
 0x690   :  { %v9695_v47 = vpop.eup %9694  ;;  %7529 = vst [vmem:[#allocation2 + $0xc8] sm:$0xff] %v9693_v30  ;;  %v7178_v19 = vpop.f32.mrb[68].mxu0 }
 0x691   :  { %7530 = vst [vmem:[#allocation2 + $0xd0] sm:$0xff] %v9695_v47  ;;  %v8612_v15 = vadd.f32 %v7178_v19, %v3991_v13  ;;  %v7180_v35 = vpop.f32.mrb[69].mxu0 }
 0x692   :  { %v8613_v46 = vadd.f32 %v7180_v35, %v3995_v23  ;;  %v7182_v50 = vpop.f32.mrb[70].mxu0 }
 0x693   :  { %9704 = vtanh.f32 %v8612_v15  ;;  %v8614_v40 = vadd.f32 %v7182_v50, %v3991_v13  ;;  %v7184_v18 = vpop.f32.mrb[71].mxu0 }
 0x694   :  { %9706 = vtanh.f32 %v8613_v46  ;;  %v8615_v17 = vadd.f32 %v7184_v18, %v3995_v23 }
 0x695   :  { %v9697_v51 = vpop.eup %9696  ;;  %9708 = vtanh.f32 %v8614_v40 }
 0x696   :  { %v9699_v21 = vpop.eup %9698  ;;  %7536 = vst [vmem:[#allocation2 + $0x100] sm:$0xff] %v9697_v51  ;;  %9710 = vtanh.f32 %v8615_v17 }
 0x697   :  { %v9701_v39 = vpop.eup %9700  ;;  %7537 = vst [vmem:[#allocation2 + $0x108] sm:$0xff] %v9699_v21 }
 0x698   :  { %v9703_v48 = vpop.eup %9702  ;;  %7543 = vst [vmem:[#allocation2 + $0x138] sm:$0xff] %v9701_v39 }
 0x699   :  { %7544 = vst [vmem:[#allocation2 + $0x140] sm:$0xff] %v9703_v48 }
 0x69d   :  { %v9705_v2 = vpop.eup %9704 }
 0x69e   :  { %v9707_v38 = vpop.eup %9706  ;;  %7550 = vst [vmem:[#allocation2 + $0x170] sm:$0xff] %v9705_v2 }
 0x69f   :  { %v9709_v1 = vpop.eup %9708  ;;  %7551 = vst [vmem:[#allocation2 + $0x178] sm:$0xff] %v9707_v38 }
 0x6a0   :  { %v9711_v56 = vpop.eup %9710  ;;  %7557 = vst [vmem:[#allocation2 + $0x1a8] sm:$0xff] %v9709_v1 }
 0x6a1   :  { %7558 = vst [vmem:[#allocation2 + $0x1b0] sm:$0xff] %v9711_v56 }
 0x6a2   :  { %9724 = shalt.err (!%p9721_p4)
}
 0x6a3   :  { %s9725_s24 = scalar_lea.hbm %s12941_s11, 7168 }
 0x6a4   :  { %p9726_p5 = scmp.ne.s32.totalorder %s12941_s11, %s9725_s24  ;;  %p9729_p6 = scmp.lt.u32.totalorder %s9725_s24, %s12941_s11 }
 0x6a6   :  { %p9731_p7 = pnand %p9729_p6, %p9726_p5 }
 0x6a8   :  { %9734 = shalt.err (!%p9731_p7)
}
 0x6a9   :  { %s9739_s29 = smov 896   ;;  %s9740_s7 = smov 56  }
 0x6aa   :  { %7571 = dma.vmem_to_hbm [thread:$0]  %s7566_s21, 7168, %s12941_s11, [#allocation3], %s9739_s29, %s9739_s29, %s9740_s7  }
 0x6ab   :  { %9735 = dma.done.wait [#allocation3], 7168  }
 0x6ac   :  { %9736 = vsyncadd [#allocation3], 4294960128 }
 0x6ad   :  { %7575 = vsyncpa [#allocation3], 1 }

</bundles_post_ra>
